<compile_context>
chip_gen: v7x
topology: tpu7x:2x2x1
jax: 0.10.0
libtpu: 0.0.40
codegen_flags: <defaults>
</compile_context>

<pallas_src>
import functools

import jax
import jax.numpy as jnp
import numpy as np
from jax.experimental import pallas as pl
from jax.experimental.pallas import tpu as pltpu


def _conv3x3_rows(in_rows, w_ref, b_ref, mask_rows, *, cin, cout, W, HW):
    """3x3 'SAME' conv, channels-major flat layout, VPU scalar-FMA path.

    in_rows:   list of `cin` arrays, each (1, HW) float32.
    w_ref:     SMEM ref, flat (9*cin*cout,) float32; index [((t*cin)+ci)*cout+co]
               with tap order t = (dy+1)*3 + (dx+1) (== (3,3,ci,co).reshape(-1)).
    b_ref:     SMEM ref, (cout,) float32.
    mask_rows: list of 9 (1, HW) float32 0/1 edge-validity masks (one per tap).
    returns:   list of `cout` arrays, each (1, HW) float32.
    """
    # Bias-as-init: no extra full-tile add at the end.
    outs = [jnp.full((1, HW), b_ref[co], jnp.float32) for co in range(cout)]
    t = 0
    for dy in (-1, 0, 1):
        for dx in (-1, 0, 1):
            off = dy * W + dx
            for ci in range(cin):
                row = in_rows[ci]
                if off != 0:
                    # shifted[p] = row[p + off]; wrapped lanes are zeroed by the mask.
                    row = pltpu.roll(row, (-off) % HW, 1)
                    row = row * mask_rows[t]
                base = (t * cin + ci) * cout
                for co in range(cout):
                    outs[co] = outs[co] + w_ref[base + co] * row
            t += 1
    return outs


def _invblock_kernel(x_ref, mask_ref, winv_ref, fw_ref, fb_ref, hgw_ref, hgb_ref,
                     out_ref, *, H, W, C1, C2, clamp):
    C = C1 + C2
    HW = H * W

    x = x_ref[0].astype(jnp.float32)                       # (C, HW), lane-dense
    x_rows = [x[c:c + 1, :] for c in range(C)]
    mask_rows = [mask_ref[t:t + 1, :] for t in range(9)]   # reused by both convs

    # --- InvertibleConv1x1 (flow permutation): y[co] = sum_ci winv[co, ci] * x[ci]
    perm_rows = []
    for co in range(C):
        acc = winv_ref[co, 0] * x_rows[0]
        for ci in range(1, C):
            acc = acc + winv_ref[co, ci] * x_rows[ci]
        perm_rows.append(acc)
    x1_rows = perm_rows[:C1]
    x2_rows = perm_rows[C1:]

    # --- y1 = x1 + F(x2)
    f_rows = _conv3x3_rows(x2_rows, fw_ref, fb_ref, mask_rows,
                           cin=C2, cout=C1, W=W, HW=HW)
    y1_rows = [a + b for a, b in zip(x1_rows, f_rows)]

    # --- fused H|G conv over y1: first C2 outputs = H(y1), last C2 = G(y1)
    hg_rows = _conv3x3_rows(y1_rows, hgw_ref, hgb_ref, mask_rows,
                            cin=C1, cout=2 * C2, W=W, HW=HW)
    h_rows = hg_rows[:C2]
    g_rows = hg_rows[C2:]

    # --- direct lane-dense stores (no concatenate / reshape)
    for i in range(C1):
        out_ref[0, i:i + 1, :] = y1_rows[i].astype(out_ref.dtype)
    for i in range(C2):
        # clamp * (2*sigmoid(h) - 1) == clamp * tanh(h / 2)  (single EUP op)
        s = clamp * jnp.tanh(0.5 * h_rows[i])
        y2 = x2_rows[i] * jnp.exp(s) + g_rows[i]
        out_ref[0, C1 + i:C1 + i + 1, :] = y2.astype(out_ref.dtype)


def invblock_forward(x_nchw, winv, fw, fb, hw, hb, gw, gb, *, clamp=0.8):
    """InvBlock.forward. x_nchw: (N, C, H, W). Returns (N, C, H, W)."""
    N, C, H, W = x_nchw.shape
    C1 = fw.shape[-1]          # F: split_len2 -> split_len1
    C2 = C - C1
    HW = H * W
    assert fw.shape == (3, 3, C2, C1)
    assert hw.shape == (3, 3, C1, C2) and gw.shape == (3, 3, C1, C2)

    # Channels-major, spatial flattened onto the lane axis (pure reshape, no transpose).
    x_flat = x_nchw.reshape(N, C, HW)

    # Weight prep (hoisted casts, flattened lane-friendly slabs, H|G fused).
    winv_f = winv.astype(jnp.float32)                                       # (C, C)
    fw_f = fw.astype(jnp.float32).reshape(-1)                               # (9*C2*C1,)
    fb_f = fb.astype(jnp.float32)                                           # (C1,)
    hgw_f = jnp.concatenate([hw, gw], axis=-1).astype(jnp.float32).reshape(-1)  # (9*C1*2C2,)
    hgb_f = jnp.concatenate([hb, gb]).astype(jnp.float32)                   # (2*C2,)

    # Precomputed 3x3 tap edge-validity masks (one (1, HW) 0/1 row per tap).
    hh, ww = np.meshgrid(np.arange(H), np.arange(W), indexing="ij")
    masks = []
    for dy in (-1, 0, 1):
        for dx in (-1, 0, 1):
            valid = ((hh + dy >= 0) & (hh + dy < H) &
                     (ww + dx >= 0) & (ww + dx < W))
            masks.append(valid.reshape(-1).astype(np.float32))
    mask_arr = jnp.asarray(np.stack(masks, axis=0))                         # (9, HW)

    kernel = functools.partial(_invblock_kernel, H=H, W=W, C1=C1, C2=C2, clamp=clamp)

    smem = pl.BlockSpec(memory_space=pltpu.MemorySpace.SMEM)

    flops = N * HW * (2 * C * C + 2 * 9 * C2 * C1 + 2 * 9 * C1 * (2 * C2) + 8 * C2)
    transc = N * HW * 2 * C2
    bytes_accessed = 2 * N * C * HW * 4 + 4 * int(
        winv_f.size + fw_f.size + fb_f.size + hgw_f.size + hgb_f.size + mask_arr.size)
    cost = pl.CostEstimate(flops=int(flops), transcendentals=int(transc),
                           bytes_accessed=int(bytes_accessed))

    out_flat = pl.pallas_call(
        kernel,
        out_shape=jax.ShapeDtypeStruct((N, C, HW), x_nchw.dtype),
        grid_spec=pltpu.PrefetchScalarGridSpec(
            num_scalar_prefetch=0,
            grid=(N,),
            in_specs=[
                pl.BlockSpec((1, C, HW), lambda n: (n, 0, 0)),   # x (lane-dense)
                pl.BlockSpec((9, HW), lambda n: (0, 0)),         # tap masks (resident)
                smem,                                            # invconv W   (C, C)
                smem, smem,                                      # F weights / bias
                smem, smem,                                      # fused H|G weights / bias
            ],
            out_specs=pl.BlockSpec((1, C, HW), lambda n: (n, 0, 0)),
        ),
        compiler_params=pltpu.CompilerParams(
            dimension_semantics=("parallel",),
            vmem_limit_bytes=32 * 1024 * 1024),
        cost_estimate=cost,
    )(x_flat, mask_arr, winv_f, fw_f, fb_f, hgw_f, hgb_f)

    return out_flat.reshape(N, C, H, W)


def _ref_forward(x_nchw, winv, fw, fb, hw, hb, gw, gb, *, clamp=0.8):
    """Pure-JAX reference (NCHW semantics, mirrors the PyTorch forward)."""
    C1 = fw.shape[-1]
    x = jnp.einsum('oc,nchw->nohw', winv, x_nchw)
    x1, x2 = x[:, :C1], x[:, C1:]

    def conv(inp_nchw, w_hwio, b):
        inp = jnp.transpose(inp_nchw, (0, 2, 3, 1))
        out = jax.lax.conv_general_dilated(
            inp, w_hwio, window_strides=(1, 1), padding='SAME',
            dimension_numbers=('NHWC', 'HWIO', 'NHWC')) + b.reshape(1, 1, 1, -1)
        return jnp.transpose(out, (0, 3, 1, 2))

    y1 = x1 + conv(x2, fw, fb)
    s = clamp * (jax.nn.sigmoid(conv(y1, hw, hb)) * 2.0 - 1.0)
    y2 = x2 * jnp.exp(s) + conv(y1, gw, gb)
    return jnp.concatenate([y1, y2], axis=1)


if __name__ == "__main__":
    # Small shapes consistent with the module: channel_num=4, channel_split_num=2.
    N, C, H, W = 2, 4, 16, 16
    C1, C2 = 2, C - 2
    clamp = 0.8

    key = jax.random.PRNGKey(0)
    kx, kw, kf, kfb, kh, khb, kg, kgb = jax.random.split(key, 8)

    x = jax.random.normal(kx, (N, C, H, W), jnp.float32)

    # InvertibleConv1x1 init (LU_decomposed recomposes back to the same random
    # orthogonal matrix at init, so initialize W directly as orthogonal).
    winv = jnp.linalg.qr(jax.random.normal(kw, (C, C), jnp.float32))[0]

    # Subnets F: C2->C1, H: C1->C2, G: C1->C2 (3x3 conv weights in HWIO layout).
    fw = 0.1 * jax.random.normal(kf, (3, 3, C2, C1), jnp.float32)
    fb = 0.1 * jax.random.normal(kfb, (C1,), jnp.float32)
    hw = 0.1 * jax.random.normal(kh, (3, 3, C1, C2), jnp.float32)
    hb = 0.1 * jax.random.normal(khb, (C2,), jnp.float32)
    gw = 0.1 * jax.random.normal(kg, (3, 3, C1, C2), jnp.float32)
    gb = 0.1 * jax.random.normal(kgb, (C2,), jnp.float32)

    out = invblock_forward(x, winv, fw, fb, hw, hb, gw, gb, clamp=clamp)
    out = jax.block_until_ready(out)

    ref = _ref_forward(x, winv, fw, fb, hw, hb, gw, gb, clamp=clamp)
    assert out.shape == (N, C, H, W)
    assert jnp.allclose(out, ref, atol=1e-4, rtol=1e-4), (
        float(jnp.max(jnp.abs(out - ref))))

    print("KERNEL_OK")
</pallas_src>

<mosaic_0001>
module attributes {stable_mosaic.version = 11 : i64} {
  func.func @_invblock_kernel(%arg0: i32, %arg1: memref<1x4x256xf32, #tpu.memory_space<vmem>>, %arg2: memref<9x256xf32, #tpu.memory_space<vmem>>, %arg3: memref<4x4xf32, #tpu.memory_space<smem>>, %arg4: memref<36xf32, #tpu.memory_space<smem>>, %arg5: memref<2xf32, #tpu.memory_space<smem>>, %arg6: memref<72xf32, #tpu.memory_space<smem>>, %arg7: memref<4xf32, #tpu.memory_space<smem>>, %arg8: memref<1x4x256xf32, #tpu.memory_space<vmem>>) attributes {dimension_semantics = [#tpu.dimension_semantics<parallel>], iteration_bounds = array<i64: 2>, scalar_prefetch = 0 : i64, scratch_operands = 0 : i64, tpu.core_type = #tpu.core_type<tc>, window_params = [{transform_indices = @transform_0, window_bounds = array<i64: 1, 4, 256>}, {pipeline_mode = #tpu.pipeline_mode<synchronous>, transform_indices = @transform_1, window_bounds = array<i64: 9, 256>}, {transform_indices = @transform_2, window_bounds = array<i64: 4, 4>}, {transform_indices = @transform_3, window_bounds = array<i64: 36>}, {transform_indices = @transform_4, window_bounds = array<i64: 2>}, {transform_indices = @transform_5, window_bounds = array<i64: 72>}, {transform_indices = @transform_6, window_bounds = array<i64: 4>}, {transform_indices = @transform_7, window_bounds = array<i64: 1, 4, 256>}]} {
    %c0 = arith.constant 0 : index
    %c0_0 = arith.constant 0 : index
    %c0_1 = arith.constant 0 : index
    %0 = vector.load %arg1[%c0, %c0_0, %c0_1] : memref<1x4x256xf32, #tpu.memory_space<vmem>>, vector<1x4x256xf32>
    %1 = vector.shape_cast %0 : vector<1x4x256xf32> to vector<4x256xf32>
    %2 = vector.extract_strided_slice %1 {offsets = [0, 0], sizes = [1, 256], strides = [1, 1]} : vector<4x256xf32> to vector<1x256xf32>
    %3 = vector.extract_strided_slice %1 {offsets = [1, 0], sizes = [1, 256], strides = [1, 1]} : vector<4x256xf32> to vector<1x256xf32>
    %4 = vector.extract_strided_slice %1 {offsets = [2, 0], sizes = [1, 256], strides = [1, 1]} : vector<4x256xf32> to vector<1x256xf32>
    %5 = vector.extract_strided_slice %1 {offsets = [3, 0], sizes = [1, 256], strides = [1, 1]} : vector<4x256xf32> to vector<1x256xf32>
    %c0_2 = arith.constant 0 : index
    %c0_3 = arith.constant 0 : index
    %6 = vector.load %arg2[%c0_2, %c0_3] : memref<9x256xf32, #tpu.memory_space<vmem>>, vector<1x256xf32>
    %c1 = arith.constant 1 : index
    %c0_4 = arith.constant 0 : index
    %7 = vector.load %arg2[%c1, %c0_4] : memref<9x256xf32, #tpu.memory_space<vmem>>, vector<1x256xf32>
    %c2 = arith.constant 2 : index
    %c0_5 = arith.constant 0 : index
    %8 = vector.load %arg2[%c2, %c0_5] : memref<9x256xf32, #tpu.memory_space<vmem>>, vector<1x256xf32>
    %c3 = arith.constant 3 : index
    %c0_6 = arith.constant 0 : index
    %9 = vector.load %arg2[%c3, %c0_6] : memref<9x256xf32, #tpu.memory_space<vmem>>, vector<1x256xf32>
    %c5 = arith.constant 5 : index
    %c0_7 = arith.constant 0 : index
    %10 = vector.load %arg2[%c5, %c0_7] : memref<9x256xf32, #tpu.memory_space<vmem>>, vector<1x256xf32>
    %c6 = arith.constant 6 : index
    %c0_8 = arith.constant 0 : index
    %11 = vector.load %arg2[%c6, %c0_8] : memref<9x256xf32, #tpu.memory_space<vmem>>, vector<1x256xf32>
    %c7 = arith.constant 7 : index
    %c0_9 = arith.constant 0 : index
    %12 = vector.load %arg2[%c7, %c0_9] : memref<9x256xf32, #tpu.memory_space<vmem>>, vector<1x256xf32>
    %c8 = arith.constant 8 : index
    %c0_10 = arith.constant 0 : index
    %13 = vector.load %arg2[%c8, %c0_10] : memref<9x256xf32, #tpu.memory_space<vmem>>, vector<1x256xf32>
    %c0_11 = arith.constant 0 : index
    %c0_12 = arith.constant 0 : index
    %14 = memref.load %arg3[%c0_11, %c0_12] : memref<4x4xf32, #tpu.memory_space<smem>>
    %15 = vector.broadcast %14 : f32 to vector<1x256xf32>
    %16 = arith.mulf %15, %2 : vector<1x256xf32>
    %c0_13 = arith.constant 0 : index
    %c1_14 = arith.constant 1 : index
    %17 = memref.load %arg3[%c0_13, %c1_14] : memref<4x4xf32, #tpu.memory_space<smem>>
    %18 = vector.broadcast %17 : f32 to vector<1x256xf32>
    %19 = arith.mulf %18, %3 : vector<1x256xf32>
    %20 = arith.addf %16, %19 : vector<1x256xf32>
    %c0_15 = arith.constant 0 : index
    %c2_16 = arith.constant 2 : index
    %21 = memref.load %arg3[%c0_15, %c2_16] : memref<4x4xf32, #tpu.memory_space<smem>>
    %22 = vector.broadcast %21 : f32 to vector<1x256xf32>
    %23 = arith.mulf %22, %4 : vector<1x256xf32>
    %24 = arith.addf %20, %23 : vector<1x256xf32>
    %c0_17 = arith.constant 0 : index
    %c3_18 = arith.constant 3 : index
    %25 = memref.load %arg3[%c0_17, %c3_18] : memref<4x4xf32, #tpu.memory_space<smem>>
    %26 = vector.broadcast %25 : f32 to vector<1x256xf32>
    %27 = arith.mulf %26, %5 : vector<1x256xf32>
    %28 = arith.addf %24, %27 : vector<1x256xf32>
    %c1_19 = arith.constant 1 : index
    %c0_20 = arith.constant 0 : index
    %29 = memref.load %arg3[%c1_19, %c0_20] : memref<4x4xf32, #tpu.memory_space<smem>>
    %30 = vector.broadcast %29 : f32 to vector<1x256xf32>
    %31 = arith.mulf %30, %2 : vector<1x256xf32>
    %c1_21 = arith.constant 1 : index
    %c1_22 = arith.constant 1 : index
    %32 = memref.load %arg3[%c1_21, %c1_22] : memref<4x4xf32, #tpu.memory_space<smem>>
    %33 = vector.broadcast %32 : f32 to vector<1x256xf32>
    %34 = arith.mulf %33, %3 : vector<1x256xf32>
    %35 = arith.addf %31, %34 : vector<1x256xf32>
    %c1_23 = arith.constant 1 : index
    %c2_24 = arith.constant 2 : index
    %36 = memref.load %arg3[%c1_23, %c2_24] : memref<4x4xf32, #tpu.memory_space<smem>>
    %37 = vector.broadcast %36 : f32 to vector<1x256xf32>
    %38 = arith.mulf %37, %4 : vector<1x256xf32>
    %39 = arith.addf %35, %38 : vector<1x256xf32>
    %c1_25 = arith.constant 1 : index
    %c3_26 = arith.constant 3 : index
    %40 = memref.load %arg3[%c1_25, %c3_26] : memref<4x4xf32, #tpu.memory_space<smem>>
    %41 = vector.broadcast %40 : f32 to vector<1x256xf32>
    %42 = arith.mulf %41, %5 : vector<1x256xf32>
    %43 = arith.addf %39, %42 : vector<1x256xf32>
    %c2_27 = arith.constant 2 : index
    %c0_28 = arith.constant 0 : index
    %44 = memref.load %arg3[%c2_27, %c0_28] : memref<4x4xf32, #tpu.memory_space<smem>>
    %45 = vector.broadcast %44 : f32 to vector<1x256xf32>
    %46 = arith.mulf %45, %2 : vector<1x256xf32>
    %c2_29 = arith.constant 2 : index
    %c1_30 = arith.constant 1 : index
    %47 = memref.load %arg3[%c2_29, %c1_30] : memref<4x4xf32, #tpu.memory_space<smem>>
    %48 = vector.broadcast %47 : f32 to vector<1x256xf32>
    %49 = arith.mulf %48, %3 : vector<1x256xf32>
    %50 = arith.addf %46, %49 : vector<1x256xf32>
    %c2_31 = arith.constant 2 : index
    %c2_32 = arith.constant 2 : index
    %51 = memref.load %arg3[%c2_31, %c2_32] : memref<4x4xf32, #tpu.memory_space<smem>>
    %52 = vector.broadcast %51 : f32 to vector<1x256xf32>
    %53 = arith.mulf %52, %4 : vector<1x256xf32>
    %54 = arith.addf %50, %53 : vector<1x256xf32>
    %c2_33 = arith.constant 2 : index
    %c3_34 = arith.constant 3 : index
    %55 = memref.load %arg3[%c2_33, %c3_34] : memref<4x4xf32, #tpu.memory_space<smem>>
    %56 = vector.broadcast %55 : f32 to vector<1x256xf32>
    %57 = arith.mulf %56, %5 : vector<1x256xf32>
    %58 = arith.addf %54, %57 : vector<1x256xf32>
    %c3_35 = arith.constant 3 : index
    %c0_36 = arith.constant 0 : index
    %59 = memref.load %arg3[%c3_35, %c0_36] : memref<4x4xf32, #tpu.memory_space<smem>>
    %60 = vector.broadcast %59 : f32 to vector<1x256xf32>
    %61 = arith.mulf %60, %2 : vector<1x256xf32>
    %c3_37 = arith.constant 3 : index
    %c1_38 = arith.constant 1 : index
    %62 = memref.load %arg3[%c3_37, %c1_38] : memref<4x4xf32, #tpu.memory_space<smem>>
    %63 = vector.broadcast %62 : f32 to vector<1x256xf32>
    %64 = arith.mulf %63, %3 : vector<1x256xf32>
    %65 = arith.addf %61, %64 : vector<1x256xf32>
    %c3_39 = arith.constant 3 : index
    %c2_40 = arith.constant 2 : index
    %66 = memref.load %arg3[%c3_39, %c2_40] : memref<4x4xf32, #tpu.memory_space<smem>>
    %67 = vector.broadcast %66 : f32 to vector<1x256xf32>
    %68 = arith.mulf %67, %4 : vector<1x256xf32>
    %69 = arith.addf %65, %68 : vector<1x256xf32>
    %c3_41 = arith.constant 3 : index
    %c3_42 = arith.constant 3 : index
    %70 = memref.load %arg3[%c3_41, %c3_42] : memref<4x4xf32, #tpu.memory_space<smem>>
    %71 = vector.broadcast %70 : f32 to vector<1x256xf32>
    %72 = arith.mulf %71, %5 : vector<1x256xf32>
    %73 = arith.addf %69, %72 : vector<1x256xf32>
    %c0_43 = arith.constant 0 : index
    %74 = memref.load %arg5[%c0_43] : memref<2xf32, #tpu.memory_space<smem>>
    %75 = vector.broadcast %74 : f32 to vector<1x256xf32>
    %c1_44 = arith.constant 1 : index
    %76 = memref.load %arg5[%c1_44] : memref<2xf32, #tpu.memory_space<smem>>
    %77 = vector.broadcast %76 : f32 to vector<1x256xf32>
    %c17_i32 = arith.constant 17 : i32
    %78 = tpu.dynamic_rotate %58 by %c17_i32 dim 1 : vector<1x256xf32>, i32 -> vector<1x256xf32>
    %79 = arith.mulf %78, %6 : vector<1x256xf32>
    %c0_45 = arith.constant 0 : index
    %80 = memref.load %arg4[%c0_45] : memref<36xf32, #tpu.memory_space<smem>>
    %81 = vector.broadcast %80 : f32 to vector<1x256xf32>
    %82 = arith.mulf %81, %79 : vector<1x256xf32>
    %83 = arith.addf %75, %82 : vector<1x256xf32>
    %c1_46 = arith.constant 1 : index
    %84 = memref.load %arg4[%c1_46] : memref<36xf32, #tpu.memory_space<smem>>
    %85 = vector.broadcast %84 : f32 to vector<1x256xf32>
    %86 = arith.mulf %85, %79 : vector<1x256xf32>
    %87 = arith.addf %77, %86 : vector<1x256xf32>
    %c17_i32_47 = arith.constant 17 : i32
    %88 = tpu.dynamic_rotate %73 by %c17_i32_47 dim 1 : vector<1x256xf32>, i32 -> vector<1x256xf32>
    %89 = arith.mulf %88, %6 : vector<1x256xf32>
    %c2_48 = arith.constant 2 : index
    %90 = memref.load %arg4[%c2_48] : memref<36xf32, #tpu.memory_space<smem>>
    %91 = vector.broadcast %90 : f32 to vector<1x256xf32>
    %92 = arith.mulf %91, %89 : vector<1x256xf32>
    %93 = arith.addf %83, %92 : vector<1x256xf32>
    %c3_49 = arith.constant 3 : index
    %94 = memref.load %arg4[%c3_49] : memref<36xf32, #tpu.memory_space<smem>>
    %95 = vector.broadcast %94 : f32 to vector<1x256xf32>
    %96 = arith.mulf %95, %89 : vector<1x256xf32>
    %97 = arith.addf %87, %96 : vector<1x256xf32>
    %c16_i32 = arith.constant 16 : i32
    %98 = tpu.dynamic_rotate %58 by %c16_i32 dim 1 : vector<1x256xf32>, i32 -> vector<1x256xf32>
    %99 = arith.mulf %98, %7 : vector<1x256xf32>
    %c4 = arith.constant 4 : index
    %100 = memref.load %arg4[%c4] : memref<36xf32, #tpu.memory_space<smem>>
    %101 = vector.broadcast %100 : f32 to vector<1x256xf32>
    %102 = arith.mulf %101, %99 : vector<1x256xf32>
    %103 = arith.addf %93, %102 : vector<1x256xf32>
    %c5_50 = arith.constant 5 : index
    %104 = memref.load %arg4[%c5_50] : memref<36xf32, #tpu.memory_space<smem>>
    %105 = vector.broadcast %104 : f32 to vector<1x256xf32>
    %106 = arith.mulf %105, %99 : vector<1x256xf32>
    %107 = arith.addf %97, %106 : vector<1x256xf32>
    %c16_i32_51 = arith.constant 16 : i32
    %108 = tpu.dynamic_rotate %73 by %c16_i32_51 dim 1 : vector<1x256xf32>, i32 -> vector<1x256xf32>
    %109 = arith.mulf %108, %7 : vector<1x256xf32>
    %c6_52 = arith.constant 6 : index
    %110 = memref.load %arg4[%c6_52] : memref<36xf32, #tpu.memory_space<smem>>
    %111 = vector.broadcast %110 : f32 to vector<1x256xf32>
    %112 = arith.mulf %111, %109 : vector<1x256xf32>
    %113 = arith.addf %103, %112 : vector<1x256xf32>
    %c7_53 = arith.constant 7 : index
    %114 = memref.load %arg4[%c7_53] : memref<36xf32, #tpu.memory_space<smem>>
    %115 = vector.broadcast %114 : f32 to vector<1x256xf32>
    %116 = arith.mulf %115, %109 : vector<1x256xf32>
    %117 = arith.addf %107, %116 : vector<1x256xf32>
    %c15_i32 = arith.constant 15 : i32
    %118 = tpu.dynamic_rotate %58 by %c15_i32 dim 1 : vector<1x256xf32>, i32 -> vector<1x256xf32>
    %119 = arith.mulf %118, %8 : vector<1x256xf32>
    %c8_54 = arith.constant 8 : index
    %120 = memref.load %arg4[%c8_54] : memref<36xf32, #tpu.memory_space<smem>>
    %121 = vector.broadcast %120 : f32 to vector<1x256xf32>
    %122 = arith.mulf %121, %119 : vector<1x256xf32>
    %123 = arith.addf %113, %122 : vector<1x256xf32>
    %c9 = arith.constant 9 : index
    %124 = memref.load %arg4[%c9] : memref<36xf32, #tpu.memory_space<smem>>
    %125 = vector.broadcast %124 : f32 to vector<1x256xf32>
    %126 = arith.mulf %125, %119 : vector<1x256xf32>
    %127 = arith.addf %117, %126 : vector<1x256xf32>
    %c15_i32_55 = arith.constant 15 : i32
    %128 = tpu.dynamic_rotate %73 by %c15_i32_55 dim 1 : vector<1x256xf32>, i32 -> vector<1x256xf32>
    %129 = arith.mulf %128, %8 : vector<1x256xf32>
    %c10 = arith.constant 10 : index
    %130 = memref.load %arg4[%c10] : memref<36xf32, #tpu.memory_space<smem>>
    %131 = vector.broadcast %130 : f32 to vector<1x256xf32>
    %132 = arith.mulf %131, %129 : vector<1x256xf32>
    %133 = arith.addf %123, %132 : vector<1x256xf32>
    %c11 = arith.constant 11 : index
    %134 = memref.load %arg4[%c11] : memref<36xf32, #tpu.memory_space<smem>>
    %135 = vector.broadcast %134 : f32 to vector<1x256xf32>
    %136 = arith.mulf %135, %129 : vector<1x256xf32>
    %137 = arith.addf %127, %136 : vector<1x256xf32>
    %c1_i32 = arith.constant 1 : i32
    %138 = tpu.dynamic_rotate %58 by %c1_i32 dim 1 : vector<1x256xf32>, i32 -> vector<1x256xf32>
    %139 = arith.mulf %138, %9 : vector<1x256xf32>
    %c12 = arith.constant 12 : index
    %140 = memref.load %arg4[%c12] : memref<36xf32, #tpu.memory_space<smem>>
    %141 = vector.broadcast %140 : f32 to vector<1x256xf32>
    %142 = arith.mulf %141, %139 : vector<1x256xf32>
    %143 = arith.addf %133, %142 : vector<1x256xf32>
    %c13 = arith.constant 13 : index
    %144 = memref.load %arg4[%c13] : memref<36xf32, #tpu.memory_space<smem>>
    %145 = vector.broadcast %144 : f32 to vector<1x256xf32>
    %146 = arith.mulf %145, %139 : vector<1x256xf32>
    %147 = arith.addf %137, %146 : vector<1x256xf32>
    %c1_i32_56 = arith.constant 1 : i32
    %148 = tpu.dynamic_rotate %73 by %c1_i32_56 dim 1 : vector<1x256xf32>, i32 -> vector<1x256xf32>
    %149 = arith.mulf %148, %9 : vector<1x256xf32>
    %c14 = arith.constant 14 : index
    %150 = memref.load %arg4[%c14] : memref<36xf32, #tpu.memory_space<smem>>
    %151 = vector.broadcast %150 : f32 to vector<1x256xf32>
    %152 = arith.mulf %151, %149 : vector<1x256xf32>
    %153 = arith.addf %143, %152 : vector<1x256xf32>
    %c15 = arith.constant 15 : index
    %154 = memref.load %arg4[%c15] : memref<36xf32, #tpu.memory_space<smem>>
    %155 = vector.broadcast %154 : f32 to vector<1x256xf32>
    %156 = arith.mulf %155, %149 : vector<1x256xf32>
    %157 = arith.addf %147, %156 : vector<1x256xf32>
    %c16 = arith.constant 16 : index
    %158 = memref.load %arg4[%c16] : memref<36xf32, #tpu.memory_space<smem>>
    %159 = vector.broadcast %158 : f32 to vector<1x256xf32>
    %160 = arith.mulf %159, %58 : vector<1x256xf32>
    %161 = arith.addf %153, %160 : vector<1x256xf32>
    %c17 = arith.constant 17 : index
    %162 = memref.load %arg4[%c17] : memref<36xf32, #tpu.memory_space<smem>>
    %163 = vector.broadcast %162 : f32 to vector<1x256xf32>
    %164 = arith.mulf %163, %58 : vector<1x256xf32>
    %165 = arith.addf %157, %164 : vector<1x256xf32>
    %c18 = arith.constant 18 : index
    %166 = memref.load %arg4[%c18] : memref<36xf32, #tpu.memory_space<smem>>
    %167 = vector.broadcast %166 : f32 to vector<1x256xf32>
    %168 = arith.mulf %167, %73 : vector<1x256xf32>
    %169 = arith.addf %161, %168 : vector<1x256xf32>
    %c19 = arith.constant 19 : index
    %170 = memref.load %arg4[%c19] : memref<36xf32, #tpu.memory_space<smem>>
    %171 = vector.broadcast %170 : f32 to vector<1x256xf32>
    %172 = arith.mulf %171, %73 : vector<1x256xf32>
    %173 = arith.addf %165, %172 : vector<1x256xf32>
    %c255_i32 = arith.constant 255 : i32
    %174 = tpu.dynamic_rotate %58 by %c255_i32 dim 1 : vector<1x256xf32>, i32 -> vector<1x256xf32>
    %175 = arith.mulf %174, %10 : vector<1x256xf32>
    %c20 = arith.constant 20 : index
    %176 = memref.load %arg4[%c20] : memref<36xf32, #tpu.memory_space<smem>>
    %177 = vector.broadcast %176 : f32 to vector<1x256xf32>
    %178 = arith.mulf %177, %175 : vector<1x256xf32>
    %179 = arith.addf %169, %178 : vector<1x256xf32>
    %c21 = arith.constant 21 : index
    %180 = memref.load %arg4[%c21] : memref<36xf32, #tpu.memory_space<smem>>
    %181 = vector.broadcast %180 : f32 to vector<1x256xf32>
    %182 = arith.mulf %181, %175 : vector<1x256xf32>
    %183 = arith.addf %173, %182 : vector<1x256xf32>
    %c255_i32_57 = arith.constant 255 : i32
    %184 = tpu.dynamic_rotate %73 by %c255_i32_57 dim 1 : vector<1x256xf32>, i32 -> vector<1x256xf32>
    %185 = arith.mulf %184, %10 : vector<1x256xf32>
    %c22 = arith.constant 22 : index
    %186 = memref.load %arg4[%c22] : memref<36xf32, #tpu.memory_space<smem>>
    %187 = vector.broadcast %186 : f32 to vector<1x256xf32>
    %188 = arith.mulf %187, %185 : vector<1x256xf32>
    %189 = arith.addf %179, %188 : vector<1x256xf32>
    %c23 = arith.constant 23 : index
    %190 = memref.load %arg4[%c23] : memref<36xf32, #tpu.memory_space<smem>>
    %191 = vector.broadcast %190 : f32 to vector<1x256xf32>
    %192 = arith.mulf %191, %185 : vector<1x256xf32>
    %193 = arith.addf %183, %192 : vector<1x256xf32>
    %c241_i32 = arith.constant 241 : i32
    %194 = tpu.dynamic_rotate %58 by %c241_i32 dim 1 : vector<1x256xf32>, i32 -> vector<1x256xf32>
    %195 = arith.mulf %194, %11 : vector<1x256xf32>
    %c24 = arith.constant 24 : index
    %196 = memref.load %arg4[%c24] : memref<36xf32, #tpu.memory_space<smem>>
    %197 = vector.broadcast %196 : f32 to vector<1x256xf32>
    %198 = arith.mulf %197, %195 : vector<1x256xf32>
    %199 = arith.addf %189, %198 : vector<1x256xf32>
    %c25 = arith.constant 25 : index
    %200 = memref.load %arg4[%c25] : memref<36xf32, #tpu.memory_space<smem>>
    %201 = vector.broadcast %200 : f32 to vector<1x256xf32>
    %202 = arith.mulf %201, %195 : vector<1x256xf32>
    %203 = arith.addf %193, %202 : vector<1x256xf32>
    %c241_i32_58 = arith.constant 241 : i32
    %204 = tpu.dynamic_rotate %73 by %c241_i32_58 dim 1 : vector<1x256xf32>, i32 -> vector<1x256xf32>
    %205 = arith.mulf %204, %11 : vector<1x256xf32>
    %c26 = arith.constant 26 : index
    %206 = memref.load %arg4[%c26] : memref<36xf32, #tpu.memory_space<smem>>
    %207 = vector.broadcast %206 : f32 to vector<1x256xf32>
    %208 = arith.mulf %207, %205 : vector<1x256xf32>
    %209 = arith.addf %199, %208 : vector<1x256xf32>
    %c27 = arith.constant 27 : index
    %210 = memref.load %arg4[%c27] : memref<36xf32, #tpu.memory_space<smem>>
    %211 = vector.broadcast %210 : f32 to vector<1x256xf32>
    %212 = arith.mulf %211, %205 : vector<1x256xf32>
    %213 = arith.addf %203, %212 : vector<1x256xf32>
    %c240_i32 = arith.constant 240 : i32
    %214 = tpu.dynamic_rotate %58 by %c240_i32 dim 1 : vector<1x256xf32>, i32 -> vector<1x256xf32>
    %215 = arith.mulf %214, %12 : vector<1x256xf32>
    %c28 = arith.constant 28 : index
    %216 = memref.load %arg4[%c28] : memref<36xf32, #tpu.memory_space<smem>>
    %217 = vector.broadcast %216 : f32 to vector<1x256xf32>
    %218 = arith.mulf %217, %215 : vector<1x256xf32>
    %219 = arith.addf %209, %218 : vector<1x256xf32>
    %c29 = arith.constant 29 : index
    %220 = memref.load %arg4[%c29] : memref<36xf32, #tpu.memory_space<smem>>
    %221 = vector.broadcast %220 : f32 to vector<1x256xf32>
    %222 = arith.mulf %221, %215 : vector<1x256xf32>
    %223 = arith.addf %213, %222 : vector<1x256xf32>
    %c240_i32_59 = arith.constant 240 : i32
    %224 = tpu.dynamic_rotate %73 by %c240_i32_59 dim 1 : vector<1x256xf32>, i32 -> vector<1x256xf32>
    %225 = arith.mulf %224, %12 : vector<1x256xf32>
    %c30 = arith.constant 30 : index
    %226 = memref.load %arg4[%c30] : memref<36xf32, #tpu.memory_space<smem>>
    %227 = vector.broadcast %226 : f32 to vector<1x256xf32>
    %228 = arith.mulf %227, %225 : vector<1x256xf32>
    %229 = arith.addf %219, %228 : vector<1x256xf32>
    %c31 = arith.constant 31 : index
    %230 = memref.load %arg4[%c31] : memref<36xf32, #tpu.memory_space<smem>>
    %231 = vector.broadcast %230 : f32 to vector<1x256xf32>
    %232 = arith.mulf %231, %225 : vector<1x256xf32>
    %233 = arith.addf %223, %232 : vector<1x256xf32>
    %c239_i32 = arith.constant 239 : i32
    %234 = tpu.dynamic_rotate %58 by %c239_i32 dim 1 : vector<1x256xf32>, i32 -> vector<1x256xf32>
    %235 = arith.mulf %234, %13 : vector<1x256xf32>
    %c32 = arith.constant 32 : index
    %236 = memref.load %arg4[%c32] : memref<36xf32, #tpu.memory_space<smem>>
    %237 = vector.broadcast %236 : f32 to vector<1x256xf32>
    %238 = arith.mulf %237, %235 : vector<1x256xf32>
    %239 = arith.addf %229, %238 : vector<1x256xf32>
    %c33 = arith.constant 33 : index
    %240 = memref.load %arg4[%c33] : memref<36xf32, #tpu.memory_space<smem>>
    %241 = vector.broadcast %240 : f32 to vector<1x256xf32>
    %242 = arith.mulf %241, %235 : vector<1x256xf32>
    %243 = arith.addf %233, %242 : vector<1x256xf32>
    %c239_i32_60 = arith.constant 239 : i32
    %244 = tpu.dynamic_rotate %73 by %c239_i32_60 dim 1 : vector<1x256xf32>, i32 -> vector<1x256xf32>
    %245 = arith.mulf %244, %13 : vector<1x256xf32>
    %c34 = arith.constant 34 : index
    %246 = memref.load %arg4[%c34] : memref<36xf32, #tpu.memory_space<smem>>
    %247 = vector.broadcast %246 : f32 to vector<1x256xf32>
    %248 = arith.mulf %247, %245 : vector<1x256xf32>
    %249 = arith.addf %239, %248 : vector<1x256xf32>
    %c35 = arith.constant 35 : index
    %250 = memref.load %arg4[%c35] : memref<36xf32, #tpu.memory_space<smem>>
    %251 = vector.broadcast %250 : f32 to vector<1x256xf32>
    %252 = arith.mulf %251, %245 : vector<1x256xf32>
    %253 = arith.addf %243, %252 : vector<1x256xf32>
    %254 = arith.addf %28, %249 : vector<1x256xf32>
    %255 = arith.addf %43, %253 : vector<1x256xf32>
    %c0_61 = arith.constant 0 : index
    %256 = memref.load %arg7[%c0_61] : memref<4xf32, #tpu.memory_space<smem>>
    %257 = vector.broadcast %256 : f32 to vector<1x256xf32>
    %c1_62 = arith.constant 1 : index
    %258 = memref.load %arg7[%c1_62] : memref<4xf32, #tpu.memory_space<smem>>
    %259 = vector.broadcast %258 : f32 to vector<1x256xf32>
    %c2_63 = arith.constant 2 : index
    %260 = memref.load %arg7[%c2_63] : memref<4xf32, #tpu.memory_space<smem>>
    %261 = vector.broadcast %260 : f32 to vector<1x256xf32>
    %c3_64 = arith.constant 3 : index
    %262 = memref.load %arg7[%c3_64] : memref<4xf32, #tpu.memory_space<smem>>
    %263 = vector.broadcast %262 : f32 to vector<1x256xf32>
    %c17_i32_65 = arith.constant 17 : i32
    %264 = tpu.dynamic_rotate %254 by %c17_i32_65 dim 1 : vector<1x256xf32>, i32 -> vector<1x256xf32>
    %265 = arith.mulf %264, %6 : vector<1x256xf32>
    %c0_66 = arith.constant 0 : index
    %266 = memref.load %arg6[%c0_66] : memref<72xf32, #tpu.memory_space<smem>>
    %267 = vector.broadcast %266 : f32 to vector<1x256xf32>
    %268 = arith.mulf %267, %265 : vector<1x256xf32>
    %269 = arith.addf %257, %268 : vector<1x256xf32>
    %c1_67 = arith.constant 1 : index
    %270 = memref.load %arg6[%c1_67] : memref<72xf32, #tpu.memory_space<smem>>
    %271 = vector.broadcast %270 : f32 to vector<1x256xf32>
    %272 = arith.mulf %271, %265 : vector<1x256xf32>
    %273 = arith.addf %259, %272 : vector<1x256xf32>
    %c2_68 = arith.constant 2 : index
    %274 = memref.load %arg6[%c2_68] : memref<72xf32, #tpu.memory_space<smem>>
    %275 = vector.broadcast %274 : f32 to vector<1x256xf32>
    %276 = arith.mulf %275, %265 : vector<1x256xf32>
    %277 = arith.addf %261, %276 : vector<1x256xf32>
    %c3_69 = arith.constant 3 : index
    %278 = memref.load %arg6[%c3_69] : memref<72xf32, #tpu.memory_space<smem>>
    %279 = vector.broadcast %278 : f32 to vector<1x256xf32>
    %280 = arith.mulf %279, %265 : vector<1x256xf32>
    %281 = arith.addf %263, %280 : vector<1x256xf32>
    %c17_i32_70 = arith.constant 17 : i32
    %282 = tpu.dynamic_rotate %255 by %c17_i32_70 dim 1 : vector<1x256xf32>, i32 -> vector<1x256xf32>
    %283 = arith.mulf %282, %6 : vector<1x256xf32>
    %c4_71 = arith.constant 4 : index
    %284 = memref.load %arg6[%c4_71] : memref<72xf32, #tpu.memory_space<smem>>
    %285 = vector.broadcast %284 : f32 to vector<1x256xf32>
    %286 = arith.mulf %285, %283 : vector<1x256xf32>
    %287 = arith.addf %269, %286 : vector<1x256xf32>
    %c5_72 = arith.constant 5 : index
    %288 = memref.load %arg6[%c5_72] : memref<72xf32, #tpu.memory_space<smem>>
    %289 = vector.broadcast %288 : f32 to vector<1x256xf32>
    %290 = arith.mulf %289, %283 : vector<1x256xf32>
    %291 = arith.addf %273, %290 : vector<1x256xf32>
    %c6_73 = arith.constant 6 : index
    %292 = memref.load %arg6[%c6_73] : memref<72xf32, #tpu.memory_space<smem>>
    %293 = vector.broadcast %292 : f32 to vector<1x256xf32>
    %294 = arith.mulf %293, %283 : vector<1x256xf32>
    %295 = arith.addf %277, %294 : vector<1x256xf32>
    %c7_74 = arith.constant 7 : index
    %296 = memref.load %arg6[%c7_74] : memref<72xf32, #tpu.memory_space<smem>>
    %297 = vector.broadcast %296 : f32 to vector<1x256xf32>
    %298 = arith.mulf %297, %283 : vector<1x256xf32>
    %299 = arith.addf %281, %298 : vector<1x256xf32>
    %c16_i32_75 = arith.constant 16 : i32
    %300 = tpu.dynamic_rotate %254 by %c16_i32_75 dim 1 : vector<1x256xf32>, i32 -> vector<1x256xf32>
    %301 = arith.mulf %300, %7 : vector<1x256xf32>
    %c8_76 = arith.constant 8 : index
    %302 = memref.load %arg6[%c8_76] : memref<72xf32, #tpu.memory_space<smem>>
    %303 = vector.broadcast %302 : f32 to vector<1x256xf32>
    %304 = arith.mulf %303, %301 : vector<1x256xf32>
    %305 = arith.addf %287, %304 : vector<1x256xf32>
    %c9_77 = arith.constant 9 : index
    %306 = memref.load %arg6[%c9_77] : memref<72xf32, #tpu.memory_space<smem>>
    %307 = vector.broadcast %306 : f32 to vector<1x256xf32>
    %308 = arith.mulf %307, %301 : vector<1x256xf32>
    %309 = arith.addf %291, %308 : vector<1x256xf32>
    %c10_78 = arith.constant 10 : index
    %310 = memref.load %arg6[%c10_78] : memref<72xf32, #tpu.memory_space<smem>>
    %311 = vector.broadcast %310 : f32 to vector<1x256xf32>
    %312 = arith.mulf %311, %301 : vector<1x256xf32>
    %313 = arith.addf %295, %312 : vector<1x256xf32>
    %c11_79 = arith.constant 11 : index
    %314 = memref.load %arg6[%c11_79] : memref<72xf32, #tpu.memory_space<smem>>
    %315 = vector.broadcast %314 : f32 to vector<1x256xf32>
    %316 = arith.mulf %315, %301 : vector<1x256xf32>
    %317 = arith.addf %299, %316 : vector<1x256xf32>
    %c16_i32_80 = arith.constant 16 : i32
    %318 = tpu.dynamic_rotate %255 by %c16_i32_80 dim 1 : vector<1x256xf32>, i32 -> vector<1x256xf32>
    %319 = arith.mulf %318, %7 : vector<1x256xf32>
    %c12_81 = arith.constant 12 : index
    %320 = memref.load %arg6[%c12_81] : memref<72xf32, #tpu.memory_space<smem>>
    %321 = vector.broadcast %320 : f32 to vector<1x256xf32>
    %322 = arith.mulf %321, %319 : vector<1x256xf32>
    %323 = arith.addf %305, %322 : vector<1x256xf32>
    %c13_82 = arith.constant 13 : index
    %324 = memref.load %arg6[%c13_82] : memref<72xf32, #tpu.memory_space<smem>>
    %325 = vector.broadcast %324 : f32 to vector<1x256xf32>
    %326 = arith.mulf %325, %319 : vector<1x256xf32>
    %327 = arith.addf %309, %326 : vector<1x256xf32>
    %c14_83 = arith.constant 14 : index
    %328 = memref.load %arg6[%c14_83] : memref<72xf32, #tpu.memory_space<smem>>
    %329 = vector.broadcast %328 : f32 to vector<1x256xf32>
    %330 = arith.mulf %329, %319 : vector<1x256xf32>
    %331 = arith.addf %313, %330 : vector<1x256xf32>
    %c15_84 = arith.constant 15 : index
    %332 = memref.load %arg6[%c15_84] : memref<72xf32, #tpu.memory_space<smem>>
    %333 = vector.broadcast %332 : f32 to vector<1x256xf32>
    %334 = arith.mulf %333, %319 : vector<1x256xf32>
    %335 = arith.addf %317, %334 : vector<1x256xf32>
    %c15_i32_85 = arith.constant 15 : i32
    %336 = tpu.dynamic_rotate %254 by %c15_i32_85 dim 1 : vector<1x256xf32>, i32 -> vector<1x256xf32>
    %337 = arith.mulf %336, %8 : vector<1x256xf32>
    %c16_86 = arith.constant 16 : index
    %338 = memref.load %arg6[%c16_86] : memref<72xf32, #tpu.memory_space<smem>>
    %339 = vector.broadcast %338 : f32 to vector<1x256xf32>
    %340 = arith.mulf %339, %337 : vector<1x256xf32>
    %341 = arith.addf %323, %340 : vector<1x256xf32>
    %c17_87 = arith.constant 17 : index
    %342 = memref.load %arg6[%c17_87] : memref<72xf32, #tpu.memory_space<smem>>
    %343 = vector.broadcast %342 : f32 to vector<1x256xf32>
    %344 = arith.mulf %343, %337 : vector<1x256xf32>
    %345 = arith.addf %327, %344 : vector<1x256xf32>
    %c18_88 = arith.constant 18 : index
    %346 = memref.load %arg6[%c18_88] : memref<72xf32, #tpu.memory_space<smem>>
    %347 = vector.broadcast %346 : f32 to vector<1x256xf32>
    %348 = arith.mulf %347, %337 : vector<1x256xf32>
    %349 = arith.addf %331, %348 : vector<1x256xf32>
    %c19_89 = arith.constant 19 : index
    %350 = memref.load %arg6[%c19_89] : memref<72xf32, #tpu.memory_space<smem>>
    %351 = vector.broadcast %350 : f32 to vector<1x256xf32>
    %352 = arith.mulf %351, %337 : vector<1x256xf32>
    %353 = arith.addf %335, %352 : vector<1x256xf32>
    %c15_i32_90 = arith.constant 15 : i32
    %354 = tpu.dynamic_rotate %255 by %c15_i32_90 dim 1 : vector<1x256xf32>, i32 -> vector<1x256xf32>
    %355 = arith.mulf %354, %8 : vector<1x256xf32>
    %c20_91 = arith.constant 20 : index
    %356 = memref.load %arg6[%c20_91] : memref<72xf32, #tpu.memory_space<smem>>
    %357 = vector.broadcast %356 : f32 to vector<1x256xf32>
    %358 = arith.mulf %357, %355 : vector<1x256xf32>
    %359 = arith.addf %341, %358 : vector<1x256xf32>
    %c21_92 = arith.constant 21 : index
    %360 = memref.load %arg6[%c21_92] : memref<72xf32, #tpu.memory_space<smem>>
    %361 = vector.broadcast %360 : f32 to vector<1x256xf32>
    %362 = arith.mulf %361, %355 : vector<1x256xf32>
    %363 = arith.addf %345, %362 : vector<1x256xf32>
    %c22_93 = arith.constant 22 : index
    %364 = memref.load %arg6[%c22_93] : memref<72xf32, #tpu.memory_space<smem>>
    %365 = vector.broadcast %364 : f32 to vector<1x256xf32>
    %366 = arith.mulf %365, %355 : vector<1x256xf32>
    %367 = arith.addf %349, %366 : vector<1x256xf32>
    %c23_94 = arith.constant 23 : index
    %368 = memref.load %arg6[%c23_94] : memref<72xf32, #tpu.memory_space<smem>>
    %369 = vector.broadcast %368 : f32 to vector<1x256xf32>
    %370 = arith.mulf %369, %355 : vector<1x256xf32>
    %371 = arith.addf %353, %370 : vector<1x256xf32>
    %c1_i32_95 = arith.constant 1 : i32
    %372 = tpu.dynamic_rotate %254 by %c1_i32_95 dim 1 : vector<1x256xf32>, i32 -> vector<1x256xf32>
    %373 = arith.mulf %372, %9 : vector<1x256xf32>
    %c24_96 = arith.constant 24 : index
    %374 = memref.load %arg6[%c24_96] : memref<72xf32, #tpu.memory_space<smem>>
    %375 = vector.broadcast %374 : f32 to vector<1x256xf32>
    %376 = arith.mulf %375, %373 : vector<1x256xf32>
    %377 = arith.addf %359, %376 : vector<1x256xf32>
    %c25_97 = arith.constant 25 : index
    %378 = memref.load %arg6[%c25_97] : memref<72xf32, #tpu.memory_space<smem>>
    %379 = vector.broadcast %378 : f32 to vector<1x256xf32>
    %380 = arith.mulf %379, %373 : vector<1x256xf32>
    %381 = arith.addf %363, %380 : vector<1x256xf32>
    %c26_98 = arith.constant 26 : index
    %382 = memref.load %arg6[%c26_98] : memref<72xf32, #tpu.memory_space<smem>>
    %383 = vector.broadcast %382 : f32 to vector<1x256xf32>
    %384 = arith.mulf %383, %373 : vector<1x256xf32>
    %385 = arith.addf %367, %384 : vector<1x256xf32>
    %c27_99 = arith.constant 27 : index
    %386 = memref.load %arg6[%c27_99] : memref<72xf32, #tpu.memory_space<smem>>
    %387 = vector.broadcast %386 : f32 to vector<1x256xf32>
    %388 = arith.mulf %387, %373 : vector<1x256xf32>
    %389 = arith.addf %371, %388 : vector<1x256xf32>
    %c1_i32_100 = arith.constant 1 : i32
    %390 = tpu.dynamic_rotate %255 by %c1_i32_100 dim 1 : vector<1x256xf32>, i32 -> vector<1x256xf32>
    %391 = arith.mulf %390, %9 : vector<1x256xf32>
    %c28_101 = arith.constant 28 : index
    %392 = memref.load %arg6[%c28_101] : memref<72xf32, #tpu.memory_space<smem>>
    %393 = vector.broadcast %392 : f32 to vector<1x256xf32>
    %394 = arith.mulf %393, %391 : vector<1x256xf32>
    %395 = arith.addf %377, %394 : vector<1x256xf32>
    %c29_102 = arith.constant 29 : index
    %396 = memref.load %arg6[%c29_102] : memref<72xf32, #tpu.memory_space<smem>>
    %397 = vector.broadcast %396 : f32 to vector<1x256xf32>
    %398 = arith.mulf %397, %391 : vector<1x256xf32>
    %399 = arith.addf %381, %398 : vector<1x256xf32>
    %c30_103 = arith.constant 30 : index
    %400 = memref.load %arg6[%c30_103] : memref<72xf32, #tpu.memory_space<smem>>
    %401 = vector.broadcast %400 : f32 to vector<1x256xf32>
    %402 = arith.mulf %401, %391 : vector<1x256xf32>
    %403 = arith.addf %385, %402 : vector<1x256xf32>
    %c31_104 = arith.constant 31 : index
    %404 = memref.load %arg6[%c31_104] : memref<72xf32, #tpu.memory_space<smem>>
    %405 = vector.broadcast %404 : f32 to vector<1x256xf32>
    %406 = arith.mulf %405, %391 : vector<1x256xf32>
    %407 = arith.addf %389, %406 : vector<1x256xf32>
    %c32_105 = arith.constant 32 : index
    %408 = memref.load %arg6[%c32_105] : memref<72xf32, #tpu.memory_space<smem>>
    %409 = vector.broadcast %408 : f32 to vector<1x256xf32>
    %410 = arith.mulf %409, %254 : vector<1x256xf32>
    %411 = arith.addf %395, %410 : vector<1x256xf32>
    %c33_106 = arith.constant 33 : index
    %412 = memref.load %arg6[%c33_106] : memref<72xf32, #tpu.memory_space<smem>>
    %413 = vector.broadcast %412 : f32 to vector<1x256xf32>
    %414 = arith.mulf %413, %254 : vector<1x256xf32>
    %415 = arith.addf %399, %414 : vector<1x256xf32>
    %c34_107 = arith.constant 34 : index
    %416 = memref.load %arg6[%c34_107] : memref<72xf32, #tpu.memory_space<smem>>
    %417 = vector.broadcast %416 : f32 to vector<1x256xf32>
    %418 = arith.mulf %417, %254 : vector<1x256xf32>
    %419 = arith.addf %403, %418 : vector<1x256xf32>
    %c35_108 = arith.constant 35 : index
    %420 = memref.load %arg6[%c35_108] : memref<72xf32, #tpu.memory_space<smem>>
    %421 = vector.broadcast %420 : f32 to vector<1x256xf32>
    %422 = arith.mulf %421, %254 : vector<1x256xf32>
    %423 = arith.addf %407, %422 : vector<1x256xf32>
    %c36 = arith.constant 36 : index
    %424 = memref.load %arg6[%c36] : memref<72xf32, #tpu.memory_space<smem>>
    %425 = vector.broadcast %424 : f32 to vector<1x256xf32>
    %426 = arith.mulf %425, %255 : vector<1x256xf32>
    %427 = arith.addf %411, %426 : vector<1x256xf32>
    %c37 = arith.constant 37 : index
    %428 = memref.load %arg6[%c37] : memref<72xf32, #tpu.memory_space<smem>>
    %429 = vector.broadcast %428 : f32 to vector<1x256xf32>
    %430 = arith.mulf %429, %255 : vector<1x256xf32>
    %431 = arith.addf %415, %430 : vector<1x256xf32>
    %c38 = arith.constant 38 : index
    %432 = memref.load %arg6[%c38] : memref<72xf32, #tpu.memory_space<smem>>
    %433 = vector.broadcast %432 : f32 to vector<1x256xf32>
    %434 = arith.mulf %433, %255 : vector<1x256xf32>
    %435 = arith.addf %419, %434 : vector<1x256xf32>
    %c39 = arith.constant 39 : index
    %436 = memref.load %arg6[%c39] : memref<72xf32, #tpu.memory_space<smem>>
    %437 = vector.broadcast %436 : f32 to vector<1x256xf32>
    %438 = arith.mulf %437, %255 : vector<1x256xf32>
    %439 = arith.addf %423, %438 : vector<1x256xf32>
    %c255_i32_109 = arith.constant 255 : i32
    %440 = tpu.dynamic_rotate %254 by %c255_i32_109 dim 1 : vector<1x256xf32>, i32 -> vector<1x256xf32>
    %441 = arith.mulf %440, %10 : vector<1x256xf32>
    %c40 = arith.constant 40 : index
    %442 = memref.load %arg6[%c40] : memref<72xf32, #tpu.memory_space<smem>>
    %443 = vector.broadcast %442 : f32 to vector<1x256xf32>
    %444 = arith.mulf %443, %441 : vector<1x256xf32>
    %445 = arith.addf %427, %444 : vector<1x256xf32>
    %c41 = arith.constant 41 : index
    %446 = memref.load %arg6[%c41] : memref<72xf32, #tpu.memory_space<smem>>
    %447 = vector.broadcast %446 : f32 to vector<1x256xf32>
    %448 = arith.mulf %447, %441 : vector<1x256xf32>
    %449 = arith.addf %431, %448 : vector<1x256xf32>
    %c42 = arith.constant 42 : index
    %450 = memref.load %arg6[%c42] : memref<72xf32, #tpu.memory_space<smem>>
    %451 = vector.broadcast %450 : f32 to vector<1x256xf32>
    %452 = arith.mulf %451, %441 : vector<1x256xf32>
    %453 = arith.addf %435, %452 : vector<1x256xf32>
    %c43 = arith.constant 43 : index
    %454 = memref.load %arg6[%c43] : memref<72xf32, #tpu.memory_space<smem>>
    %455 = vector.broadcast %454 : f32 to vector<1x256xf32>
    %456 = arith.mulf %455, %441 : vector<1x256xf32>
    %457 = arith.addf %439, %456 : vector<1x256xf32>
    %c255_i32_110 = arith.constant 255 : i32
    %458 = tpu.dynamic_rotate %255 by %c255_i32_110 dim 1 : vector<1x256xf32>, i32 -> vector<1x256xf32>
    %459 = arith.mulf %458, %10 : vector<1x256xf32>
    %c44 = arith.constant 44 : index
    %460 = memref.load %arg6[%c44] : memref<72xf32, #tpu.memory_space<smem>>
    %461 = vector.broadcast %460 : f32 to vector<1x256xf32>
    %462 = arith.mulf %461, %459 : vector<1x256xf32>
    %463 = arith.addf %445, %462 : vector<1x256xf32>
    %c45 = arith.constant 45 : index
    %464 = memref.load %arg6[%c45] : memref<72xf32, #tpu.memory_space<smem>>
    %465 = vector.broadcast %464 : f32 to vector<1x256xf32>
    %466 = arith.mulf %465, %459 : vector<1x256xf32>
    %467 = arith.addf %449, %466 : vector<1x256xf32>
    %c46 = arith.constant 46 : index
    %468 = memref.load %arg6[%c46] : memref<72xf32, #tpu.memory_space<smem>>
    %469 = vector.broadcast %468 : f32 to vector<1x256xf32>
    %470 = arith.mulf %469, %459 : vector<1x256xf32>
    %471 = arith.addf %453, %470 : vector<1x256xf32>
    %c47 = arith.constant 47 : index
    %472 = memref.load %arg6[%c47] : memref<72xf32, #tpu.memory_space<smem>>
    %473 = vector.broadcast %472 : f32 to vector<1x256xf32>
    %474 = arith.mulf %473, %459 : vector<1x256xf32>
    %475 = arith.addf %457, %474 : vector<1x256xf32>
    %c241_i32_111 = arith.constant 241 : i32
    %476 = tpu.dynamic_rotate %254 by %c241_i32_111 dim 1 : vector<1x256xf32>, i32 -> vector<1x256xf32>
    %477 = arith.mulf %476, %11 : vector<1x256xf32>
    %c48 = arith.constant 48 : index
    %478 = memref.load %arg6[%c48] : memref<72xf32, #tpu.memory_space<smem>>
    %479 = vector.broadcast %478 : f32 to vector<1x256xf32>
    %480 = arith.mulf %479, %477 : vector<1x256xf32>
    %481 = arith.addf %463, %480 : vector<1x256xf32>
    %c49 = arith.constant 49 : index
    %482 = memref.load %arg6[%c49] : memref<72xf32, #tpu.memory_space<smem>>
    %483 = vector.broadcast %482 : f32 to vector<1x256xf32>
    %484 = arith.mulf %483, %477 : vector<1x256xf32>
    %485 = arith.addf %467, %484 : vector<1x256xf32>
    %c50 = arith.constant 50 : index
    %486 = memref.load %arg6[%c50] : memref<72xf32, #tpu.memory_space<smem>>
    %487 = vector.broadcast %486 : f32 to vector<1x256xf32>
    %488 = arith.mulf %487, %477 : vector<1x256xf32>
    %489 = arith.addf %471, %488 : vector<1x256xf32>
    %c51 = arith.constant 51 : index
    %490 = memref.load %arg6[%c51] : memref<72xf32, #tpu.memory_space<smem>>
    %491 = vector.broadcast %490 : f32 to vector<1x256xf32>
    %492 = arith.mulf %491, %477 : vector<1x256xf32>
    %493 = arith.addf %475, %492 : vector<1x256xf32>
    %c241_i32_112 = arith.constant 241 : i32
    %494 = tpu.dynamic_rotate %255 by %c241_i32_112 dim 1 : vector<1x256xf32>, i32 -> vector<1x256xf32>
    %495 = arith.mulf %494, %11 : vector<1x256xf32>
    %c52 = arith.constant 52 : index
    %496 = memref.load %arg6[%c52] : memref<72xf32, #tpu.memory_space<smem>>
    %497 = vector.broadcast %496 : f32 to vector<1x256xf32>
    %498 = arith.mulf %497, %495 : vector<1x256xf32>
    %499 = arith.addf %481, %498 : vector<1x256xf32>
    %c53 = arith.constant 53 : index
    %500 = memref.load %arg6[%c53] : memref<72xf32, #tpu.memory_space<smem>>
    %501 = vector.broadcast %500 : f32 to vector<1x256xf32>
    %502 = arith.mulf %501, %495 : vector<1x256xf32>
    %503 = arith.addf %485, %502 : vector<1x256xf32>
    %c54 = arith.constant 54 : index
    %504 = memref.load %arg6[%c54] : memref<72xf32, #tpu.memory_space<smem>>
    %505 = vector.broadcast %504 : f32 to vector<1x256xf32>
    %506 = arith.mulf %505, %495 : vector<1x256xf32>
    %507 = arith.addf %489, %506 : vector<1x256xf32>
    %c55 = arith.constant 55 : index
    %508 = memref.load %arg6[%c55] : memref<72xf32, #tpu.memory_space<smem>>
    %509 = vector.broadcast %508 : f32 to vector<1x256xf32>
    %510 = arith.mulf %509, %495 : vector<1x256xf32>
    %511 = arith.addf %493, %510 : vector<1x256xf32>
    %c240_i32_113 = arith.constant 240 : i32
    %512 = tpu.dynamic_rotate %254 by %c240_i32_113 dim 1 : vector<1x256xf32>, i32 -> vector<1x256xf32>
    %513 = arith.mulf %512, %12 : vector<1x256xf32>
    %c56 = arith.constant 56 : index
    %514 = memref.load %arg6[%c56] : memref<72xf32, #tpu.memory_space<smem>>
    %515 = vector.broadcast %514 : f32 to vector<1x256xf32>
    %516 = arith.mulf %515, %513 : vector<1x256xf32>
    %517 = arith.addf %499, %516 : vector<1x256xf32>
    %c57 = arith.constant 57 : index
    %518 = memref.load %arg6[%c57] : memref<72xf32, #tpu.memory_space<smem>>
    %519 = vector.broadcast %518 : f32 to vector<1x256xf32>
    %520 = arith.mulf %519, %513 : vector<1x256xf32>
    %521 = arith.addf %503, %520 : vector<1x256xf32>
    %c58 = arith.constant 58 : index
    %522 = memref.load %arg6[%c58] : memref<72xf32, #tpu.memory_space<smem>>
    %523 = vector.broadcast %522 : f32 to vector<1x256xf32>
    %524 = arith.mulf %523, %513 : vector<1x256xf32>
    %525 = arith.addf %507, %524 : vector<1x256xf32>
    %c59 = arith.constant 59 : index
    %526 = memref.load %arg6[%c59] : memref<72xf32, #tpu.memory_space<smem>>
    %527 = vector.broadcast %526 : f32 to vector<1x256xf32>
    %528 = arith.mulf %527, %513 : vector<1x256xf32>
    %529 = arith.addf %511, %528 : vector<1x256xf32>
    %c240_i32_114 = arith.constant 240 : i32
    %530 = tpu.dynamic_rotate %255 by %c240_i32_114 dim 1 : vector<1x256xf32>, i32 -> vector<1x256xf32>
    %531 = arith.mulf %530, %12 : vector<1x256xf32>
    %c60 = arith.constant 60 : index
    %532 = memref.load %arg6[%c60] : memref<72xf32, #tpu.memory_space<smem>>
    %533 = vector.broadcast %532 : f32 to vector<1x256xf32>
    %534 = arith.mulf %533, %531 : vector<1x256xf32>
    %535 = arith.addf %517, %534 : vector<1x256xf32>
    %c61 = arith.constant 61 : index
    %536 = memref.load %arg6[%c61] : memref<72xf32, #tpu.memory_space<smem>>
    %537 = vector.broadcast %536 : f32 to vector<1x256xf32>
    %538 = arith.mulf %537, %531 : vector<1x256xf32>
    %539 = arith.addf %521, %538 : vector<1x256xf32>
    %c62 = arith.constant 62 : index
    %540 = memref.load %arg6[%c62] : memref<72xf32, #tpu.memory_space<smem>>
    %541 = vector.broadcast %540 : f32 to vector<1x256xf32>
    %542 = arith.mulf %541, %531 : vector<1x256xf32>
    %543 = arith.addf %525, %542 : vector<1x256xf32>
    %c63 = arith.constant 63 : index
    %544 = memref.load %arg6[%c63] : memref<72xf32, #tpu.memory_space<smem>>
    %545 = vector.broadcast %544 : f32 to vector<1x256xf32>
    %546 = arith.mulf %545, %531 : vector<1x256xf32>
    %547 = arith.addf %529, %546 : vector<1x256xf32>
    %c239_i32_115 = arith.constant 239 : i32
    %548 = tpu.dynamic_rotate %254 by %c239_i32_115 dim 1 : vector<1x256xf32>, i32 -> vector<1x256xf32>
    %549 = arith.mulf %548, %13 : vector<1x256xf32>
    %c64 = arith.constant 64 : index
    %550 = memref.load %arg6[%c64] : memref<72xf32, #tpu.memory_space<smem>>
    %551 = vector.broadcast %550 : f32 to vector<1x256xf32>
    %552 = arith.mulf %551, %549 : vector<1x256xf32>
    %553 = arith.addf %535, %552 : vector<1x256xf32>
    %c65 = arith.constant 65 : index
    %554 = memref.load %arg6[%c65] : memref<72xf32, #tpu.memory_space<smem>>
    %555 = vector.broadcast %554 : f32 to vector<1x256xf32>
    %556 = arith.mulf %555, %549 : vector<1x256xf32>
    %557 = arith.addf %539, %556 : vector<1x256xf32>
    %c66 = arith.constant 66 : index
    %558 = memref.load %arg6[%c66] : memref<72xf32, #tpu.memory_space<smem>>
    %559 = vector.broadcast %558 : f32 to vector<1x256xf32>
    %560 = arith.mulf %559, %549 : vector<1x256xf32>
    %561 = arith.addf %543, %560 : vector<1x256xf32>
    %c67 = arith.constant 67 : index
    %562 = memref.load %arg6[%c67] : memref<72xf32, #tpu.memory_space<smem>>
    %563 = vector.broadcast %562 : f32 to vector<1x256xf32>
    %564 = arith.mulf %563, %549 : vector<1x256xf32>
    %565 = arith.addf %547, %564 : vector<1x256xf32>
    %c239_i32_116 = arith.constant 239 : i32
    %566 = tpu.dynamic_rotate %255 by %c239_i32_116 dim 1 : vector<1x256xf32>, i32 -> vector<1x256xf32>
    %567 = arith.mulf %566, %13 : vector<1x256xf32>
    %c68 = arith.constant 68 : index
    %568 = memref.load %arg6[%c68] : memref<72xf32, #tpu.memory_space<smem>>
    %569 = vector.broadcast %568 : f32 to vector<1x256xf32>
    %570 = arith.mulf %569, %567 : vector<1x256xf32>
    %571 = arith.addf %553, %570 : vector<1x256xf32>
    %c69 = arith.constant 69 : index
    %572 = memref.load %arg6[%c69] : memref<72xf32, #tpu.memory_space<smem>>
    %573 = vector.broadcast %572 : f32 to vector<1x256xf32>
    %574 = arith.mulf %573, %567 : vector<1x256xf32>
    %575 = arith.addf %557, %574 : vector<1x256xf32>
    %c70 = arith.constant 70 : index
    %576 = memref.load %arg6[%c70] : memref<72xf32, #tpu.memory_space<smem>>
    %577 = vector.broadcast %576 : f32 to vector<1x256xf32>
    %578 = arith.mulf %577, %567 : vector<1x256xf32>
    %579 = arith.addf %561, %578 : vector<1x256xf32>
    %c71 = arith.constant 71 : index
    %580 = memref.load %arg6[%c71] : memref<72xf32, #tpu.memory_space<smem>>
    %581 = vector.broadcast %580 : f32 to vector<1x256xf32>
    %582 = arith.mulf %581, %567 : vector<1x256xf32>
    %583 = arith.addf %565, %582 : vector<1x256xf32>
    %c0_117 = arith.constant 0 : index
    %c0_118 = arith.constant 0 : index
    %c0_119 = arith.constant 0 : index
    %584 = vector.load %arg8[%c0_117, %c0_118, %c0_119] : memref<1x4x256xf32, #tpu.memory_space<vmem>>, vector<1x1x256xf32>
    %585 = vector.shape_cast %584 : vector<1x1x256xf32> to vector<1x256xf32>
    %586 = vector.shape_cast %254 : vector<1x256xf32> to vector<1x1x256xf32>
    tpu.vector_store %arg8[%c0_117, %c0_118, %c0_119], %586 {strides = array<i32>} : memref<1x4x256xf32, #tpu.memory_space<vmem>>, vector<1x1x256xf32>,
    %c0_120 = arith.constant 0 : index
    %c1_121 = arith.constant 1 : index
    %c0_122 = arith.constant 0 : index
    %587 = vector.load %arg8[%c0_120, %c1_121, %c0_122] : memref<1x4x256xf32, #tpu.memory_space<vmem>>, vector<1x1x256xf32>
    %588 = vector.shape_cast %587 : vector<1x1x256xf32> to vector<1x256xf32>
    %589 = vector.shape_cast %255 : vector<1x256xf32> to vector<1x1x256xf32>
    tpu.vector_store %arg8[%c0_120, %c1_121, %c0_122], %589 {strides = array<i32>} : memref<1x4x256xf32, #tpu.memory_space<vmem>>, vector<1x1x256xf32>,
    %cst = arith.constant 5.000000e-01 : f32
    %590 = vector.broadcast %cst : f32 to vector<1x256xf32>
    %591 = arith.mulf %590, %571 : vector<1x256xf32>
    %592 = math.tanh %591 : vector<1x256xf32>
    %cst_123 = arith.constant 8.000000e-01 : f32
    %593 = vector.broadcast %cst_123 : f32 to vector<1x256xf32>
    %594 = arith.mulf %593, %592 : vector<1x256xf32>
    %595 = math.exp %594 : vector<1x256xf32>
    %596 = arith.mulf %58, %595 : vector<1x256xf32>
    %597 = arith.addf %596, %579 : vector<1x256xf32>
    %c0_124 = arith.constant 0 : index
    %c2_125 = arith.constant 2 : index
    %c0_126 = arith.constant 0 : index
    %598 = vector.load %arg8[%c0_124, %c2_125, %c0_126] : memref<1x4x256xf32, #tpu.memory_space<vmem>>, vector<1x1x256xf32>
    %599 = vector.shape_cast %598 : vector<1x1x256xf32> to vector<1x256xf32>
    %600 = vector.shape_cast %597 : vector<1x256xf32> to vector<1x1x256xf32>
    tpu.vector_store %arg8[%c0_124, %c2_125, %c0_126], %600 {strides = array<i32>} : memref<1x4x256xf32, #tpu.memory_space<vmem>>, vector<1x1x256xf32>,
    %cst_127 = arith.constant 5.000000e-01 : f32
    %601 = vector.broadcast %cst_127 : f32 to vector<1x256xf32>
    %602 = arith.mulf %601, %575 : vector<1x256xf32>
    %603 = math.tanh %602 : vector<1x256xf32>
    %cst_128 = arith.constant 8.000000e-01 : f32
    %604 = vector.broadcast %cst_128 : f32 to vector<1x256xf32>
    %605 = arith.mulf %604, %603 : vector<1x256xf32>
    %606 = math.exp %605 : vector<1x256xf32>
    %607 = arith.mulf %73, %606 : vector<1x256xf32>
    %608 = arith.addf %607, %583 : vector<1x256xf32>
    %c0_129 = arith.constant 0 : index
    %c3_130 = arith.constant 3 : index
    %c0_131 = arith.constant 0 : index
    %609 = vector.load %arg8[%c0_129, %c3_130, %c0_131] : memref<1x4x256xf32, #tpu.memory_space<vmem>>, vector<1x1x256xf32>
    %610 = vector.shape_cast %609 : vector<1x1x256xf32> to vector<1x256xf32>
    %611 = vector.shape_cast %608 : vector<1x256xf32> to vector<1x1x256xf32>
    tpu.vector_store %arg8[%c0_129, %c3_130, %c0_131], %611 {strides = array<i32>} : memref<1x4x256xf32, #tpu.memory_space<vmem>>, vector<1x1x256xf32>,
    return
  }
  func.func @transform_0(%arg0: i32) -> (i32, i32, i32) {
    %c0_i32 = arith.constant 0 : i32
    %c0_i32_0 = arith.constant 0 : i32
    %c0_i32_1 = arith.constant 0 : i32
    return %arg0, %c0_i32, %c0_i32_0 : i32, i32, i32
  }
  func.func @transform_1(%arg0: i32) -> (i32, i32) {
    %c0_i32 = arith.constant 0 : i32
    %c0_i32_0 = arith.constant 0 : i32
    %c0_i32_1 = arith.constant 0 : i32
    return %c0_i32, %c0_i32_0 : i32, i32
  }
  func.func @transform_2(%arg0: i32) -> (i32, i32) {
    %c0_i32 = arith.constant 0 : i32
    %c0_i32_0 = arith.constant 0 : i32
    %c0_i32_1 = arith.constant 0 : i32
    return %c0_i32, %c0_i32_0 : i32, i32
  }
  func.func @transform_3(%arg0: i32) -> i32 {
    %c0_i32 = arith.constant 0 : i32
    %c0_i32_0 = arith.constant 0 : i32
    return %c0_i32 : i32
  }
  func.func @transform_4(%arg0: i32) -> i32 {
    %c0_i32 = arith.constant 0 : i32
    %c0_i32_0 = arith.constant 0 : i32
    return %c0_i32 : i32
  }
  func.func @transform_5(%arg0: i32) -> i32 {
    %c0_i32 = arith.constant 0 : i32
    %c0_i32_0 = arith.constant 0 : i32
    return %c0_i32 : i32
  }
  func.func @transform_6(%arg0: i32) -> i32 {
    %c0_i32 = arith.constant 0 : i32
    %c0_i32_0 = arith.constant 0 : i32
    return %c0_i32 : i32
  }
  func.func @transform_7(%arg0: i32) -> (i32, i32, i32) {
    %c0_i32 = arith.constant 0 : i32
    %c0_i32_0 = arith.constant 0 : i32
    %c0_i32_1 = arith.constant 0 : i32
    return %arg0, %c0_i32, %c0_i32_0 : i32, i32, i32
  }
}

</mosaic_0001>

<bundles_post_ra>
// kernel: tpu_custom_call.1
= control target key start
LH: loop header
LB: loop body
LE: loop exit
PB: predicated region body
PF: predicated region fallthrough
CT: control target
= control target key end

     0   :  { %s4139_s0 = inlined_call_operand.hbm [shape: f32[2,4,256], index: 0, kind: input, shape index: {}]   ;;  %s4140_s1 = inlined_call_operand.hbm [shape: f32[9,256], index: 1, kind: input, shape index: {}]   ;;  %s4141_s2 = inlined_call_operand.vmem [shape: f32[4,4], index: 2, kind: input, shape index: {}]   ;;  %s4142_s3 = inlined_call_operand.vmem [shape: f32[36], index: 3, kind: input, shape index: {}]   ;;  %s4143_s4 = inlined_call_operand.vmem [shape: f32[2], index: 4, kind: input, shape index: {}]   ;;  %s4144_s5 = inlined_call_operand.vmem [shape: f32[72], index: 5, kind: input, shape index: {}]   ;;  %s4145_s6 = inlined_call_operand.vmem [shape: f32[4], index: 6, kind: input, shape index: {}]   ;;  %s4146_s7 = inlined_call_operand.hbm [shape: f32[2,4,256], index: 7, kind: output, shape index: {}]  }
   0x1   :  { %4267 = sst [smem:[#allocation81_spill]] %s4139_s0 }
   0x2   :  { %4268 = sst [smem:[#allocation82_spill]] %s4140_s1 }
   0x3   :  { %4269 = sst [smem:[#allocation83_spill]] %s4141_s2 }
   0x4   :  { %4270 = sst [smem:[#allocation84_spill]] %s4142_s3 }
   0x5   :  { %4271 = sst [smem:[#allocation85_spill]] %s4143_s4 }
   0x6   :  { %4272 = sst [smem:[#allocation86_spill]] %s4144_s5 }
   0x7   :  { %4273 = sst [smem:[#allocation87_spill]] %s4145_s6 }
   0x8   :  { %4274 = sst [smem:[#allocation88_spill]] %s4146_s7 }
   0x9   :  { %12 = vsyncpa [#allocation3], 0 }
   0xa   :  { %14 = vsyncpa [#allocation3 + $0x1], 0 }
   0xb   :  { %15 = vsyncpa [#allocation7], 0 }
   0xc   :  { %16 = vsyncpa [#allocation5], 0 }
   0xd   :  { %17 = vsyncpa [#allocation10], 0 }
   0xe   :  { %18 = vsyncpa [#allocation13], 0 }
   0xf   :  { %19 = vsyncpa [#allocation4], 0 }
  0x10   :  { %21 = vsyncpa [#allocation4 + $0x1], 0  ;;  %s2522_s24 = smov 0   ;;  %s2524_s25 = smov 0  }
  0x11   :  { %s2526_s26 = smov 0   ;;  %s2528_s27 = smov 0  }
  0x12 LB: > { %4275 = sst [smem:[#allocation22_spill]] %s2449_s24  ;;  %s4279_s3 = sld [smem:[#allocation84_spill]]  ;;  %s2461_s27 = sphi %s2528_s27, %s4592_s27   ;;  %s2457_s26 = sphi %s2526_s26, %s4595_s26   ;;  %s2453_s25 = sphi %s2524_s25, %s4594_s25   ;;  %s2449_s24 = sphi %s2522_s24, %s4593_s24  }
  0x13   : > { %4276 = sst [smem:[#allocation23_spill]] %s2453_s25  ;;  %s2546_s8 = sadd.s32 4294967295, %s2461_s27  }
  0x14   : > { %4277 = sst [smem:[#allocation24_spill]] %s2457_s26  ;;  %p1945_p0 = scmp.ge.s32.totalorder %s2461_s27, 1 }
  0x15   : > { %4278 = sst [smem:[#allocation25_spill]] %s2461_s27  ;;  %p4147_p1 = scmp.eq.s32.totalorder %s2546_s8, 0 }
  0x16   : > { %4280 = sst [smem:[#allocation26_spill]] %s2546_s8  ;;  %p210_p2 = scmp.lt.s32.totalorder %s2461_s27, 3 }
  0x17   : > { %s4282_s5 = sld [smem:[#allocation86_spill]]  ;;  %s2463_s14 = smov [#allocation6]  }
  0x18   : > { %s247_s30 = sshll.u32 %s4279_s3, 4  ;;  %p2551_p3 = pnand %p1945_p0, %p210_p2  ;;  %s248_s30 = int_to_ptr.vmem [resolvable:$true] %s247_s30 }
  0x19   : > { %s222_s15 = sshll.u32 %s2463_s14, 4  ;;  %s4284_s2 = sld [smem:[#allocation83_spill]]  ;;  %s2567_s15 = int_to_ptr.vmem [resolvable:$true] %s222_s15 }
  0x1a   : > { %s4281_s9 = scalar_select %p2551_p3, 1, 0 }
  0x1b   : > { %p2140_p5 = pneg %p2551_p3  ;;  %s2246_s19 = scalar_lea.vmem %s248_s30, 16 }
  0x1c   : > { %p2247_p7 = scmp.ne.s32.totalorder %s248_s30, %s2246_s19  ;;  %p2254_p11 = scmp.lt.s32.totalorder %s248_s30, %s248_s30 }
  0x1d   : > { %s269_s12 = sshll.u32 %s4282_s5, 4  ;;  %p2563_p6 = pnand %p2140_p5, %p4147_p1  ;;  %s270_s12 = int_to_ptr.vmem [resolvable:$true] %s269_s12 }
  0x1e   : > { %p2255_p12 = scmp.lt.s32.totalorder %s2246_s19, %s2246_s19 }
  0x1f   : > { %s236_s18 = sshll.u32 %s4284_s2, 4  ;;  %p2574_p8 = pneg %p2563_p6  ;;  %s237_s18 = int_to_ptr.vmem [resolvable:$true] %s236_s18 }
  0x20   : > { %p2256_p13 = por %p2255_p12, %p2254_p11 }
  0x21   : > { %p2249_p9 = pnand %p2574_p8, %p2247_p7 }
  0x23   : > { %p2250_p10 = pneg %p2249_p9 }
  0x25   : > { %p2257_p0 = pnand %p2256_p13, %p2250_p10 }
  0x27   : > { %2260 = shalt.err (!%p2257_p0)
}
  0x28   : > { %s2464_s21 = smov [#allocation9]   ;;  %s2261_s22 = scalar_lea.vmem %s270_s12, 16 }
  0x29   : > { %2149 = dma.vmem_to_smem (!%p2563_p6), %s248_s30, 16, %s2464_s21, [#allocation10]  }
  0x2a   : > { %p2262_p2 = scmp.ne.s32.totalorder %s270_s12, %s2261_s22  ;;  %p2269_p1 = scmp.lt.s32.totalorder %s270_s12, %s270_s12 }
  0x2b   : > { %p2270_p3 = scmp.lt.s32.totalorder %s2261_s22, %s2261_s22 }
  0x2c   : > { %p2264_p5 = pnand %p2262_p2, %p2574_p8 }
  0x2d   : > { %p2271_p7 = por %p2270_p3, %p2269_p1 }
  0x2e   : > { %p2265_p4 = pneg %p2264_p5 }
  0x30   : > { %p2272_p9 = pnand %p2271_p7, %p2265_p4 }
  0x32   : > { %2275 = shalt.err (!%p2272_p9)
}
  0x33   : > { %s2465_s23 = smov [#allocation12]   ;;  %s4286_s1 = sld [smem:[#allocation82_spill]] }
  0x34   : > { %2155 = dma.vmem_to_smem (!%p2563_p6), %s270_s12, 16, %s2465_s23, [#allocation13]  }
  0x39   : > { %s2276_s10 = scalar_lea.hbm %s4286_s1, 512 }
  0x3a   : > { %p2277_p10 = scmp.ne.s32.totalorder %s4286_s1, %s2276_s10  ;;  %p2283_p1 = scmp.lt.u32.totalorder %s2276_s10, %s4286_s1 }
  0x3c   : > { %p2279_p11 = pnand %p2277_p10, %p2574_p8 }
  0x3e   : > { %p2280_p12 = pneg %p2279_p11 }
  0x40   : > { %p2285_p3 = pnand %p2283_p1, %p2280_p12 }
  0x42   : > { %2288 = shalt.err (!%p2285_p3)
}
  0x43   : > { %s2289_s12 = scalar_lea.vmem %s2567_s15, 512  ;;  %p2297_p2 = scmp.lt.s32.totalorder %s2567_s15, %s2567_s15 }
  0x44   : > { %p2290_p4 = scmp.ne.s32.totalorder %s2567_s15, %s2289_s12  ;;  %p2298_p5 = scmp.lt.s32.totalorder %s2289_s12, %s2289_s12 }
  0x46   : > { %p2292_p13 = pnand %p2290_p4, %p2574_p8  ;;  %p2299_p7 = por %p2298_p5, %p2297_p2 }
  0x48   : > { %p2293_p0 = pneg %p2292_p13 }
  0x4a   : > { %p2300_p9 = pnand %p2299_p7, %p2293_p0 }
  0x4c   : > { %2303 = shalt.err (!%p2300_p9)
}
  0x4d   : > { %s2466_s17 = smov 256   ;;  %s2467_s19 = smov 16  }
  0x4e   : > { %2143 = dma.hbm_to_vmem [thread:$0]  (!%p2563_p6), %s4286_s1, 512, %s2567_s15, [#allocation7], %s2466_s17, %s2466_s17, %s2467_s19  }
  0x4f   : > { %s2304_s29 = scalar_lea.vmem %s237_s18, 64  ;;  %p2312_p1 = scmp.lt.s32.totalorder %s237_s18, %s237_s18 }
  0x50   : > { %p2305_p10 = scmp.ne.s32.totalorder %s237_s18, %s2304_s29  ;;  %p2313_p3 = scmp.lt.s32.totalorder %s2304_s29, %s2304_s29 }
  0x52   : > { %p2307_p11 = pnand %p2305_p10, %p2574_p8  ;;  %p2314_p4 = por %p2313_p3, %p2312_p1 }
  0x54   : > { %p2308_p12 = pneg %p2307_p11 }
  0x56   : > { %p2315_p13 = pnand %p2314_p4, %p2308_p12 }
  0x58   : > { %2318 = shalt.err (!%p2315_p13)
}
  0x59   : > { %s2468_s10 = smov [#allocation8]   ;;  %s4287_s4 = sld [smem:[#allocation85_spill]] }
  0x5a   : > { %2146 = dma.vmem_to_smem (!%p2563_p6), %s237_s18, 64, %s2468_s10, [#allocation5]  }
  0x5b   : > { %s4288_s6 = sld [smem:[#allocation87_spill]] }
  0x5f   : > { %s258_s11 = sshll.u32 %s4287_s4, 4  ;;  %s259_s11 = int_to_ptr.vmem [resolvable:$true] %s258_s11 }
  0x60   : > { %s2319_s17 = scalar_lea.vmem %s259_s11, 16  ;;  %p2327_p7 = scmp.lt.s32.totalorder %s259_s11, %s259_s11 }
  0x61   : > { %s280_s12 = sshll.u32 %s4288_s6, 4  ;;  %p2320_p0 = scmp.ne.s32.totalorder %s259_s11, %s2319_s17  ;;  %s281_s12 = int_to_ptr.vmem [resolvable:$true] %s280_s12 }
  0x62   : > { %p2328_p9 = scmp.lt.s32.totalorder %s2319_s17, %s2319_s17 }
  0x63   : > { %p2322_p2 = pnand %p2320_p0, %p2574_p8 }
  0x64   : > { %p2329_p10 = por %p2328_p9, %p2327_p7 }
  0x65   : > { %p2323_p5 = pneg %p2322_p2 }
  0x67   : > { %p2330_p11 = pnand %p2329_p10, %p2323_p5 }
  0x69   : > { %2333 = shalt.err (!%p2330_p11)
}
  0x6a   : > { %s2469_s18 = smov [#allocation11]   ;;  %s2334_s19 = scalar_lea.vmem %s281_s12, 16 }
  0x6b   : > { %2152 = dma.vmem_to_smem (!%p2563_p6), %s259_s11, 16, %s2469_s18, [#allocation10]  }
  0x6c   : > { %p2335_p12 = scmp.ne.s32.totalorder %s281_s12, %s2334_s19  ;;  %p2342_p4 = scmp.lt.s32.totalorder %s281_s12, %s281_s12 }
  0x6d   : > { %p2343_p13 = scmp.lt.s32.totalorder %s2334_s19, %s2334_s19 }
  0x6e   : > { %p2337_p1 = pnand %p2335_p12, %p2574_p8 }
  0x6f   : > { %p2344_p0 = por %p2343_p13, %p2342_p4 }
  0x70   : > { %p2338_p3 = pneg %p2337_p1 }
  0x72   : > { %p2345_p2 = pnand %p2344_p0, %p2338_p3 }
  0x74   : > { %2348 = shalt.err (!%p2345_p2)
}
  0x75   : > { %s2470_s21 = smov [#allocation14]   ;;  %s1944_s20 = sadd.s32 4294967294, %s2461_s27  }
  0x76   : > { %2158 = dma.vmem_to_smem (!%p2563_p6), %s281_s12, 16, %s2470_s21, [#allocation13]  }
  0x77   : > { %s2633_s22 = sadd.s32 1, %s2461_s27   ;;  %s34_s23 = sadd.s32 1, %s2457_s26 }
  0x78   : > { %4289 = sst [smem:[#allocation27_spill]] %s2633_s22  ;;  %s31_s13 = ssub.s32 %s2461_s27, %s2633_s22 }
  0x79   : > { %p32_p8 = scmp.eq.s32.totalorder %s31_s13, 0  ;;  %p41_p5 = scmp.ne.s32.totalorder %s2457_s26, %s2453_s25 }
  0x7a   : > { %p42_p7 = scmp.eq.s32.totalorder %s2461_s27, 0  ;;  %p47_p9 = scmp.ne.s32.totalorder %s2453_s25, %s2449_s24 }
  0x7b   : > { %s2644_s28 = scalar_select %p32_p8, %s2457_s26, %s34_s23  }
  0x7c   : > { %p2646_p10 = por %p42_p7, %p41_p5  ;;  %p4292_p11 = scmp.eq.s32.totalorder %s2546_s8, 0 }
  0x7d   : > { %4290 = sst [smem:[#allocation28_spill]] %s2644_s28  ;;  %p197_p12 = scmp.eq.s32.totalorder %s2546_s8, 1 }
  0x7e   : > { %p2652_p6 = por %p4292_p11, %p47_p9  ;;  %p203_p1 = scmp.eq.s32.totalorder %s1944_s20, 1 }
  0x7f   : > { %p2173_p3 = scmp.lt.s32.totalorder %s2461_s27, 2  ;;  %s291_s15 = sand.u32 1, %s2457_s26  }
  0x80   : > { %p2659_p4 = por %p197_p12, %p41_p5  ;;  %p2663_p13 = por %p203_p1, %p47_p9 }
  0x81   : > { %s1953_s14 = sshll.u32 %s291_s15, 3  ;;  %s2110_s16 = sshll.u32 %s2461_s27, 7 }
  0x82   : > { %s4294_s30 = scalar_select %p2659_p4, 1, 0 }
  0x83   : > { %s4296_s11 = scalar_select %p2663_p13, 1, 0 }
  0x84   : > { %4295 = sst [smem:[#allocation29_spill]] %s4294_s30  ;;  %s4298_s0 = sld [smem:[#allocation81_spill]] }
  0x85   : > { %4297 = sst [smem:[#allocation30_spill]] %s4296_s11  ;;  %s295_s19 = scalar_lea.vmem [#allocation2], %s1953_s14 }
  0x86   : > { %s303_s21 = sshll.u32 %s295_s19, 4  ;;  %p2677_p0 = pnand %p2173_p3, %p2646_p10  ;;  %s2673_s21 = int_to_ptr.vmem [resolvable:$true] %s303_s21 }
  0x87   : > { %s292_s13 = scalar_lea.sflag [#allocation3], %s291_s15 }
  0x88   : > { %p2351_p8 = pneg %p2677_p0 }
  0x8a   : > { %s2671_s18 = scalar_lea.hbm %s4298_s0, %s2110_s16  ;;  %s2354_s12 = scalar_lea.hbm %s4298_s0, 256 }
  0x8b   : > { %s2349_s23 = scalar_lea.hbm %s2671_s18, 128  ;;  %p2355_p9 = scmp.lt.u32.totalorder %s2671_s18, %s4298_s0 }
  0x8c   : > { %p2350_p2 = scmp.ne.s32.totalorder %s2671_s18, %s2349_s23  ;;  %p2356_p10 = scmp.lt.u32.totalorder %s2354_s12, %s2349_s23 }
  0x8d   : > { %p2358_p12 = scmp.lt.u32.totalorder %s2349_s23, %s2671_s18 }
  0x8e   : > { %p2352_p5 = pnand %p2351_p8, %p2350_p2  ;;  %p2357_p11 = por %p2356_p10, %p2355_p9 }
  0x90   : > { %p2353_p7 = pneg %p2352_p5  ;;  %p2359_p1 = por %p2358_p12, %p2357_p11 }
  0x92   : > { %p2360_p3 = pnand %p2359_p1, %p2353_p7 }
  0x94   : > { %2363 = shalt.err (!%p2360_p3)
}
  0x95   : > { %s2364_s15 = scalar_lea.vmem %s2673_s21, 128  ;;  %s2471_s19 = smov [#allocation2]  }
  0x96   : > { %p2365_p2 = scmp.ne.s32.totalorder %s2673_s21, %s2364_s15  ;;  %s2369_s14 = sshll.u32 %s2471_s19, 4  ;;  %s2370_s14 = int_to_ptr.vmem [resolvable:$false] %s2369_s14 }
  0x97   : > { %s2371_s16 = scalar_lea.vmem %s2370_s14, 256  ;;  %p2372_p4 = scmp.lt.s32.totalorder %s2673_s21, %s2370_s14 }
  0x98   : > { %p2367_p5 = pnand %p2365_p2, %p2351_p8  ;;  %p2373_p9 = scmp.lt.s32.totalorder %s2371_s16, %s2364_s15 }
  0x9a   : > { %p2368_p13 = pneg %p2367_p5  ;;  %p2374_p10 = por %p2373_p9, %p2372_p4 }
  0x9c   : > { %p2375_p11 = pnand %p2374_p10, %p2368_p13 }
  0x9e   : > { %2378 = shalt.err (!%p2375_p11)
}
  0x9f   : > { %2162 = dma.hbm_to_vmem [thread:$0]  (!%p2677_p0), %s2671_s18, 128, %s2673_s21, %s292_s13  }
  0xa0   : > { %p4300_p7 = scmp.ne.s32.totalorder %s4281_s9, 0 }
  0xa2   : > { %312 = sbr.rel (%p4300_p7) target bundleno = 690 (0x2b2), region = 48 }
  0xa9   : > { %s2709_s23 = sand.u32 1, %s2453_s25  }
  0xaa   : > { %4301 = sst [smem:[#allocation31_spill]] %s2709_s23  ;;  %s4160_s12 = sshll.u32 %s2709_s23, 3 }
  0xab   : > { %s315_s29 = scalar_lea.sflag [#allocation3], %s2709_s23  ;;  %s318_s17 = scalar_lea.vmem [#allocation2], %s4160_s12 }
  0xac   : > { %2424 = dma.done.wait (%p2652_p6), %s315_s29, 128  }
  0xad   : > { %2426 = vsyncadd (%p2652_p6), %s315_s29, 4294967168  ;;  %p4302_p4 = scmp.eq.s32.totalorder %s2546_s8, 0 }
  0xaf   : > { %2428 = dma.done.wait (%p4302_p4), [#allocation7], 512   ;;  %p4303_p13 = pmov %p4302_p4 }
  0xb0   : > { %p4304_p0 = pmov %p4302_p4 }
  0xb1   : > { %2430 = vsyncadd (%p4303_p13), [#allocation7], 4294966784 }
  0xb2   : > { %2432 = dma.done.wait (%p4304_p0), [#allocation5], 64   ;;  %p4305_p8 = pmov %p4304_p0 }
  0xb3   : > { %p4306_p12 = pmov %p4304_p0 }
  0xb4   : > { %2434 = vsyncadd (%p4305_p8), [#allocation5], 4294967232 }
  0xb5   : > { %2436 = dma.done.wait (%p4306_p12), [#allocation10], 32   ;;  %p4307_p1 = pmov %p4304_p0 }
  0xb6   : > { %p4308_p6 = pmov %p4304_p0 }
  0xb7   : > { %2438 = vsyncadd (%p4307_p1), [#allocation10], 4294967264 }
  0xb8   : > { %2440 = dma.done.wait (%p4308_p6), [#allocation13], 32   ;;  %p4309_p3 = pmov %p4304_p0 }
  0xba   : > { %2442 = vsyncadd (%p4309_p3), [#allocation13], 4294967264 }
  0xbb   : > { %347 = sfence }
  0xbc   : > { %s1985_s9 = sld [smem:[#allocation8 + $0x180]]  ;;  %s1986_s10 = sld [smem:[#allocation8 + $0x181]]  ;;  %v2735_v0 = vld [vmem:[%s318_s17] sm:$0xff]  ;;  %v4175_v1 = vlaneseq  ;;  %v375_v37 = vld [vmem:[#allocation6] ss:$8 sm:$0x3] }
  0xbd   : > { %s1988_s18 = sld [smem:[#allocation8 + $0x182]]  ;;  %s1990_s21 = sld [smem:[#allocation8 + $0x183]]  ;;  %v377_v40 = vld [vmem:[#allocation6 + $0x1] ss:$8 sm:$0x3] }
  0xbe   : > { %s1978_s20 = sld [smem:[#allocation8 + $0x100]]  ;;  %s1979_s13 = sld [smem:[#allocation8 + $0x101]]  ;;  %v2742_v12 = vshrl.u32 %v4175_v1, 7  ;;  %v2823_v38 = vand.u32 127, %v4175_v1 }
  0xbf   : > { %s1981_s15 = sld [smem:[#allocation8 + $0x102]]  ;;  %s1983_s19 = sld [smem:[#allocation8 + $0x103]]  ;;  %v379_v49 = vld [vmem:[#allocation6 + $0x2] ss:$8 sm:$0x3] }
  0xc0   : > { %v2749_v26 = vsub.s32 0, %v2742_v12  ;;  %v2754_v30 = vsub.s32 4, %v2742_v12  ;;  %s4165_s14 = smov 17   ;;  %s4163_s16 = smov 16   ;;  %v2826_v39 = vsub.s32 1, %v2742_v12  ;;  %vm519_vm0 = vcmp.lt.s32.totalorder %v2823_v38, 17 }
  0xc1   : > { %s4158_s29 = smov 15   ;;  %s4156_s17 = smov 1   ;;  %v381_v57 = vld [vmem:[#allocation6 + $0x3] ss:$8 sm:$0x3]  ;;  %vm582_vm1 = vcmp.lt.s32.totalorder %v2823_v38, 16 }
  0xc2   : > { %v472_v2 = vstv %s1985_s9  ;;  %v475_v3 = vstv %s1986_s10  ;;  %s4154_s9 = smov 127   ;;  %s4150_s10 = smov 113   ;;  %v2846_v41 = vrot.slane %v375_v37, %v2749_v26  ;;  %v2849_v42 = vrot.slane %v375_v37, %v2826_v39 }
  0xc3   : > { %v473_v4 = vmul.f32 %v472_v2, %v2735_v0  ;;  %v476_v5 = vmul.f32 %v475_v3, %v2735_v0  ;;  %v483_v6 = vstv %s1988_s18  ;;  %v491_v7 = vstv %s1990_s21  ;;  %s4152_s18 = smov 112   ;;  %s4161_s21 = smov 111   ;;  %v383_v2 = vld [vmem:[#allocation6 + $0x5] ss:$8 sm:$0x3] }
  0xc4   : > { %v484_v8 = vmul.f32 %v483_v6, %v2735_v0  ;;  %v492_v9 = vmul.f32 %v491_v7, %v2735_v0  ;;  %v445_v10 = vstv %s1978_s20  ;;  %v448_v13 = vstv %s1979_s13  ;;  %s2798_s20 = sld [smem:[#allocation9 + $0x2]]  ;;  %s2800_s13 = sld [smem:[#allocation9 + $0x3]] }
  0xc5   : > { %v1987_v11 = vrot.slane %v476_v5, 9  ;;  %v456_v14 = vstv %s1981_s15  ;;  %v446_v16 = vmul.f32 %v445_v10, %v2735_v0  ;;  %v449_v17 = vmul.f32 %v448_v13, %v2735_v0  ;;  %s2802_s15 = sld [smem:[#allocation9]]  ;;  %s2816_s12 = sld [smem:[#allocation9 + $0x11]] }
  0xc6   : > { %v1989_v15 = vrot.slane %v484_v8, 10  ;;  %v457_v18 = vmul.f32 %v456_v14, %v2735_v0  ;;  %v1991_v20 = vrot.slane %v492_v9, 11  ;;  %v464_v21 = vstv %s1983_s19  ;;  %s2804_s19 = sld [smem:[#allocation9 + $0x1]]  ;;  %s2830_s0 = sld [smem:[#allocation9 + $0x7]] }
  0xc7   : > { %v481_v19 = vadd.f32 %v1987_v11, %v473_v4  ;;  %v1980_v22 = vrot.slane %v449_v17, 9  ;;  %v465_v24 = vmul.f32 %v464_v21, %v2735_v0  ;;  %s2832_s1 = sld [smem:[#allocation9 + $0x8]]  ;;  %s2834_s2 = sld [smem:[#allocation9 + $0x9]]  ;;  %v2862_v51 = vrot.slane %v377_v40, %v2749_v26 }
  0xc8   : > { %v1982_v23 = vrot.slane %v457_v18, 10  ;;  %s2836_s3 = sld [smem:[#allocation9 + $0xa]]  ;;  %s2838_s4 = sld [smem:[#allocation9 + $0xb]]  ;;  %v2865_v52 = vrot.slane %v377_v40, %v2826_v39  ;;  %v2879_v62 = vrot.slane %v379_v49, %v2749_v26  ;;  %v2882_v63 = vrot.slane %v379_v49, %v2826_v39 }
  0xc9   : > { %v489_v25 = vadd.f32 %v1989_v15, %v481_v19  ;;  %v454_v27 = vadd.f32 %v1980_v22, %v446_v16  ;;  %v1984_v28 = vrot.slane %v465_v24, 11  ;;  %s2840_s5 = sld [smem:[#allocation9 + $0xc]]  ;;  %s2842_s6 = sld [smem:[#allocation9 + $0xd]]  ;;  %v2907_v14 = vrot.slane %v381_v57, %v2749_v26 }
  0xca   : > { %v567_v43 = vstv %s2798_s20  ;;  %v573_v44 = vstv %s2800_s13  ;;  %s2853_s28 = sld [smem:[#allocation9 + $0xe]]  ;;  %s2855_s26 = sld [smem:[#allocation9 + $0xf]]  ;;  %v2910_v15 = vrot.slane %v381_v57, %v2826_v39  ;;  %v2924_v21 = vrot.slane %v383_v2, %v2826_v39 }
  0xcb   : > { %v2751_v29 = vadd.f32 %v1991_v20, %v489_v25  ;;  %v462_v31 = vadd.f32 %v1982_v23, %v454_v27  ;;  %v536_v47 = vstv %s2802_s15  ;;  %v751_v54 = vstv %s2816_s12  ;;  %s2873_s25 = sld [smem:[#allocation9 + $0x14]]  ;;  %s2884_s12 = sld [smem:[#allocation9 + $0x15]] }
  0xcc   : > { %v542_v48 = vstv %s2804_s19  ;;  %v625_v61 = vstv %s2830_s0  ;;  %s2916_s22 = sld [smem:[#allocation9 + $0x19]]  ;;  %v2921_v20 = vrot.slane %v383_v2, %v2749_v26  ;;  %s2926_s27 = sld [smem:[#allocation9 + $0x1a]]  ;;  %vm634_vm2 = vcmp.lt.s32.totalorder %v2823_v38, 15 }
  0xcd   : > { %4310 = vst [vmem:[#allocation32_spill] sm:$0xff] %v2751_v29  ;;  %v551_v32 = vrot.slane %v2751_v29, %v2749_v26  ;;  %v2758_v33 = vadd.f32 %v1984_v28, %v462_v31  ;;  %v555_v34 = vrot.slane %v2751_v29, %v2754_v30  ;;  %v651_v4 = vstv %s2832_s1  ;;  %s2928_s11 = sld [smem:[#allocation9 + $0x1b]]  ;;  %v385_v28 = vld [vmem:[#allocation6 + $0x6] ss:$8 sm:$0x3]  ;;  %s2946_s24 = sld [smem:[#allocation9 + $0x1c]] }
  0xce   : > { %v657_v5 = vstv %s2834_s2  ;;  %v671_v9 = vstv %s2836_s3  ;;  %v677_v10 = vstv %s2838_s4  ;;  %s2948_s7 = sld [smem:[#allocation9 + $0x1d]]  ;;  %s2985_s30 = sld [smem:[#allocation9 + $0x1e]]  ;;  %vm686_vm3 = vcmp.lt.s32.totalorder %v2823_v38, 1 }
  0xcf   : > { %4311 = vst [vmem:[#allocation33_spill] sm:$0xff] %v2758_v33  ;;  %558 = vrot.lane.b32.xlu1 %v551_v32, %s4165_s14  ;;  %v506_v35 = vrot.slane %v2758_v33, %v2749_v26  ;;  %v510_v36 = vrot.slane %v2758_v33, %v2754_v30  ;;  %v2892_v7 = vmul.f32 %v751_v54, %v2758_v33  ;;  %v703_v16 = vstv %s2840_s5  ;;  %s2987_s8 = sld [smem:[#allocation9 + $0x1f]]  ;;  %s2999_s15 = sld [smem:[#allocation9 + $0x20]] }
  0xd0   : > { %v709_v17 = vstv %s2842_s6  ;;  %v723_v18 = vstv %s2853_s28  ;;  %v729_v19 = vstv %s2855_s26  ;;  %s3001_s19 = sld [smem:[#allocation8 + $0x1]]  ;;  %s3080_s0 = sld [smem:[#allocation8]]  ;;  %vm802_vm4 = vcmp.lt.s32.totalorder %v2823_v38, 127 }
  0xd1   : > { %513 = vrot.lane.b32.xlu0 %v506_v35, %s4165_s14  ;;  %s3097_s1 = sld [smem:[#allocation8 + $0x2]]  ;;  %s3099_s2 = sld [smem:[#allocation8 + $0x80]]  ;;  %vm854_vm5 = vcmp.lt.s32.totalorder %v2823_v38, 113  ;;  %vm906_vm6 = vcmp.lt.s32.totalorder %v2823_v38, 112  ;;  %vm958_vm7 = vcmp.lt.s32.totalorder %v2823_v38, 111 }
  0xd2   : > { %s3109_s3 = sld [smem:[#allocation8 + $0x3]]  ;;  %s3111_s4 = sld [smem:[#allocation8 + $0x82]] }
  0xd3   : > { %560 = vrot.lane.b32.xlu1 %v555_v34, %s4165_s14  ;;  %s3123_s5 = sld [smem:[#allocation8 + $0x83]]  ;;  %s3125_s6 = sld [smem:[#allocation9 + $0x22]] }
  0xd4   : > { %s4354_s28 = smov 113   ;;  %s3382_s20 = sld [smem:[#allocation12 + $0x22]] }
  0xd5   : > { %515 = vrot.lane.b32.xlu0 %v510_v36, %s4165_s14  ;;  %s2828_s14 = sld [smem:[#allocation9 + $0x6]]  ;;  %s3384_s13 = sld [smem:[#allocation12 + $0x23]] }
  0xd7   : > { %580 = vrot.lane.b32.xlu1 %v510_v36, %s4163_s16 }
  0xd9   : > { %578 = vrot.lane.b32.xlu0 %v506_v35, %s4163_s16 }
  0xdb   : > { %612 = vrot.lane.b32.xlu1 %v555_v34, %s4163_s16  ;;  %v619_v60 = vstv %s2828_s14  ;;  %s3140_s14 = sld [smem:[#allocation9 + $0x23]] }
  0xdd   : > { %610 = vrot.lane.b32.xlu0 %v551_v32, %s4163_s16  ;;  %s2820_s16 = sld [smem:[#allocation9 + $0x13]] }
  0xdf   : > { %632 = vrot.lane.b32.xlu1 %v510_v36, %s4158_s29 }
  0xe1   : > { %630 = vrot.lane.b32.xlu0 %v506_v35, %s4158_s29 }
  0xe3   : > { %664 = vrot.lane.b32.xlu1 %v555_v34, %s4158_s29  ;;  %v783_v59 = vstv %s2820_s16  ;;  %s2894_s16 = sld [smem:[#allocation9 + $0x16]] }
  0xe4   : > { %v2904_v13 = vmul.f32 %v783_v59, %v2751_v29  ;;  %v387_v59 = vld [vmem:[#allocation6 + $0x7] ss:$8 sm:$0x3] }
  0xe5   : > { %662 = vrot.lane.b32.xlu0 %v551_v32, %s4158_s29  ;;  %s2814_s29 = sld [smem:[#allocation9 + $0x10]] }
  0xe7   : > { %684 = vrot.lane.b32.xlu1 %v510_v36, %s4156_s17 }
  0xe9   : > { %682 = vrot.lane.b32.xlu0 %v506_v35, %s4156_s17 }
  0xeb   : > { %716 = vrot.lane.b32.xlu1 %v555_v34, %s4156_s17  ;;  %v735_v53 = vstv %s2814_s29  ;;  %s2896_s29 = sld [smem:[#allocation9 + $0x17]] }
  0xec   : > { %v2889_v6 = vmul.f32 %v735_v53, %v2758_v33 }
  0xed   : > { %714 = vrot.lane.b32.xlu0 %v551_v32, %s4156_s17  ;;  %s2812_s17 = sld [smem:[#allocation9 + $0x5]] }
  0xef   : > { %800 = vrot.lane.b32.xlu1 %v510_v36, %s4154_s9 }
  0xf1   : > { %798 = vrot.lane.b32.xlu0 %v506_v35, %s4154_s9 }
  0xf3   : > { %832 = vrot.lane.b32.xlu1 %v555_v34, %s4154_s9  ;;  %v605_v56 = vstv %s2812_s17  ;;  %s3066_s17 = sld [smem:[#allocation9 + $0x21]] }
  0xf5   : > { %830 = vrot.lane.b32.xlu0 %v551_v32, %s4154_s9  ;;  %s2810_s9 = sld [smem:[#allocation9 + $0x4]] }
  0xf7   : > { %852 = vrot.lane.b32.xlu1 %v510_v36, %s4150_s10 }
  0xf9   : > { %850 = vrot.lane.b32.xlu0 %v506_v35, %s4150_s10 }
  0xfb   : > { %884 = vrot.lane.b32.xlu1 %v555_v34, %s4150_s10  ;;  %v599_v55 = vstv %s2810_s9  ;;  %s3068_s9 = sld [smem:[#allocation8 + $0x81]] }
  0xfd   : > { %882 = vrot.lane.b32.xlu0 %v551_v32, %s4150_s10  ;;  %s2806_s10 = sld [smem:[#allocation11]] }
  0xff   : > { %904 = vrot.lane.b32.xlu1 %v510_v36, %s4152_s18 }
 0x101   : > { %902 = vrot.lane.b32.xlu0 %v506_v35, %s4152_s18 }
 0x103   : > { %936 = vrot.lane.b32.xlu1 %v555_v34, %s4152_s18  ;;  %v499_v45 = vstv %s2806_s10  ;;  %s3378_s10 = sld [smem:[#allocation12 + $0x20]] }
 0x105   : > { %934 = vrot.lane.b32.xlu0 %v551_v32, %s4152_s18  ;;  %s2808_s18 = sld [smem:[#allocation11 + $0x1]] }
 0x107   : > { %956 = vrot.lane.b32.xlu1 %v510_v36, %s4161_s21 }
 0x109   : > { %954 = vrot.lane.b32.xlu0 %v506_v35, %s4161_s21 }
 0x10b   : > { %988 = vrot.lane.b32.xlu1 %v555_v34, %s4161_s21  ;;  %v501_v46 = vstv %s2808_s18  ;;  %s3380_s18 = sld [smem:[#allocation12 + $0x21]] }
 0x10d   : > { %986 = vrot.lane.b32.xlu0 %v551_v32, %s4161_s21  ;;  %s2818_s21 = sld [smem:[#allocation9 + $0x12]] }
 0x113   : > { %v767_v58 = vstv %s2818_s21  ;;  %s2914_s21 = sld [smem:[#allocation9 + $0x18]] }
 0x114   : > { %v2901_v11 = vmul.f32 %v767_v58, %v2751_v29 }
 0x141   : > { %v559_v50 = vpop.permute.xlu1 %558 }
 0x143   : > { %v514_v3 = vpop.permute.xlu0 %513 }
 0x145   : > { %v561_v8 = vpop.permute.xlu1 %560 }
 0x146   : > { %v562_v37 = vsel %vm519_vm0, %v559_v50, %v561_v8  ;;  %v563_v40 = vsel %vm519_vm0, %v561_v8, %v559_v50  ;;  %v2966_v8 = vrot.slane %v385_v28, %v2749_v26 }
 0x147   : > { %v516_v22 = vpop.permute.xlu0 %515 }
 0x148   : > { %v520_v49 = vsel %vm519_vm0, %v514_v3, %v516_v22  ;;  %v521_v53 = vsel %vm519_vm0, %v516_v22, %v514_v3  ;;  %v2969_v3 = vrot.slane %v385_v28, %v2826_v39  ;;  %v564_v22 = vmul.f32 %v563_v40, %v2846_v41 }
 0x149   : > { %v581_v31 = vpop.permute.xlu1 %580  ;;  %v533_v54 = vmul.f32 %v2846_v41, %v521_v53  ;;  %v534_v57 = vmul.f32 %v2849_v42, %v520_v49  ;;  %v565_v49 = vmul.f32 %v562_v37, %v2849_v42 }
 0x14a   : > { %v574_v32 = vmul.f32 %v573_v44, %v564_v22 }
 0x14b   : > { %v579_v2 = vpop.permute.xlu0 %578  ;;  %v537_v53 = vmul.f32 %v536_v47, %v533_v54  ;;  %v538_v1 = vmul.f32 %v536_v47, %v534_v57  ;;  %v543_v58 = vmul.f32 %v542_v48, %v533_v54  ;;  %v544_v36 = vmul.f32 %v542_v48, %v534_v57 }
 0x14c   : > { %v583_v28 = vsel %vm582_vm1, %v579_v2, %v581_v31  ;;  %v584_v40 = vsel %vm582_vm1, %v581_v31, %v579_v2  ;;  %v3004_v54 = vrot.slane %v387_v59, %v2749_v26  ;;  %v575_v27 = vmul.f32 %v573_v44, %v565_v49 }
 0x14d   : > { %v613_v50 = vpop.permute.xlu1 %612  ;;  %v539_v48 = vadd.f32 %v537_v53, %v499_v45  ;;  %v540_v57 = vadd.f32 %v538_v1, %v499_v45  ;;  %v596_v31 = vmul.f32 %v2862_v51, %v584_v40  ;;  %v597_v2 = vmul.f32 %v2865_v52, %v583_v28 }
 0x14e   : > { %v3007_v53 = vrot.slane %v387_v59, %v2826_v39  ;;  %v568_v40 = vmul.f32 %v567_v43, %v564_v22  ;;  %v569_v28 = vmul.f32 %v567_v43, %v565_v49  ;;  %v545_v35 = vadd.f32 %v543_v58, %v501_v46 }
 0x14f   : > { %v611_v34 = vpop.permute.xlu0 %610  ;;  %v546_v37 = vadd.f32 %v544_v36, %v501_v46  ;;  %v600_v46 = vmul.f32 %v599_v55, %v596_v31  ;;  %v601_v36 = vmul.f32 %v599_v55, %v597_v2  ;;  %v943_v55 = vstv %s2985_s30  ;;  %s4355_s30 = smov 112  }
 0x150   : > { %v614_v59 = vsel %vm582_vm1, %v611_v34, %v613_v50  ;;  %v615_v45 = vsel %vm582_vm1, %v613_v50, %v611_v34  ;;  %v570_v43 = vadd.f32 %v568_v40, %v539_v48  ;;  %v571_v58 = vadd.f32 %v569_v28, %v540_v57  ;;  %v389_v48 = vld [vmem:[#allocation6 + $0x10] ss:$8 sm:$0x3] }
 0x151   : > { %v633_v47 = vpop.permute.xlu1 %632  ;;  %v616_v22 = vmul.f32 %v615_v45, %v2862_v51  ;;  %v617_v44 = vmul.f32 %v614_v59, %v2865_v52  ;;  %v576_v57 = vadd.f32 %v574_v32, %v545_v35  ;;  %v577_v40 = vadd.f32 %v575_v27, %v546_v37 }
 0x152   : > { %v949_v28 = vstv %s2987_s8  ;;  %v606_v45 = vmul.f32 %v605_v56, %v596_v31  ;;  %v607_v59 = vmul.f32 %v605_v56, %v597_v2  ;;  %v3050_v32 = vrot.slane %v389_v48, %v2826_v39  ;;  %s4352_s8 = smov 1  }
 0x153   : > { %v631_v1 = vpop.permute.xlu0 %630  ;;  %v975_v27 = vstv %s2999_s15  ;;  %v394_v35 = vstv %s3001_s19  ;;  %v602_v37 = vadd.f32 %v600_v46, %v570_v43  ;;  %v603_v31 = vadd.f32 %v601_v36, %v571_v58  ;;  %s3394_s15 = sld [smem:[#allocation12]]  ;;  %s3396_s19 = sld [smem:[#allocation12 + $0x1]] }
 0x154   : > { %v635_v49 = vsel %vm634_vm2, %v631_v1, %v633_v47  ;;  %v636_v34 = vsel %vm634_vm2, %v633_v47, %v631_v1  ;;  %v3047_v47 = vrot.slane %v389_v48, %v2749_v26  ;;  %v620_v56 = vmul.f32 %v619_v60, %v616_v22 }
 0x155   : > { %v665_v50 = vpop.permute.xlu1 %664  ;;  %v648_v25 = vmul.f32 %v2879_v62, %v636_v34  ;;  %v649_v24 = vmul.f32 %v2882_v63, %v635_v49  ;;  %v621_v2 = vmul.f32 %v619_v60, %v617_v44  ;;  %v626_v49 = vmul.f32 %v625_v61, %v616_v22 }
 0x156   : > { %v627_v34 = vmul.f32 %v625_v61, %v617_v44  ;;  %v608_v43 = vadd.f32 %v606_v45, %v576_v57  ;;  %v609_v58 = vadd.f32 %v607_v59, %v577_v40 }
 0x157   : > { %v663_v23 = vpop.permute.xlu0 %662  ;;  %v652_v60 = vmul.f32 %v651_v4, %v648_v25  ;;  %v653_v46 = vmul.f32 %v651_v4, %v649_v24  ;;  %v658_v61 = vmul.f32 %v657_v5, %v648_v25  ;;  %v659_v36 = vmul.f32 %v657_v5, %v649_v24 }
 0x158   : > { %v666_v39 = vsel %vm634_vm2, %v663_v23, %v665_v50  ;;  %v667_v48 = vsel %vm634_vm2, %v665_v50, %v663_v23  ;;  %v622_v50 = vadd.f32 %v620_v56, %v602_v37  ;;  %v623_v57 = vadd.f32 %v621_v2, %v603_v31 }
 0x159   : > { %v685_v1 = vpop.permute.xlu1 %684  ;;  %v668_v23 = vmul.f32 %v667_v48, %v2879_v62  ;;  %v669_v22 = vmul.f32 %v666_v39, %v2882_v63  ;;  %v628_v45 = vadd.f32 %v626_v49, %v608_v43  ;;  %v629_v5 = vadd.f32 %v627_v34, %v609_v58  ;;  %4357 = sst [smem:[#allocation37_spill]] %s3394_s15 }
 0x15a   : > { %v655_v49 = vadd.f32 %v653_v46, %v623_v57  ;;  %4358 = sst [smem:[#allocation38_spill]] %s3396_s19 }
 0x15b   : > { %v683_v44 = vpop.permute.xlu0 %682  ;;  %v672_v24 = vmul.f32 %v671_v9, %v668_v23  ;;  %v673_v59 = vmul.f32 %v671_v9, %v669_v22  ;;  %v678_v37 = vmul.f32 %v677_v10, %v668_v23  ;;  %v679_v31 = vmul.f32 %v677_v10, %v669_v22 }
 0x15c   : > { %v687_v40 = vsel %vm686_vm3, %v683_v44, %v685_v1  ;;  %v688_v4 = vsel %vm686_vm3, %v685_v1, %v683_v44  ;;  %v654_v1 = vadd.f32 %v652_v60, %v622_v50  ;;  %v660_v9 = vadd.f32 %v658_v61, %v628_v45 }
 0x15d   : > { %v717_v25 = vpop.permute.xlu1 %716  ;;  %v700_v56 = vmul.f32 %v2907_v14, %v688_v4  ;;  %v701_v2 = vmul.f32 %v2910_v15, %v687_v40  ;;  %v661_v34 = vadd.f32 %v659_v36, %v629_v5  ;;  %v421_v61 = vstv %s3068_s9  ;;  %s3400_s9 = sld [smem:[#allocation12 + $0x3]] }
 0x15e   : > { %v674_v36 = vadd.f32 %v672_v24, %v654_v1  ;;  %v680_v22 = vadd.f32 %v678_v37, %v660_v9  ;;  %v391_v4 = vstv %s3080_s0  ;;  %v418_v9 = vstv %s3099_s2  ;;  %s3402_s0 = sld [smem:[#allocation14]]  ;;  %s3406_s2 = sld [smem:[#allocation14 + $0x2]] }
 0x15f   : > { %v715_v39 = vpop.permute.xlu0 %714  ;;  %v704_v48 = vmul.f32 %v703_v16, %v700_v56  ;;  %v705_v43 = vmul.f32 %v703_v16, %v701_v2  ;;  %v710_v10 = vmul.f32 %v709_v17, %v700_v56  ;;  %v711_v58 = vmul.f32 %v709_v17, %v701_v2 }
 0x160   : > { %v718_v60 = vsel %vm686_vm3, %v715_v39, %v717_v25  ;;  %v719_v46 = vsel %vm686_vm3, %v717_v25, %v715_v39  ;;  %v981_v16 = vstv %s3066_s17  ;;  %v675_v17 = vadd.f32 %v673_v59, %v655_v49  ;;  %s3398_s17 = sld [smem:[#allocation12 + $0x2]] }
 0x161   : > { %v801_v23 = vpop.permute.xlu1 %800  ;;  %v681_v44 = vadd.f32 %v679_v31, %v661_v34  ;;  %v720_v50 = vmul.f32 %v719_v46, %v2907_v14  ;;  %v721_v57 = vmul.f32 %v718_v60, %v2910_v15  ;;  %v395_v25 = vmul.f32 %v394_v35, %v2735_v0 }
 0x162   : > { %v706_v45 = vadd.f32 %v704_v48, %v674_v36  ;;  %v707_v5 = vadd.f32 %v705_v43, %v675_v17  ;;  %v712_v24 = vadd.f32 %v710_v10, %v680_v22  ;;  %v402_v49 = vstv %s3097_s1  ;;  %s3404_s1 = sld [smem:[#allocation14 + $0x1]] }
 0x163   : > { %v799_v40 = vpop.permute.xlu0 %798  ;;  %v713_v59 = vadd.f32 %v711_v58, %v681_v44  ;;  %v724_v31 = vmul.f32 %v723_v18, %v720_v50  ;;  %v725_v56 = vmul.f32 %v723_v18, %v721_v57  ;;  %v730_v2 = vmul.f32 %v729_v19, %v720_v50  ;;  %4360 = sst [smem:[#allocation40_spill]] %s3400_s9 }
 0x164   : > { %v731_v1 = vmul.f32 %v729_v19, %v721_v57  ;;  %v392_v35 = vmul.f32 %v391_v4, %v2735_v0  ;;  %v3144_v34 = vmul.f32 %v421_v61, %v2735_v0  ;;  %v803_v58 = vsel %vm802_vm4, %v799_v40, %v801_v23  ;;  %4361 = sst [smem:[#allocation41_spill]] %s3402_s0 }
 0x165   : > { %v833_v37 = vpop.permute.xlu1 %832  ;;  %v726_v39 = vadd.f32 %v724_v31, %v706_v45  ;;  %v727_v48 = vadd.f32 %v725_v56, %v707_v5  ;;  %v732_v43 = vadd.f32 %v730_v2, %v712_v24  ;;  %v804_v19 = vsel %vm802_vm4, %v801_v23, %v799_v40  ;;  %4363 = sst [smem:[#allocation43_spill]] %s3406_s2 }
 0x166   : > { %v733_v10 = vadd.f32 %v731_v1, %v713_v59  ;;  %v410_v46 = vstv %s3109_s3  ;;  %v429_v36 = vstv %s3111_s4  ;;  %v4312_v61 = vrot.slane %v2889_v6, %v2749_v26  ;;  %4359 = sst [smem:[#allocation39_spill]] %s3398_s17  ;;  %s3408_s3 = sld [smem:[#allocation14 + $0x3]] }
 0x167   : > { %v831_v18 = vpop.permute.xlu0 %830  ;;  %v4313_v22 = vrot.slane %v2889_v6, %v2754_v30  ;;  %v1966_v50 = vrot.slane %v395_v25, 9  ;;  %v3160_v57 = vmul.f32 %v402_v49, %v2735_v0  ;;  %v4314_v23 = vrot.slane %v2892_v7, %v2749_v26  ;;  %s3410_s4 = sld [smem:[#allocation12 + $0x4]] }
 0x168   : > { %v748_v17 = vadd.f32 %v4312_v61, %v726_v39  ;;  %v4315_v4 = vrot.slane %v2892_v7, %v2754_v30  ;;  %v834_v5 = vsel %vm802_vm4, %v831_v18, %v833_v37  ;;  %v835_v6 = vsel %vm802_vm4, %v833_v37, %v831_v18  ;;  %4362 = sst [smem:[#allocation42_spill]] %s3404_s1 }
 0x169   : > { %v853_v60 = vpop.permute.xlu1 %852  ;;  %v749_v44 = vadd.f32 %v4313_v22, %v727_v48  ;;  %v764_v40 = vadd.f32 %v4314_v23, %v732_v43  ;;  %v816_v24 = vmul.f32 %v2921_v20, %v803_v58  ;;  %v817_v25 = vmul.f32 %v2924_v21, %v804_v19 }
 0x16a   : > { %v765_v45 = vadd.f32 %v4315_v4, %v733_v10  ;;  %v437_v31 = vstv %s3123_s5  ;;  %v995_v56 = vstv %s3125_s6  ;;  %v3181_v37 = vmul.f32 %v410_v46, %v2735_v0  ;;  %s3412_s5 = sld [smem:[#allocation12 + $0x5]]  ;;  %s3414_s6 = sld [smem:[#allocation12 + $0x6]] }
 0x16b   : > { %v851_v59 = vpop.permute.xlu0 %850  ;;  %v419_v49 = vmul.f32 %v418_v9, %v2735_v0  ;;  %v4316_v39 = vrot.slane %v2901_v11, %v2749_v26  ;;  %v4317_v43 = vrot.slane %v2901_v11, %v2754_v30  ;;  %v836_v18 = vmul.f32 %v834_v5, %v2921_v20 }
 0x16c   : > { %v855_v7 = vsel %vm854_vm5, %v851_v59, %v853_v60  ;;  %v856_v2 = vsel %vm854_vm5, %v853_v60, %v851_v59  ;;  %v837_v58 = vmul.f32 %v835_v6, %v2924_v21  ;;  %v4318_v19 = vrot.slane %v2904_v13, %v2749_v26  ;;  %4364 = sst [smem:[#allocation44_spill]] %s3408_s3 }
 0x16d   : > { %v885_v1 = vpop.permute.xlu1 %884  ;;  %v780_v48 = vadd.f32 %v4316_v39, %v748_v17  ;;  %v781_v10 = vadd.f32 %v4317_v43, %v749_v44  ;;  %v4319_v46 = vrot.slane %v2904_v13, %v2754_v30  ;;  %v3199_v17 = vadd.f32 %v1966_v50, %v392_v35  ;;  %4365 = sst [smem:[#allocation45_spill]] %s3410_s4 }
 0x16e   : > { %v796_v60 = vadd.f32 %v4318_v19, %v764_v40  ;;  %v4320_v22 = vstv %s2873_s25  ;;  %v868_v4 = vmul.f32 %v2966_v8, %v855_v7  ;;  %v869_v5 = vmul.f32 %v2969_v3, %v856_v2  ;;  %s4349_s25 = sshll.u32 %s2709_s23, 3  ;;  %s3436_s23 = sld [smem:[#allocation12 + $0x11]] }
 0x16f   : > { %v797_v9 = vadd.f32 %v4319_v46, %v765_v45  ;;  %v820_v11 = vmul.f32 %v4320_v22, %v816_v24  ;;  %v4321_v44 = vmov %v4320_v22  ;;  %v883_v6 = vpop.permute.xlu0 %882  ;;  %v4322_v40 = vstv %s2884_s12  ;;  %s3344_s26 = scalar_lea.vmem [#allocation15], %s4349_s25  ;;  %s3386_s12 = sld [smem:[#allocation12 + $0x24]] }
 0x170   : > { %v821_v23 = vmul.f32 %v4321_v44, %v817_v25  ;;  %v826_v59 = vmul.f32 %v4322_v40, %v816_v24  ;;  %v4323_v13 = vmov %v4322_v40  ;;  %v1973_v35 = vrot.slane %v3144_v34, 9  ;;  %4350 = sst [smem:[#allocation36_spill]] %s3344_s26 }
 0x171   : > { %v827_v45 = vmul.f32 %v4323_v13, %v817_v25  ;;  %v905_v39 = vpop.permute.xlu1 %904  ;;  %v3213_v50 = vmul.f32 %v429_v36, %v2735_v0  ;;  %v822_v43 = vadd.f32 %v820_v11, %v780_v48  ;;  %v4324_v7 = vstv %s2894_s16  ;;  %s3388_s16 = sld [smem:[#allocation12 + $0x25]]  ;;  %4366 = sst [smem:[#allocation46_spill]] %s3412_s5 }
 0x172   : > { %v823_v19 = vadd.f32 %v821_v23, %v781_v10  ;;  %v840_v46 = vmul.f32 %v4324_v7, %v836_v18  ;;  %v4325_v2 = vmov %v4324_v7  ;;  %v828_v44 = vadd.f32 %v826_v59, %v796_v60  ;;  %4367 = sst [smem:[#allocation47_spill]] %s3414_s6  ;;  %s3422_s25 = sld [smem:[#allocation12 + $0xa]] }
 0x173   : > { %v841_v22 = vmul.f32 %v4325_v2, %v837_v58  ;;  %v829_v24 = vadd.f32 %v827_v45, %v797_v9  ;;  %v886_v25 = vsel %vm854_vm5, %v883_v6, %v885_v1  ;;  %v887_v34 = vsel %vm854_vm5, %v885_v1, %v883_v6  ;;  %v903_v2 = vpop.permute.xlu0 %902 }
 0x174   : > { %v4326_v40 = vstv %s2896_s29  ;;  %v4328_v11 = vstv %s2914_s21  ;;  %v888_v60 = vmul.f32 %v886_v25, %v2966_v8  ;;  %v889_v9 = vmul.f32 %v887_v34, %v2969_v3  ;;  %s3390_s29 = sld [smem:[#allocation12 + $0x26]]  ;;  %s3392_s21 = sld [smem:[#allocation12 + $0x27]] }
 0x175   : > { %v846_v36 = vmul.f32 %v4326_v40, %v836_v18  ;;  %v4327_v48 = vmov %v4326_v40  ;;  %v872_v23 = vmul.f32 %v4328_v11, %v868_v4  ;;  %v4329_v13 = vmov %v4328_v11  ;;  %v937_v6 = vpop.permute.xlu1 %936  ;;  %4378 = sst [smem:[#allocation58_spill]] %s3436_s23 }
 0x176   : > { %v847_v10 = vmul.f32 %v4327_v48, %v837_v58  ;;  %v873_v7 = vmul.f32 %v4329_v13, %v869_v5  ;;  %v907_v59 = vsel %vm906_vm6, %v903_v2, %v905_v39  ;;  %v908_v1 = vsel %vm906_vm6, %v905_v39, %v903_v2  ;;  %s3450_s23 = sld [smem:[#allocation12 + $0x18]] }
 0x177   : > { %v842_v18 = vadd.f32 %v840_v46, %v822_v43  ;;  %v843_v58 = vadd.f32 %v841_v22, %v823_v19  ;;  %v1968_v45 = vrot.slane %v3160_v57, 10  ;;  %v3240_v40 = vmul.f32 %v437_v31, %v2735_v0  ;;  %v935_v19 = vpop.permute.xlu0 %934 }
 0x178   : > { %v4330_v25 = vstv %s2916_s22  ;;  %v920_v13 = vmul.f32 %v3004_v54, %v907_v59  ;;  %v921_v39 = vmul.f32 %v3007_v53, %v908_v1  ;;  %v848_v2 = vadd.f32 %v846_v36, %v828_v44  ;;  %s4353_s22 = smov 127   ;;  %4371 = sst [smem:[#allocation51_spill]] %s3422_s25 }
 0x179   : > { %v878_v34 = vmul.f32 %v4330_v25, %v868_v4  ;;  %v4331_v48 = vmov %v4330_v25  ;;  %v849_v43 = vadd.f32 %v847_v10, %v829_v24  ;;  %v427_v57 = vadd.f32 %v1973_v35, %v419_v49  ;;  %s3584_s25 = sld [smem:[#allocation12 + $0x39]] }
 0x17a   : > { %v879_v11 = vmul.f32 %v4331_v48, %v869_v5  ;;  %v1975_v0 = vrot.slane %v3213_v50, 10  ;;  %v874_v31 = vadd.f32 %v872_v23, %v842_v18  ;;  %v875_v46 = vadd.f32 %v873_v7, %v843_v58  ;;  %v957_v48 = vpop.permute.xlu1 %956 }
 0x17b   : > { %v4332_v22 = vstv %s2926_s27  ;;  %v4334_v59 = vstv %s2928_s11  ;;  %v938_v24 = vsel %vm906_vm6, %v935_v19, %v937_v6  ;;  %v939_v49 = vsel %vm906_vm6, %v937_v6, %v935_v19  ;;  %s4351_s27 = smov 15   ;;  %s4356_s11 = smov 111  }
 0x17c   : > { %v892_v4 = vmul.f32 %v4332_v22, %v888_v60  ;;  %v4333_v25 = vmov %v4332_v22  ;;  %v898_v61 = vmul.f32 %v4334_v59, %v888_v60  ;;  %v4335_v1 = vmov %v4334_v59  ;;  %v955_v59 = vpop.permute.xlu0 %954  ;;  %4384 = sst [smem:[#allocation64_spill]] %s3450_s23  ;;  %s4449_s23 = sld [smem:[#allocation58_spill]] }
 0x17d   : > { %v893_v5 = vmul.f32 %v4333_v25, %v889_v9  ;;  %v899_v44 = vmul.f32 %v4335_v1, %v889_v9  ;;  %v880_v35 = vadd.f32 %v878_v34, %v848_v2  ;;  %v881_v50 = vadd.f32 %v879_v11, %v849_v43 }
 0x17e   : > { %v4336_v36 = vstv %s2946_s24  ;;  %v4338_v18 = vstv %s2948_s7  ;;  %v940_v22 = vmul.f32 %v938_v24, %v3004_v54  ;;  %v941_v25 = vmul.f32 %v939_v49, %v3007_v53  ;;  %s4342_s7 = smov 17   ;;  %s4344_s24 = smov 16  }
 0x17f   : > { %v924_v10 = vmul.f32 %v4336_v36, %v920_v13  ;;  %v4337_v23 = vmov %v4336_v36  ;;  %v930_v60 = vmul.f32 %v4338_v18, %v920_v13  ;;  %v4339_v58 = vmov %v4338_v18  ;;  %4408 = sst [smem:[#allocation78_spill]] %s3584_s25 }
 0x180   : > { %v925_v7 = vmul.f32 %v4337_v23, %v921_v39  ;;  %v931_v9 = vmul.f32 %v4339_v58, %v921_v39  ;;  %v894_v6 = vadd.f32 %v892_v4, %v874_v31  ;;  %v895_v19 = vadd.f32 %v893_v5, %v875_v46  ;;  %v989_v5 = vpop.permute.xlu1 %988  ;;  %s3598_s25 = sld [smem:[#allocation12 + $0x3c]] }
 0x181   : > { %v959_v34 = vsel %vm958_vm7, %v955_v59, %v957_v48  ;;  %v960_v11 = vsel %vm958_vm7, %v957_v48, %v955_v59  ;;  %v900_v2 = vadd.f32 %v898_v61, %v880_v35  ;;  %v901_v13 = vadd.f32 %v899_v44, %v881_v50  ;;  %v987_v35 = vpop.permute.xlu0 %986 }
 0x182   : > { %v944_v39 = vmul.f32 %v943_v55, %v940_v22  ;;  %v945_v43 = vmul.f32 %v943_v55, %v941_v25  ;;  %v950_v1 = vmul.f32 %v949_v28, %v940_v22  ;;  %v951_v31 = vmul.f32 %v949_v28, %v941_v25 }
 0x183   : > { %v972_v46 = vmul.f32 %v3047_v47, %v959_v34  ;;  %v973_v4 = vmul.f32 %v3050_v32, %v960_v11  ;;  %v926_v24 = vadd.f32 %v924_v10, %v894_v6  ;;  %v927_v48 = vadd.f32 %v925_v7, %v895_v19 }
 0x184   : > { %v932_v49 = vadd.f32 %v930_v60, %v900_v2  ;;  %v933_v61 = vadd.f32 %v931_v9, %v901_v13  ;;  %v408_v28 = vadd.f32 %v1968_v45, %v3199_v17  ;;  %v1970_v23 = vrot.slane %v3181_v37, 11 }
 0x185   : > { %v976_v44 = vmul.f32 %v975_v27, %v972_v46  ;;  %v977_v50 = vmul.f32 %v975_v27, %v973_v4  ;;  %v982_v55 = vmul.f32 %v981_v16, %v972_v46  ;;  %v983_v36 = vmul.f32 %v981_v16, %v973_v4 }
 0x186   : > { %v990_v10 = vsel %vm958_vm7, %v987_v35, %v989_v5  ;;  %v991_v7 = vsel %vm958_vm7, %v989_v5, %v987_v35  ;;  %v946_v18 = vadd.f32 %v944_v39, %v926_v24  ;;  %v947_v27 = vadd.f32 %v945_v43, %v927_v48 }
 0x187   : > { %v952_v60 = vadd.f32 %v950_v1, %v932_v49  ;;  %v953_v58 = vadd.f32 %v951_v31, %v933_v61  ;;  %v435_v9 = vadd.f32 %v1975_v0, %v427_v57  ;;  %v1977_v16 = vrot.slane %v3240_v40, 11 }
 0x188   : > { %v992_v17 = vmul.f32 %v990_v10, %v3047_v47  ;;  %v993_v37 = vmul.f32 %v991_v7, %v3050_v32  ;;  %v978_v45 = vadd.f32 %v976_v44, %v946_v18  ;;  %v979_v22 = vadd.f32 %v977_v50, %v947_v27 }
 0x189   : > { %v984_v25 = vadd.f32 %v982_v55, %v952_v60  ;;  %v985_v59 = vadd.f32 %v983_v36, %v953_v58  ;;  %v4340_v34 = vstv %s3140_s14  ;;  %v416_v39 = vadd.f32 %v1970_v23, %v408_v28  ;;  %s3416_s14 = sld [smem:[#allocation12 + $0x7]] }
 0x18a   : > { %v996_v6 = vmul.f32 %v995_v56, %v992_v17  ;;  %v997_v19 = vmul.f32 %v995_v56, %v993_v37  ;;  %v1002_v11 = vmul.f32 %v4340_v34, %v992_v17  ;;  %v4341_v2 = vmov %v4340_v34 }
 0x18b   : > { %v1003_v13 = vmul.f32 %v4341_v2, %v993_v37  ;;  %v443_v1 = vadd.f32 %v1977_v16, %v435_v9  ;;  %v2480_v4 = vmov 1966171168   ;;  %v4345_v28 = vlaneseq }
 0x18c   : > { %v998_v57 = vadd.f32 %v996_v6, %v978_v45  ;;  %v999_v0 = vadd.f32 %v997_v19, %v979_v22  ;;  %v1004_v40 = vadd.f32 %v1002_v11, %v984_v25  ;;  %v1687_v5 = vunpack.c.l.s4 %v2480_v4 }
 0x18d   : > { %v1005_v43 = vadd.f32 %v1003_v13, %v985_v59  ;;  %vm3336_vm8 = vcmp.lt.s32.totalorder %v4345_v28, 256  ;;  %v4346_v23 = vmov 0  ;;  %v1303_v7 = vstv %s3378_s10  ;;  %s3470_s10 = sld [smem:[#allocation12 + $0x1c]] }
 0x18e   : > { %v1008_v31 = vcombine.low %v998_v57, %v999_v0  ;;  %v1688_v61 = vunpack.c.0.s8 %v1687_v5  ;;  %v4347_v23 = vsel %vm3336_vm8, 4294967295, %v4346_v23  ;;  %v1319_v18 = vstv %s3380_s18  ;;  %s3472_s18 = sld [smem:[#allocation12 + $0x1d]] }
 0x18f   : > { %v1013_v46 = vcombine.low %v1004_v40, %v1005_v43  ;;  %4348 = vst [vmem:[#allocation35_spill] sm:$0xff] %v4347_v23  ;;  %4368 = sst [smem:[#allocation48_spill]] %s3416_s14  ;;  %v1335_v27 = vstv %s3382_s20  ;;  %v1351_v60 = vstv %s3384_s13  ;;  %v1367_v58 = vstv %s3386_s12  ;;  %s3479_s13 = sld [smem:[#allocation12 + $0x1f]] }
 0x190   : > { %v3310_v24 = vadd.f32 %v1008_v31, %v416_v39  ;;  %v3325_v50 = vsub.s32 %v1688_v61, %v2742_v12  ;;  %v1383_v9 = vstv %s3388_s16  ;;  %v1399_v16 = vstv %s3390_s29  ;;  %s3477_s20 = sld [smem:[#allocation12 + $0x1e]]  ;;  %s3490_s12 = sld [smem:[#allocation12 + $0x28]] }
 0x191   : > { %v3312_v48 = vadd.f32 %v1013_v46, %v443_v1  ;;  %v1415_v17 = vstv %s3392_s21  ;;  %v1044_v37 = vstv %s3394_s15  ;;  %v1050_v45 = vstv %s3396_s19  ;;  %s3492_s16 = sld [smem:[#allocation12 + $0x29]]  ;;  %s3502_s21 = sld [smem:[#allocation12 + $0x2a]] }
 0x192   : > { %v1032_v56 = vrot.slane %v3310_v24, %v2754_v30  ;;  %v1028_v49 = vrot.slane %v3310_v24, %v2749_v26  ;;  %4343 = vst [vmem:[#allocation34_spill] sm:$0xff] %v3325_v50  ;;  %v1692_v55 = vrot.slane %v3310_v24, %v3325_v50  ;;  %v1056_v22 = vstv %s3398_s17  ;;  %s3561_s15 = sld [smem:[#allocation12 + $0x34]]  ;;  %s3590_s29 = sld [smem:[#allocation12 + $0x3a]] }
 0x193   : > { %v1075_v35 = vrot.slane %v3312_v48, %v2754_v30  ;;  %v1071_v44 = vrot.slane %v3312_v48, %v2749_v26  ;;  %v1712_v36 = vrot.slane %v3312_v48, %v3325_v50  ;;  %v1062_v25 = vstv %s3400_s9  ;;  %4388 = sst [smem:[#allocation68_spill]] %s3470_s10  ;;  %s3552_s9 = sld [smem:[#allocation12 + $0x33]] }
 0x194   : > { %1037 = vrot.lane.b32.xlu1 %v1032_v56, %s4342_s7  ;;  %1035 = vrot.lane.b32.xlu0 %v1028_v49, %s4342_s7  ;;  %v1699_v12 = vrot.slane %v1692_v55, %v3325_v50  ;;  %v1017_v59 = vstv %s3402_s0  ;;  %v1019_v6 = vstv %s3404_s1  ;;  %v3482_v34 = vmul.f32 %v1303_v7, %v3310_v24  ;;  %s3540_s1 = sld [smem:[#allocation12 + $0x31]]  ;;  %s3550_s0 = sld [smem:[#allocation12 + $0x32]] }
 0x195   : > { %v1719_v10 = vrot.slane %v1712_v36, %v3325_v50  ;;  %v1021_v19 = vstv %s3406_s2  ;;  %4390 = sst [smem:[#allocation70_spill]] %s3479_s13  ;;  %v1023_v11 = vstv %s3408_s3  ;;  %v1087_v2 = vstv %s3410_s4  ;;  %s3504_s3 = sld [smem:[#allocation12 + $0x2b]] }
 0x196   : > { %1705 = vst.msk [vmem:[%s3344_s26] ss:$4 sm:$0x3] %vm3336_vm8, %v1699_v12  ;;  %4389 = sst [smem:[#allocation69_spill]] %s3477_s20  ;;  %v1093_v13 = vstv %s3412_s5  ;;  %v3488_v39 = vmul.f32 %v1319_v18, %v3310_v24  ;;  %v1099_v57 = vstv %s3414_s6  ;;  %v1105_v0 = vstv %s3416_s14  ;;  %s3516_s14 = sld [smem:[#allocation12 + $0x2c]] }
 0x197   : > { %2102 = vst.msk [vmem:[%s3344_s26 + $0x1] ss:$4 sm:$0x3] %vm3336_vm8, %v1719_v10  ;;  %s3438_s26 = sld [smem:[#allocation12 + $0x12]]  ;;  %v3497_v40 = vmul.f32 %v1335_v27, %v3310_v24  ;;  %v3500_v43 = vmul.f32 %v1351_v60, %v3310_v24  ;;  %4392 = sst [smem:[#allocation71_spill]] %s3502_s21  ;;  %v3508_v31 = vmul.f32 %v1367_v58, %v3312_v48  ;;  %v3511_v46 = vmul.f32 %v1383_v9, %v3312_v48 }
 0x198   : > { %1080 = vrot.lane.b32.xlu1 %v1075_v35, %s4342_s7  ;;  %1078 = vrot.lane.b32.xlu0 %v1071_v44, %s4342_s7  ;;  %s3418_s7 = sld [smem:[#allocation12 + $0x8]]  ;;  %v3514_v4 = vmul.f32 %v1399_v16, %v3312_v48  ;;  %s3518_s6 = sld [smem:[#allocation12 + $0x2d]]  ;;  %v3536_v55 = vmul.f32 %v1415_v17, %v3312_v48 }
 0x199   : > { %s3526_s2 = sld [smem:[#allocation12 + $0x2e]]  ;;  %s3528_s5 = sld [smem:[#allocation12 + $0x2f]] }
 0x19a   : > { %s3538_s4 = sld [smem:[#allocation12 + $0x30]]  ;;  %4397 = sst [smem:[#allocation73_spill]] %s3540_s1 }
 0x19b   : > { %4399 = sst [smem:[#allocation74_spill]] %s3550_s0  ;;  %s3563_s1 = sld [smem:[#allocation12 + $0x35]] }
 0x19c   : > { %1112 = vrot.lane.b32.xlu1 %v1032_v56, %s4344_s24  ;;  %1110 = vrot.lane.b32.xlu0 %v1028_v49, %s4344_s24  ;;  %4400 = sst [smem:[#allocation75_spill]] %s3552_s9  ;;  %s3571_s0 = sld [smem:[#allocation12 + $0x36]] }
 0x19d   : > { %s3600_s19 = sld [smem:[#allocation12 + $0x3d]]  ;;  %s3608_s9 = sld [smem:[#allocation12 + $0x3f]] }
 0x19e   : > { %4369 = sst [smem:[#allocation49_spill]] %s3418_s7  ;;  %v1119_v1 = vstv %s3418_s7  ;;  %s3614_s7 = sld [smem:[#allocation12 + $0x40]] }
 0x19f   : > { %s3624_s10 = sld [smem:[#allocation12 + $0x43]]  ;;  %s4418_s20 = sld [smem:[#allocation78_spill]] }
 0x1a0   : > { %1144 = vrot.lane.b32.xlu1 %v1075_v35, %s4344_s24  ;;  %1142 = vrot.lane.b32.xlu0 %v1071_v44, %s4344_s24  ;;  %s3420_s24 = sld [smem:[#allocation12 + $0x9]]  ;;  %4396 = sst [smem:[#allocation72_spill]] %s3538_s4 }
 0x1a1   : > { %4404 = sst [smem:[#allocation76_spill]] %s3563_s1  ;;  %s3573_s4 = sld [smem:[#allocation12 + $0x37]] }
 0x1a4   : > { %1176 = vrot.lane.b32.xlu1 %v1032_v56, %s4351_s27  ;;  %1174 = vrot.lane.b32.xlu0 %v1028_v49, %s4351_s27 }
 0x1a5   : > { %4416 = sst [smem:[#allocation80_spill]] %s3624_s10 }
 0x1a6   : > { %4370 = sst [smem:[#allocation50_spill]] %s3420_s24  ;;  %v1125_v5 = vstv %s3420_s24 }
 0x1a7   : > { %4407 = sst [smem:[#allocation77_spill]] %s3573_s4  ;;  %s3582_s24 = sld [smem:[#allocation12 + $0x38]] }
 0x1a8   : > { %1208 = vrot.lane.b32.xlu1 %v1075_v35, %s4351_s27  ;;  %1206 = vrot.lane.b32.xlu0 %v1071_v44, %s4351_s27  ;;  %s3424_s27 = sld [smem:[#allocation12 + $0xb]] }
 0x1a9   : > { %s3592_s4 = sld [smem:[#allocation12 + $0x3b]] }
 0x1aa   : > { %s4417_s13 = sld [smem:[#allocation77_spill]] }
 0x1ac   : > { %1240 = vrot.lane.b32.xlu1 %v1032_v56, %s4352_s8  ;;  %1238 = vrot.lane.b32.xlu0 %v1028_v49, %s4352_s8 }
 0x1ae   : > { %4372 = sst [smem:[#allocation52_spill]] %s3424_s27  ;;  %s3440_s27 = sld [smem:[#allocation12 + $0x13]] }
 0x1af   : > { %4409 = sst [smem:[#allocation79_spill]] %s3592_s4 }
 0x1b0   : > { %1272 = vrot.lane.b32.xlu1 %v1075_v35, %s4352_s8  ;;  %1270 = vrot.lane.b32.xlu0 %v1071_v44, %s4352_s8  ;;  %s3426_s8 = sld [smem:[#allocation12 + $0xc]] }
 0x1b4   : > { %1432 = vrot.lane.b32.xlu1 %v1032_v56, %s4353_s22  ;;  %1430 = vrot.lane.b32.xlu0 %v1028_v49, %s4353_s22  ;;  %4379 = sst [smem:[#allocation59_spill]] %s3440_s27  ;;  %s3606_s27 = sld [smem:[#allocation12 + $0x3e]] }
 0x1b6   : > { %4373 = sst [smem:[#allocation53_spill]] %s3426_s8  ;;  %s3442_s8 = sld [smem:[#allocation12 + $0x14]] }
 0x1b7   : > { %s4439_s10 = sld [smem:[#allocation53_spill]] }
 0x1b8   : > { %1464 = vrot.lane.b32.xlu1 %v1075_v35, %s4353_s22  ;;  %1462 = vrot.lane.b32.xlu0 %v1071_v44, %s4353_s22  ;;  %s3428_s22 = sld [smem:[#allocation12 + $0xd]] }
 0x1bc   : > { %1496 = vrot.lane.b32.xlu1 %v1032_v56, %s4354_s28  ;;  %1494 = vrot.lane.b32.xlu0 %v1028_v49, %s4354_s28  ;;  %4380 = sst [smem:[#allocation60_spill]] %s3442_s8 }
 0x1bd   : > { %s3458_s8 = sld [smem:[#allocation12 + $0x1a]] }
 0x1be   : > { %4374 = sst [smem:[#allocation54_spill]] %s3428_s22  ;;  %s3444_s22 = sld [smem:[#allocation12 + $0x15]] }
 0x1bf   : > { %s4461_s1 = sld [smem:[#allocation60_spill]] }
 0x1c0   : > { %1528 = vrot.lane.b32.xlu1 %v1075_v35, %s4354_s28  ;;  %1526 = vrot.lane.b32.xlu0 %v1071_v44, %s4354_s28  ;;  %s3430_s28 = sld [smem:[#allocation12 + $0xe]] }
 0x1c3   : > { %4386 = sst [smem:[#allocation66_spill]] %s3458_s8 }
 0x1c4   : > { %1560 = vrot.lane.b32.xlu1 %v1032_v56, %s4355_s30  ;;  %1558 = vrot.lane.b32.xlu0 %v1028_v49, %s4355_s30  ;;  %4381 = sst [smem:[#allocation61_spill]] %s3444_s22 }
 0x1c5   : > { %s3460_s22 = sld [smem:[#allocation12 + $0x1b]] }
 0x1c6   : > { %4375 = sst [smem:[#allocation55_spill]] %s3430_s28  ;;  %s3446_s28 = sld [smem:[#allocation12 + $0x16]] }
 0x1c7   : > { %s4441_s21 = sld [smem:[#allocation55_spill]] }
 0x1c8   : > { %1592 = vrot.lane.b32.xlu1 %v1075_v35, %s4355_s30  ;;  %1590 = vrot.lane.b32.xlu0 %v1071_v44, %s4355_s30  ;;  %s3432_s30 = sld [smem:[#allocation12 + $0xf]] }
 0x1cb   : > { %4387 = sst [smem:[#allocation67_spill]] %s3460_s22  ;;  %s3622_s22 = sld [smem:[#allocation12 + $0x42]] }
 0x1cc   : > { %1624 = vrot.lane.b32.xlu1 %v1032_v56, %s4356_s11  ;;  %1622 = vrot.lane.b32.xlu0 %v1028_v49, %s4356_s11  ;;  %4382 = sst [smem:[#allocation62_spill]] %s3446_s28  ;;  %s4411_s28 = sld [smem:[#allocation73_spill]] }
 0x1cd   : > { %s4463_s4 = sld [smem:[#allocation62_spill]] }
 0x1ce   : > { %4376 = sst [smem:[#allocation56_spill]] %s3432_s30  ;;  %s3452_s30 = sld [smem:[#allocation12 + $0x19]] }
 0x1cf   : > { %s4442_s8 = sld [smem:[#allocation56_spill]] }
 0x1d0   : > { %1656 = vrot.lane.b32.xlu1 %v1075_v35, %s4356_s11  ;;  %1654 = vrot.lane.b32.xlu0 %v1071_v44, %s4356_s11  ;;  %s3434_s11 = sld [smem:[#allocation12 + $0x10]] }
 0x1d1   : > { %4415 = sst [smem:[#allocation73_spill]] %s3622_s22  ;;  %s4433_s22 = sld [smem:[#allocation51_spill]] }
 0x1d4   : > { %4385 = sst [smem:[#allocation65_spill]] %s3452_s30  ;;  %s3616_s30 = sld [smem:[#allocation12 + $0x41]] }
 0x1d6   : > { %4377 = sst [smem:[#allocation57_spill]] %s3434_s11 }
 0x1d7   : > { %s3448_s11 = sld [smem:[#allocation12 + $0x17]] }
 0x1d8   : > { %s4401_s17 = sld [smem:[#allocation57_spill]] }
 0x1d9   : > { %4403 = sst [smem:[#allocation57_spill]] %s3561_s15  ;;  %s4450_s15 = sld [smem:[#allocation59_spill]] }
 0x1dd   : > { %4383 = sst [smem:[#allocation63_spill]] %s3448_s11  ;;  %s4410_s11 = sld [smem:[#allocation72_spill]] }
 0x1de   : > { %4413 = sst [smem:[#allocation72_spill]] %s3616_s30  ;;  %s4434_s30 = sld [smem:[#allocation52_spill]] }
 0x206   : > { %v1038_v9 = vpop.permute.xlu1 %1037  ;;  %v1036_v49 = vpop.permute.xlu0 %1035 }
 0x207   : > { %v1039_v27 = vsel %vm519_vm0, %v1036_v49, %v1038_v9  ;;  %v1040_v28 = vsel %vm519_vm0, %v1038_v9, %v1036_v49 }
 0x208   : > { %v1041_v10 = vmul.f32 %v1040_v28, %v2846_v41  ;;  %v1042_v36 = vmul.f32 %v1039_v27, %v2849_v42 }
 0x20a   : > { %v1045_v18 = vmul.f32 %v1044_v37, %v1041_v10  ;;  %v1046_v28 = vmul.f32 %v1044_v37, %v1042_v36  ;;  %v1081_v27 = vpop.permute.xlu1 %1080  ;;  %v1079_v35 = vpop.permute.xlu0 %1078  ;;  %v1051_v49 = vmul.f32 %v1050_v45, %v1041_v10  ;;  %v1052_v9 = vmul.f32 %v1050_v45, %v1042_v36 }
 0x20b   : > { %v1057_v37 = vmul.f32 %v1056_v22, %v1041_v10  ;;  %v1058_v48 = vmul.f32 %v1056_v22, %v1042_v36  ;;  %v1063_v61 = vmul.f32 %v1062_v25, %v1041_v10  ;;  %v1064_v44 = vmul.f32 %v1062_v25, %v1042_v36 }
 0x20c   : > { %v1047_v17 = vadd.f32 %v1045_v18, %v1017_v59  ;;  %v1048_v7 = vadd.f32 %v1046_v28, %v1017_v59  ;;  %v1082_v45 = vsel %vm519_vm0, %v1079_v35, %v1081_v27  ;;  %v1083_v60 = vsel %vm519_vm0, %v1081_v27, %v1079_v35 }
 0x20d   : > { %v1084_v25 = vmul.f32 %v1083_v60, %v2846_v41  ;;  %v1085_v36 = vmul.f32 %v1082_v45, %v2849_v42  ;;  %v1053_v28 = vadd.f32 %v1051_v49, %v1019_v6  ;;  %v1054_v35 = vadd.f32 %v1052_v9, %v1019_v6 }
 0x20e   : > { %v1113_v22 = vpop.permute.xlu1 %1112  ;;  %v1111_v10 = vpop.permute.xlu0 %1110  ;;  %v1059_v49 = vadd.f32 %v1057_v37, %v1021_v19  ;;  %v1060_v6 = vadd.f32 %v1058_v48, %v1021_v19  ;;  %v1066_v58 = vadd.f32 %v1064_v44, %v1023_v11  ;;  %v4435_v44 = vstv %s4433_s22  ;;  %s4440_s22 = sld [smem:[#allocation54_spill]] }
 0x20f   : > { %v1114_v59 = vsel %vm582_vm1, %v1111_v10, %v1113_v22  ;;  %v1115_v18 = vsel %vm582_vm1, %v1113_v22, %v1111_v10  ;;  %v1088_v42 = vmul.f32 %v1087_v2, %v1084_v25  ;;  %v1089_v60 = vmul.f32 %v1087_v2, %v1085_v36 }
 0x210   : > { %v1116_v27 = vmul.f32 %v1115_v18, %v2862_v51  ;;  %v1117_v41 = vmul.f32 %v1114_v59, %v2865_v52  ;;  %v1094_v45 = vmul.f32 %v1093_v13, %v1084_v25  ;;  %v1095_v22 = vmul.f32 %v1093_v13, %v1085_v36 }
 0x211   : > { %v1100_v9 = vmul.f32 %v1099_v57, %v1084_v25  ;;  %v1101_v10 = vmul.f32 %v1099_v57, %v1085_v36  ;;  %v1065_v2 = vadd.f32 %v1063_v61, %v1023_v11  ;;  %v1106_v13 = vmul.f32 %v1105_v0, %v1084_v25 }
 0x212   : > { %v1145_v59 = vpop.permute.xlu1 %1144  ;;  %v1143_v18 = vpop.permute.xlu0 %1142  ;;  %v1107_v37 = vmul.f32 %v1105_v0, %v1085_v36  ;;  %v1090_v16 = vadd.f32 %v1088_v42, %v1047_v17  ;;  %v1091_v19 = vadd.f32 %v1089_v60, %v1048_v7  ;;  %v1096_v48 = vadd.f32 %v1094_v45, %v1053_v28 }
 0x213   : > { %v1097_v56 = vadd.f32 %v1095_v22, %v1054_v35  ;;  %v1120_v57 = vmul.f32 %v1119_v1, %v1116_v27  ;;  %v1121_v12 = vmul.f32 %v1119_v1, %v1117_v41  ;;  %v1126_v24 = vmul.f32 %v1125_v5, %v1116_v27 }
 0x214   : > { %v1127_v61 = vmul.f32 %v1125_v5, %v1117_v41  ;;  %v1102_v23 = vadd.f32 %v1100_v9, %v1059_v49  ;;  %v1103_v11 = vadd.f32 %v1101_v10, %v1060_v6  ;;  %v1132_v25 = vmul.f32 %v4435_v44, %v1116_v27 }
 0x215   : > { %v4436_v50 = vmov %v4435_v44  ;;  %v1108_v7 = vadd.f32 %v1106_v13, %v1065_v2  ;;  %v1109_v42 = vadd.f32 %v1107_v37, %v1066_v58  ;;  %v4437_v28 = vstv %s4434_s30  ;;  %s4469_s30 = sld [smem:[#allocation64_spill]] }
 0x216   : > { %v1133_v0 = vmul.f32 %v4436_v50, %v1117_v41  ;;  %v1177_v17 = vpop.permute.xlu1 %1176  ;;  %v1175_v36 = vpop.permute.xlu0 %1174  ;;  %v1138_v35 = vmul.f32 %v4437_v28, %v1116_v27  ;;  %v4438_v60 = vmov %v4437_v28  ;;  %v1122_v22 = vadd.f32 %v1120_v57, %v1090_v16 }
 0x217   : > { %v1139_v45 = vmul.f32 %v4438_v60, %v1117_v41  ;;  %v1123_v1 = vadd.f32 %v1121_v12, %v1091_v19  ;;  %v1128_v29 = vadd.f32 %v1126_v24, %v1096_v48  ;;  %v1129_v33 = vadd.f32 %v1127_v61, %v1097_v56 }
 0x218   : > { %v1146_v5 = vsel %vm582_vm1, %v1143_v18, %v1145_v59  ;;  %v1147_v50 = vsel %vm582_vm1, %v1145_v59, %v1143_v18  ;;  %v1178_v58 = vsel %vm634_vm2, %v1175_v36, %v1177_v17  ;;  %v1179_v16 = vsel %vm634_vm2, %v1177_v17, %v1175_v36 }
 0x219   : > { %v1134_v24 = vadd.f32 %v1132_v25, %v1102_v23  ;;  %v1135_v12 = vadd.f32 %v1133_v0, %v1103_v11  ;;  %v1148_v56 = vmul.f32 %v1147_v50, %v2862_v51  ;;  %v1149_v27 = vmul.f32 %v1146_v5, %v2865_v52 }
 0x21a   : > { %v1209_v41 = vpop.permute.xlu1 %1208  ;;  %v1207_v49 = vpop.permute.xlu0 %1206  ;;  %v1140_v6 = vadd.f32 %v1138_v35, %v1108_v7  ;;  %v1141_v9 = vadd.f32 %v1139_v45, %v1109_v42  ;;  %v1180_v10 = vmul.f32 %v1179_v16, %v2879_v62  ;;  %v1181_v59 = vmul.f32 %v1178_v58, %v2882_v63 }
 0x21b   : > { %v4443_v18 = vstv %s4439_s10  ;;  %v4445_v23 = vstv %s4440_s22  ;;  %v4447_v52 = vstv %s4441_s21  ;;  %v1210_v44 = vsel %vm634_vm2, %v1207_v49, %v1209_v41  ;;  %s4470_s10 = sld [smem:[#allocation65_spill]]  ;;  %s4473_s22 = sld [smem:[#allocation66_spill]] }
 0x21c   : > { %v1152_v2 = vmul.f32 %v4443_v18, %v1148_v56  ;;  %v4444_v13 = vmov %v4443_v18  ;;  %v1158_v19 = vmul.f32 %v4445_v23, %v1148_v56  ;;  %v4446_v48 = vmov %v4445_v23  ;;  %s4474_s21 = sld [smem:[#allocation67_spill]] }
 0x21d   : > { %v1153_v37 = vmul.f32 %v4444_v13, %v1149_v27  ;;  %v1159_v51 = vmul.f32 %v4446_v48, %v1149_v27  ;;  %v1164_v57 = vmul.f32 %v4447_v52, %v1148_v56  ;;  %v4448_v61 = vmov %v4447_v52 }
 0x21e   : > { %v1165_v11 = vmul.f32 %v4448_v61, %v1149_v27  ;;  %v1211_v25 = vsel %vm634_vm2, %v1209_v41, %v1207_v49  ;;  %v1154_v0 = vadd.f32 %v1152_v2, %v1122_v22  ;;  %v4451_v36 = vstv %s4442_s8  ;;  %v1241_v35 = vpop.permute.xlu1 %1240  ;;  %v1239_v60 = vpop.permute.xlu0 %1238  ;;  %s4485_s8 = sld [smem:[#allocation68_spill]] }
 0x21f   : > { %v1155_v17 = vadd.f32 %v1153_v37, %v1123_v1  ;;  %v1170_v7 = vmul.f32 %v4451_v36, %v1148_v56  ;;  %v4452_v42 = vmov %v4451_v36  ;;  %v1160_v45 = vadd.f32 %v1158_v19, %v1128_v29 }
 0x220   : > { %v1171_v28 = vmul.f32 %v4452_v42, %v1149_v27  ;;  %v1161_v5 = vadd.f32 %v1159_v51, %v1129_v33  ;;  %v1166_v50 = vadd.f32 %v1164_v57, %v1134_v24  ;;  %v1167_v58 = vadd.f32 %v1165_v11, %v1135_v12 }
 0x221   : > { %v4453_v16 = vstv %s4401_s17  ;;  %v4455_v41 = vstv %s4449_s23  ;;  %v4457_v1 = vstv %s3438_s26  ;;  %v4459_v52 = vstv %s4450_s15  ;;  %s4462_s17 = sld [smem:[#allocation61_spill]]  ;;  %s4464_s26 = sld [smem:[#allocation63_spill]] }
 0x222   : > { %v1184_v18 = vmul.f32 %v4453_v16, %v1180_v10  ;;  %v4454_v13 = vmov %v4453_v16  ;;  %v1190_v49 = vmul.f32 %v4455_v41, %v1180_v10  ;;  %v4456_v22 = vmov %v4455_v41  ;;  %v1273_v19 = vpop.permute.xlu1 %1272  ;;  %v1271_v51 = vpop.permute.xlu0 %1270  ;;  %s4486_s23 = sld [smem:[#allocation69_spill]]  ;;  %s4487_s15 = sld [smem:[#allocation70_spill]] }
 0x223   : > { %v1185_v23 = vmul.f32 %v4454_v13, %v1181_v59  ;;  %v1191_v2 = vmul.f32 %v4456_v22, %v1181_v59  ;;  %v1196_v37 = vmul.f32 %v4457_v1, %v1180_v10  ;;  %v4458_v48 = vmov %v4457_v1 }
 0x224   : > { %v1197_v56 = vmul.f32 %v4458_v48, %v1181_v59  ;;  %v1202_v27 = vmul.f32 %v4459_v52, %v1180_v10  ;;  %v4460_v61 = vmov %v4459_v52  ;;  %v1172_v29 = vadd.f32 %v1170_v7, %v1140_v6 }
 0x225   : > { %v1203_v36 = vmul.f32 %v4460_v61, %v1181_v59  ;;  %v1173_v33 = vadd.f32 %v1171_v28, %v1141_v9  ;;  %v1186_v24 = vadd.f32 %v1184_v18, %v1154_v0  ;;  %v1187_v12 = vadd.f32 %v1185_v23, %v1155_v17 }
 0x226   : > { %v1192_v57 = vadd.f32 %v1190_v49, %v1160_v45  ;;  %v1193_v11 = vadd.f32 %v1191_v2, %v1161_v5  ;;  %v1198_v42 = vadd.f32 %v1196_v37, %v1166_v50  ;;  %v1199_v16 = vadd.f32 %v1197_v56, %v1167_v58  ;;  %v1433_v18 = vpop.permute.xlu1 %1432 }
 0x227   : > { %v1212_v10 = vmul.f32 %v1211_v25, %v2879_v62  ;;  %v1213_v59 = vmul.f32 %v1210_v44, %v2882_v63  ;;  %v1242_v6 = vsel %vm686_vm3, %v1239_v60, %v1241_v35  ;;  %v1243_v9 = vsel %vm686_vm3, %v1241_v35, %v1239_v60  ;;  %v1431_v35 = vpop.permute.xlu0 %1430 }
 0x228   : > { %v1204_v0 = vadd.f32 %v1202_v27, %v1172_v29  ;;  %v1205_v17 = vadd.f32 %v1203_v36, %v1173_v33  ;;  %v1244_v7 = vmul.f32 %v1243_v9, %v2907_v14  ;;  %v1245_v28 = vmul.f32 %v1242_v6, %v2910_v15 }
 0x229   : > { %v4465_v45 = vstv %s4461_s1  ;;  %v4467_v25 = vstv %s4462_s17  ;;  %v4471_v60 = vstv %s4463_s4  ;;  %v1274_v49 = vsel %vm686_vm3, %v1271_v51, %v1273_v19  ;;  %s3832_s1 = sld [smem:[#allocation12 + $0x44]]  ;;  %s3834_s17 = sld [smem:[#allocation12 + $0x45]] }
 0x22a   : > { %v1216_v5 = vmul.f32 %v4465_v45, %v1212_v10  ;;  %v4466_v50 = vmov %v4465_v45  ;;  %v1222_v63 = vmul.f32 %v4467_v25, %v1212_v10  ;;  %v4468_v44 = vmov %v4467_v25  ;;  %s3844_s4 = sld [smem:[#allocation12 + $0x46]] }
 0x22b   : > { %v1217_v62 = vmul.f32 %v4466_v50, %v1213_v59  ;;  %v1223_v58 = vmul.f32 %v4468_v44, %v1213_v59  ;;  %v1228_v13 = vmul.f32 %v4471_v60, %v1212_v10  ;;  %v4472_v23 = vmov %v4471_v60 }
 0x22c   : > { %v1229_v41 = vmul.f32 %v4472_v23, %v1213_v59  ;;  %v1275_v22 = vsel %vm686_vm3, %v1273_v19, %v1271_v51  ;;  %v1218_v2 = vadd.f32 %v1216_v5, %v1186_v24  ;;  %v4475_v37 = vstv %s4464_s26  ;;  %s3846_s26 = sld [smem:[#allocation12 + $0x47]] }
 0x22d   : > { %v1219_v1 = vadd.f32 %v1217_v62, %v1187_v12  ;;  %v1234_v48 = vmul.f32 %v4475_v37, %v1212_v10  ;;  %v4476_v56 = vmov %v4475_v37  ;;  %v1224_v27 = vadd.f32 %v1222_v63, %v1192_v57  ;;  %v1465_v63 = vpop.permute.xlu1 %1464 }
 0x22e   : > { %v1235_v52 = vmul.f32 %v4476_v56, %v1213_v59  ;;  %v1225_v61 = vadd.f32 %v1223_v58, %v1193_v11  ;;  %v1230_v36 = vadd.f32 %v1228_v13, %v1198_v42  ;;  %v1231_v29 = vadd.f32 %v1229_v41, %v1199_v16  ;;  %v1463_v58 = vpop.permute.xlu0 %1462 }
 0x22f   : > { %v4477_v33 = vstv %s4469_s30  ;;  %v4479_v50 = vstv %s4470_s10  ;;  %v4481_v19 = vstv %s4473_s22  ;;  %v4483_v5 = vstv %s4474_s21  ;;  %s2481_s10 = smov [#allocation15]  }
 0x230   : > { %v1248_v6 = vmul.f32 %v4477_v33, %v1244_v7  ;;  %v4478_v9 = vmov %v4477_v33  ;;  %v1254_v25 = vmul.f32 %v4479_v50, %v1244_v7  ;;  %v4480_v44 = vmov %v4479_v50  ;;  %s2383_s22 = sshll.u32 %s2481_s10, 4  ;;  %s2384_s22 = int_to_ptr.vmem [resolvable:$false] %s2383_s22 }
 0x231   : > { %v1249_v45 = vmul.f32 %v4478_v9, %v1245_v28  ;;  %v1255_v60 = vmul.f32 %v4480_v44, %v1245_v28  ;;  %v1260_v51 = vmul.f32 %v4481_v19, %v1244_v7  ;;  %v4482_v24 = vmov %v4481_v19  ;;  %s2385_s21 = scalar_lea.vmem %s2384_s22, 256 }
 0x232   : > { %v1261_v12 = vmul.f32 %v4482_v24, %v1245_v28  ;;  %v1266_v10 = vmul.f32 %v4483_v5, %v1244_v7  ;;  %v4484_v62 = vmov %v4483_v5  ;;  %v1236_v57 = vadd.f32 %v1234_v48, %v1204_v0  ;;  %v1495_v24 = vpop.permute.xlu0 %1494 }
 0x233   : > { %v1267_v59 = vmul.f32 %v4484_v62, %v1245_v28  ;;  %v1237_v11 = vadd.f32 %v1235_v52, %v1205_v17  ;;  %v1250_v42 = vadd.f32 %v1248_v6, %v1218_v2  ;;  %v1251_v16 = vadd.f32 %v1249_v45, %v1219_v1 }
 0x234   : > { %v1256_v13 = vadd.f32 %v1254_v25, %v1224_v27  ;;  %v1257_v23 = vadd.f32 %v1255_v60, %v1225_v61  ;;  %v1262_v41 = vadd.f32 %v1260_v51, %v1230_v36  ;;  %v1263_v37 = vadd.f32 %v1261_v12, %v1231_v29  ;;  %v1497_v51 = vpop.permute.xlu1 %1496 }
 0x235   : > { %v1276_v56 = vmul.f32 %v1275_v22, %v2907_v14  ;;  %v1277_v7 = vmul.f32 %v1274_v49, %v2910_v15  ;;  %v1434_v0 = vsel %vm802_vm4, %v1431_v35, %v1433_v18  ;;  %v1435_v17 = vsel %vm802_vm4, %v1433_v18, %v1431_v35 }
 0x236   : > { %v1268_v28 = vadd.f32 %v1266_v10, %v1236_v57  ;;  %v1269_v2 = vadd.f32 %v1267_v59, %v1237_v11  ;;  %v1436_v1 = vmul.f32 %v1434_v0, %v2921_v20  ;;  %v1437_v48 = vmul.f32 %v1435_v17, %v2924_v21 }
 0x237   : > { %v4488_v14 = vstv %s4485_s8  ;;  %v4490_v52 = vstv %s3472_s18  ;;  %v4492_v18 = vstv %s4486_s23  ;;  %v4494_v6 = vstv %s4487_s15  ;;  %s4510_s18 = sld [smem:[#allocation71_spill]] }
 0x238   : > { %v1280_v15 = vmul.f32 %v4488_v14, %v1276_v56  ;;  %v4489_v49 = vmov %v4488_v14  ;;  %v1286_v27 = vmul.f32 %v4490_v52, %v1276_v56  ;;  %v4491_v61 = vmov %v4490_v52 }
 0x239   : > { %v1281_v22 = vmul.f32 %v4489_v49, %v1277_v7  ;;  %v1287_v36 = vmul.f32 %v4491_v61, %v1277_v7  ;;  %v1292_v35 = vmul.f32 %v4492_v18, %v1276_v56  ;;  %v4493_v29 = vmov %v4492_v18 }
 0x23a   : > { %v1293_v33 = vmul.f32 %v4493_v29, %v1277_v7  ;;  %v1298_v9 = vmul.f32 %v4494_v6, %v1276_v56  ;;  %v4495_v45 = vmov %v4494_v6  ;;  %v1282_v25 = vadd.f32 %v1280_v15, %v1250_v42  ;;  %v1527_v6 = vpop.permute.xlu0 %1526 }
 0x23b   : > { %v1299_v50 = vmul.f32 %v4495_v45, %v1277_v7  ;;  %v1283_v44 = vadd.f32 %v1281_v22, %v1251_v16  ;;  %v1288_v60 = vadd.f32 %v1286_v27, %v1256_v13  ;;  %v1289_v19 = vadd.f32 %v1287_v36, %v1257_v23 }
 0x23c   : > { %v1294_v12 = vadd.f32 %v1292_v35, %v1262_v41  ;;  %v1295_v5 = vadd.f32 %v1293_v33, %v1263_v37  ;;  %v1300_v10 = vadd.f32 %v1298_v9, %v1268_v28  ;;  %v4496_v59 = vrot.slane %v3482_v34, %v2749_v26  ;;  %v1529_v33 = vpop.permute.xlu1 %1528 }
 0x23d   : > { %v1301_v62 = vadd.f32 %v1299_v50, %v1269_v2  ;;  %v4497_v11 = vrot.slane %v3482_v34, %v2754_v30  ;;  %v4498_v42 = vrot.slane %v3488_v39, %v2749_v26  ;;  %v4499_v13 = vrot.slane %v3488_v39, %v2754_v30 }
 0x23e   : > { %v1316_v57 = vadd.f32 %v4496_v59, %v1282_v25  ;;  %v4500_v41 = vrot.slane %v3497_v40, %v2749_v26  ;;  %v4501_v7 = vrot.slane %v3497_v40, %v2754_v30  ;;  %v4502_v0 = vrot.slane %v3500_v43, %v2749_v26 }
 0x23f   : > { %v1317_v56 = vadd.f32 %v4497_v11, %v1283_v44  ;;  %v1332_v16 = vadd.f32 %v4498_v42, %v1288_v60  ;;  %v1333_v23 = vadd.f32 %v4499_v13, %v1289_v19  ;;  %v4503_v39 = vrot.slane %v3500_v43, %v2754_v30 }
 0x240   : > { %v1348_v37 = vadd.f32 %v4500_v41, %v1294_v12  ;;  %v1349_v34 = vadd.f32 %v4501_v7, %v1295_v5  ;;  %v1364_v17 = vadd.f32 %v4502_v0, %v1300_v10  ;;  %v4504_v2 = vrot.slane %v3508_v31, %v2749_v26 }
 0x241   : > { %v1365_v28 = vadd.f32 %v4503_v39, %v1301_v62  ;;  %v4505_v40 = vrot.slane %v3508_v31, %v2754_v30  ;;  %v4506_v49 = vrot.slane %v3511_v46, %v2749_v26  ;;  %v4507_v52 = vrot.slane %v3511_v46, %v2754_v30 }
 0x242   : > { %v1380_v14 = vadd.f32 %v4504_v2, %v1316_v57  ;;  %v4508_v27 = vrot.slane %v3514_v4, %v2749_v26  ;;  %v4509_v36 = vrot.slane %v3514_v4, %v2754_v30  ;;  %v4511_v18 = vrot.slane %v3536_v55, %v2749_v26 }
 0x243   : > { %v1381_v15 = vadd.f32 %v4505_v40, %v1317_v56  ;;  %v1396_v22 = vadd.f32 %v4506_v49, %v1332_v16  ;;  %v1397_v43 = vadd.f32 %v4507_v52, %v1333_v23  ;;  %v4512_v46 = vrot.slane %v3536_v55, %v2754_v30  ;;  %v1559_v49 = vpop.permute.xlu0 %1558 }
 0x244   : > { %v1412_v61 = vadd.f32 %v4508_v27, %v1348_v37  ;;  %v1413_v31 = vadd.f32 %v4509_v36, %v1349_v34  ;;  %v1428_v35 = vadd.f32 %v4511_v18, %v1364_v17  ;;  %v1663_v9 = vstv %s3832_s1 }
 0x245   : > { %v1429_v29 = vadd.f32 %v4512_v46, %v1365_v28  ;;  %v1669_v45 = vstv %s3834_s17  ;;  %v1675_v50 = vstv %s3844_s4  ;;  %v1681_v25 = vstv %s3846_s26 }
 0x246   : > { %v4513_v4 = vstv %s3490_s12  ;;  %v1466_v26 = vsel %vm802_vm4, %v1463_v58, %v1465_v63  ;;  %v1467_v12 = vsel %vm802_vm4, %v1465_v63, %v1463_v58  ;;  %v4515_v30 = vstv %s3492_s16  ;;  %s4585_s12 = sld [smem:[#allocation88_spill]] }
 0x247   : > { %v1440_v44 = vmul.f32 %v4513_v4, %v1436_v1  ;;  %v4514_v60 = vmov %v4513_v4  ;;  %v1446_v55 = vmul.f32 %v4515_v30, %v1436_v1  ;;  %v4516_v5 = vmov %v4515_v30 }
 0x248   : > { %v1441_v19 = vmul.f32 %v4514_v60, %v1437_v48  ;;  %v1447_v10 = vmul.f32 %v4516_v5, %v1437_v48  ;;  %v4517_v62 = vstv %s4510_s18  ;;  %v4519_v16 = vstv %s3504_s3  ;;  %s4529_s3 = sld [smem:[#allocation74_spill]] }
 0x249   : > { %v1452_v59 = vmul.f32 %v4517_v62, %v1436_v1  ;;  %v4518_v57 = vmov %v4517_v62  ;;  %v1442_v56 = vadd.f32 %v1440_v44, %v1380_v14  ;;  %v1458_v13 = vmul.f32 %v4519_v16, %v1436_v1 }
 0x24a   : > { %v1453_v11 = vmul.f32 %v4518_v57, %v1437_v48  ;;  %v1443_v42 = vadd.f32 %v1441_v19, %v1381_v15  ;;  %v4520_v23 = vmov %v4519_v16  ;;  %v1468_v63 = vmul.f32 %v1466_v26, %v2921_v20  ;;  %v1561_v15 = vpop.permute.xlu1 %1560 }
 0x24b   : > { %v1459_v41 = vmul.f32 %v4520_v23, %v1437_v48  ;;  %v1469_v58 = vmul.f32 %v1467_v12, %v2924_v21  ;;  %v1498_v37 = vsel %vm854_vm5, %v1495_v24, %v1497_v51  ;;  %v1499_v7 = vsel %vm854_vm5, %v1497_v51, %v1495_v24 }
 0x24c   : > { %v1448_v34 = vadd.f32 %v1446_v55, %v1396_v22  ;;  %v1449_v0 = vadd.f32 %v1447_v10, %v1397_v43  ;;  %v1500_v1 = vmul.f32 %v1498_v37, %v2966_v8  ;;  %v1501_v48 = vmul.f32 %v1499_v7, %v2969_v3 }
 0x24d   : > { %v4521_v17 = vstv %s3516_s14  ;;  %v4523_v21 = vstv %s3518_s6  ;;  %v1454_v51 = vadd.f32 %v1452_v59, %v1412_v61  ;;  %v1455_v24 = vadd.f32 %v1453_v11, %v1413_v31  ;;  %s4538_s6 = sld [smem:[#allocation76_spill]]  ;;  %s4549_s14 = sld [smem:[#allocation79_spill]] }
 0x24e   : > { %v1472_v20 = vmul.f32 %v4521_v17, %v1468_v63  ;;  %v4522_v39 = vmov %v4521_v17  ;;  %v1478_v2 = vmul.f32 %v4523_v21, %v1468_v63  ;;  %v4524_v14 = vmov %v4523_v21 }
 0x24f   : > { %v1473_v28 = vmul.f32 %v4522_v39, %v1469_v58  ;;  %v1479_v40 = vmul.f32 %v4524_v14, %v1469_v58  ;;  %v4525_v22 = vstv %s3526_s2  ;;  %v1460_v36 = vadd.f32 %v1458_v13, %v1428_v35  ;;  %s4530_s2 = sld [smem:[#allocation75_spill]] }
 0x250   : > { %v1484_v52 = vmul.f32 %v4525_v22, %v1468_v63  ;;  %v4526_v43 = vmov %v4525_v22  ;;  %v1461_v18 = vadd.f32 %v1459_v41, %v1429_v29  ;;  %v4527_v46 = vstv %s3528_s5  ;;  %s4537_s5 = sld [smem:[#allocation57_spill]] }
 0x251   : > { %v1485_v27 = vmul.f32 %v4526_v43, %v1469_v58  ;;  %v1490_v4 = vmul.f32 %v4527_v46, %v1468_v63  ;;  %v4528_v44 = vmov %v4527_v46  ;;  %v1474_v19 = vadd.f32 %v1472_v20, %v1442_v56  ;;  %v1591_v63 = vpop.permute.xlu0 %1590 }
 0x252   : > { %v1491_v60 = vmul.f32 %v4528_v44, %v1469_v58  ;;  %v1475_v26 = vadd.f32 %v1473_v28, %v1443_v42  ;;  %v1530_v61 = vsel %vm854_vm5, %v1527_v6, %v1529_v33  ;;  %v1531_v31 = vsel %vm854_vm5, %v1529_v33, %v1527_v6  ;;  %v1593_v6 = vpop.permute.xlu1 %1592 }
 0x253   : > { %v1480_v12 = vadd.f32 %v1478_v2, %v1448_v34  ;;  %v1481_v30 = vadd.f32 %v1479_v40, %v1449_v0  ;;  %v4531_v55 = vstv %s4410_s11  ;;  %v1486_v10 = vadd.f32 %v1484_v52, %v1454_v51 }
 0x254   : > { %v1504_v35 = vmul.f32 %v4531_v55, %v1500_v1  ;;  %v4532_v29 = vmov %v4531_v55  ;;  %v1487_v62 = vadd.f32 %v1485_v27, %v1455_v24  ;;  %v4533_v59 = vstv %s4411_s28  ;;  %s4562_s28 = sld [smem:[#allocation80_spill]] }
 0x255   : > { %v1505_v5 = vmul.f32 %v4532_v29, %v1501_v48  ;;  %v1510_v57 = vmul.f32 %v4533_v59, %v1500_v1  ;;  %v4534_v11 = vmov %v4533_v59  ;;  %v1492_v42 = vadd.f32 %v1490_v4, %v1460_v36 }
 0x256   : > { %v1511_v56 = vmul.f32 %v4534_v11, %v1501_v48  ;;  %v1493_v16 = vadd.f32 %v1491_v60, %v1461_v18  ;;  %v4535_v13 = vstv %s4529_s3  ;;  %v1506_v58 = vadd.f32 %v1504_v35, %v1474_v19 }
 0x257   : > { %v1516_v23 = vmul.f32 %v4535_v13, %v1500_v1  ;;  %v4536_v41 = vmov %v4535_v13  ;;  %v1507_v37 = vadd.f32 %v1505_v5, %v1475_v26  ;;  %v4539_v7 = vstv %s4530_s2 }
 0x258   : > { %v1517_v33 = vmul.f32 %v4536_v41, %v1501_v48  ;;  %v1522_v34 = vmul.f32 %v4539_v7, %v1500_v1  ;;  %v4540_v0 = vmov %v4539_v7  ;;  %v1532_v20 = vmul.f32 %v1530_v61, %v2966_v8 }
 0x259   : > { %v1523_v17 = vmul.f32 %v4540_v0, %v1501_v48  ;;  %v1533_v39 = vmul.f32 %v1531_v31, %v2969_v3  ;;  %v1562_v28 = vsel %vm906_vm6, %v1559_v49, %v1561_v15  ;;  %v1563_v21 = vsel %vm906_vm6, %v1561_v15, %v1559_v49  ;;  %v1625_v31 = vpop.permute.xlu1 %1624 }
 0x25a   : > { %v1512_v2 = vadd.f32 %v1510_v57, %v1480_v12  ;;  %v1513_v14 = vadd.f32 %v1511_v56, %v1481_v30  ;;  %v1564_v1 = vmul.f32 %v1562_v28, %v3004_v54  ;;  %v1565_v48 = vmul.f32 %v1563_v21, %v3007_v53  ;;  %v1623_v12 = vpop.permute.xlu0 %1622 }
 0x25b   : > { %v4541_v40 = vstv %s4537_s5  ;;  %v4543_v3 = vstv %s4538_s6  ;;  %v1518_v27 = vadd.f32 %v1516_v23, %v1486_v10  ;;  %v1519_v36 = vadd.f32 %v1517_v33, %v1487_v62 }
 0x25c   : > { %v1536_v8 = vmul.f32 %v4541_v40, %v1532_v20  ;;  %v4542_v51 = vmov %v4541_v40  ;;  %v1542_v22 = vmul.f32 %v4543_v3, %v1532_v20  ;;  %v4544_v52 = vmov %v4543_v3 }
 0x25d   : > { %v1537_v24 = vmul.f32 %v4542_v51, %v1533_v39  ;;  %v1543_v43 = vmul.f32 %v4544_v52, %v1533_v39  ;;  %v1524_v15 = vadd.f32 %v1522_v34, %v1492_v42  ;;  %v1525_v49 = vadd.f32 %v1523_v17, %v1493_v16 }
 0x25e   : > { %v4545_v18 = vstv %s3571_s0  ;;  %v4547_v60 = vstv %s4417_s13  ;;  %v1538_v30 = vadd.f32 %v1536_v8, %v1506_v58  ;;  %v1594_v35 = vsel %vm906_vm6, %v1591_v63, %v1593_v6  ;;  %v1657_v8 = vpop.permute.xlu1 %1656  ;;  %v1655_v51 = vpop.permute.xlu0 %1654  ;;  %s4560_s0 = sld [smem:[#allocation72_spill]] }
 0x25f   : > { %v1548_v46 = vmul.f32 %v4545_v18, %v1532_v20  ;;  %v4546_v4 = vmov %v4545_v18  ;;  %v1554_v19 = vmul.f32 %v4547_v60, %v1532_v20  ;;  %v4548_v26 = vmov %v4547_v60 }
 0x260   : > { %v1549_v44 = vmul.f32 %v4546_v4, %v1533_v39  ;;  %v1555_v61 = vmul.f32 %v4548_v26, %v1533_v39  ;;  %v1539_v55 = vadd.f32 %v1537_v24, %v1507_v37  ;;  %v1595_v29 = vsel %vm906_vm6, %v1593_v6, %v1591_v63 }
 0x261   : > { %v1544_v5 = vadd.f32 %v1542_v22, %v1512_v2  ;;  %v1545_v10 = vadd.f32 %v1543_v43, %v1513_v14  ;;  %v4550_v62 = vstv %s3582_s24  ;;  %v4552_v56 = vstv %s4418_s20  ;;  %s4561_s24 = sld [smem:[#allocation73_spill]] }
 0x262   : > { %v1568_v59 = vmul.f32 %v4550_v62, %v1564_v1  ;;  %v4551_v57 = vmov %v4550_v62  ;;  %v1574_v42 = vmul.f32 %v4552_v56, %v1564_v1  ;;  %v4553_v16 = vmov %v4552_v56 }
 0x263   : > { %v1569_v11 = vmul.f32 %v4551_v57, %v1565_v48  ;;  %v1575_v13 = vmul.f32 %v4553_v16, %v1565_v48  ;;  %v4554_v23 = vstv %s3590_s29  ;;  %v1550_v37 = vadd.f32 %v1548_v46, %v1518_v27 }
 0x264   : > { %v1580_v41 = vmul.f32 %v4554_v23, %v1564_v1  ;;  %v4555_v33 = vmov %v4554_v23  ;;  %v1551_v7 = vadd.f32 %v1549_v44, %v1519_v36  ;;  %v1556_v34 = vadd.f32 %v1554_v19, %v1524_v15 }
 0x265   : > { %v1581_v58 = vmul.f32 %v4555_v33, %v1565_v48  ;;  %v1557_v6 = vadd.f32 %v1555_v61, %v1525_v49  ;;  %v1570_v63 = vadd.f32 %v1568_v59, %v1538_v30  ;;  %v1571_v0 = vadd.f32 %v1569_v11, %v1539_v55 }
 0x266   : > { %v4556_v17 = vstv %s4549_s14  ;;  %v1596_v21 = vmul.f32 %v1594_v35, %v3004_v54  ;;  %v1597_v2 = vmul.f32 %v1595_v29, %v3007_v53  ;;  %v1626_v14 = vsel %vm958_vm7, %v1623_v12, %v1625_v31 }
 0x267   : > { %v1586_v20 = vmul.f32 %v4556_v17, %v1564_v1  ;;  %v4557_v39 = vmov %v4556_v17  ;;  %v1627_v40 = vsel %vm958_vm7, %v1625_v31, %v1623_v12  ;;  %v1576_v24 = vadd.f32 %v1574_v42, %v1544_v5 }
 0x268   : > { %v1587_v28 = vmul.f32 %v4557_v39, %v1565_v48  ;;  %v1577_v1 = vadd.f32 %v1575_v13, %v1545_v10  ;;  %v1582_v3 = vadd.f32 %v1580_v41, %v1550_v37  ;;  %v1583_v48 = vadd.f32 %v1581_v58, %v1551_v7 }
 0x269   : > { %v4558_v54 = vstv %s3598_s25  ;;  %v1628_v43 = vmul.f32 %v1626_v14, %v3047_v47  ;;  %v1629_v27 = vmul.f32 %v1627_v40, %v3050_v32  ;;  %v1588_v36 = vadd.f32 %v1586_v20, %v1556_v34  ;;  %s4582_s25 = sld [smem:[#allocation29_spill]] }
 0x26a   : > { %v1600_v53 = vmul.f32 %v4558_v54, %v1596_v21  ;;  %v4559_v22 = vmov %v4558_v54  ;;  %v1589_v15 = vadd.f32 %v1587_v28, %v1557_v6  ;;  %v1658_v49 = vsel %vm958_vm7, %v1655_v51, %v1657_v8 }
 0x26b   : > { %v1601_v52 = vmul.f32 %v4559_v22, %v1597_v2  ;;  %v1659_v18 = vsel %vm958_vm7, %v1657_v8, %v1655_v51  ;;  %v4563_v46 = vstv %s3600_s19  ;;  %v4565_v19 = vstv %s3606_s27  ;;  %s4577_s19 = sld [smem:[#allocation26_spill]] }
 0x26c   : > { %v1606_v4 = vmul.f32 %v4563_v46, %v1596_v21  ;;  %v4564_v44 = vmov %v4563_v46  ;;  %v1612_v26 = vmul.f32 %v4565_v19, %v1596_v21  ;;  %v4566_v61 = vmov %v4565_v19 }
 0x26d   : > { %v1607_v60 = vmul.f32 %v4564_v44, %v1597_v2  ;;  %v1613_v31 = vmul.f32 %v4566_v61, %v1597_v2  ;;  %v1602_v12 = vadd.f32 %v1600_v53, %v1570_v63  ;;  %v1603_v30 = vadd.f32 %v1601_v52, %v1571_v0 }
 0x26e   : > { %v4567_v55 = vstv %s3608_s9  ;;  %v4569_v10 = vstv %s3614_s7  ;;  %v4571_v57 = vstv %s4560_s0  ;;  %v4573_v16 = vstv %s4561_s24  ;;  %s4578_s9 = sld [smem:[#allocation36_spill]]  ;;  %s4580_s7 = sld [smem:[#allocation31_spill]] }
 0x26f   : > { %v1618_v35 = vmul.f32 %v4567_v55, %v1596_v21  ;;  %v4568_v29 = vmov %v4567_v55  ;;  %v1632_v62 = vmul.f32 %v4569_v10, %v1628_v43  ;;  %v4570_v38 = vmov %v4569_v10  ;;  %p4586_p5 = scmp.ne.s32.totalorder %s4582_s25, 0 }
 0x270   : > { %v1619_v5 = vmul.f32 %v4568_v29, %v1597_v2  ;;  %v1633_v59 = vmul.f32 %v4570_v38, %v1629_v27  ;;  %v1638_v11 = vmul.f32 %v4571_v57, %v1628_v43  ;;  %v4572_v56 = vmov %v4571_v57 }
 0x271   : > { %v1639_v42 = vmul.f32 %v4572_v56, %v1629_v27  ;;  %v1644_v13 = vmul.f32 %v4573_v16, %v1628_v43  ;;  %v4574_v23 = vmov %v4573_v16  ;;  %v4575_v33 = vstv %s4562_s28  ;;  %s2111_s27 = sshll.u32 %s4577_s19, 7 }
 0x272   : > { %v1645_v41 = vmul.f32 %v4574_v23, %v1629_v27  ;;  %v1650_v58 = vmul.f32 %v4575_v33, %v1628_v43  ;;  %v4576_v37 = vmov %v4575_v33  ;;  %v1608_v34 = vadd.f32 %v1606_v4, %v1576_v24  ;;  %s4092_s16 = scalar_lea.hbm %s4585_s12, %s2111_s27 }
 0x273   : > { %v1651_v7 = vmul.f32 %v4576_v37, %v1629_v27  ;;  %v1609_v6 = vadd.f32 %v1607_v60, %v1577_v1  ;;  %v1614_v63 = vadd.f32 %v1612_v26, %v1582_v3  ;;  %v1615_v0 = vadd.f32 %v1613_v31, %v1583_v48  ;;  %v4583_v37 = vld [vmem:[#allocation34_spill] sm:$0xff] }
 0x274   : > { %v1620_v17 = vadd.f32 %v1618_v35, %v1588_v36  ;;  %v1621_v20 = vadd.f32 %v1619_v5, %v1589_v15  ;;  %v1634_v39 = vadd.f32 %v1632_v62, %v1602_v12  ;;  %v1635_v28 = vadd.f32 %v1633_v59, %v1603_v30  ;;  %s1814_s11 = sshll.u32 %s4578_s9, 4  ;;  %s1800_s29 = scalar_lea.sflag [#allocation4], %s4580_s7  ;;  %s4094_s11 = int_to_ptr.vmem [resolvable:$true] %s1814_s11 }
 0x275   : > { %v1640_v21 = vadd.f32 %v1638_v11, %v1608_v34  ;;  %v1641_v2 = vadd.f32 %v1639_v42, %v1609_v6  ;;  %v1660_v14 = vmul.f32 %v1658_v49, %v3047_v47  ;;  %v1661_v40 = vmul.f32 %v1659_v18, %v3050_v32  ;;  %v4579_v42 = vld [vmem:[#allocation33_spill] sm:$0xff]  ;;  %s2379_s30 = scalar_lea.vmem %s4094_s11, 128  ;;  %p2386_p11 = scmp.lt.s32.totalorder %s4094_s11, %s2384_s22 }
 0x276   : > { %v1646_v8 = vadd.f32 %v1644_v13, %v1614_v63  ;;  %v1647_v51 = vadd.f32 %v1645_v41, %v1615_v0  ;;  %v1652_v24 = vadd.f32 %v1650_v58, %v1620_v17  ;;  %v1653_v1 = vadd.f32 %v1651_v7, %v1621_v20  ;;  %v4581_v41 = vld [vmem:[#allocation32_spill] sm:$0xff]  ;;  %p2380_p2 = scmp.ne.s32.totalorder %s4094_s11, %s2379_s30  ;;  %p2387_p7 = scmp.lt.s32.totalorder %s2385_s21, %s2379_s30 }
 0x277   : > { %v1664_v3 = vmul.f32 %v1663_v9, %v1660_v14  ;;  %v1665_v48 = vmul.f32 %v1663_v9, %v1661_v40  ;;  %v1670_v54 = vmul.f32 %v1669_v45, %v1660_v14  ;;  %v1671_v53 = vmul.f32 %v1669_v45, %v1661_v40 }
 0x278   : > { %v1676_v22 = vmul.f32 %v1675_v50, %v1660_v14  ;;  %v1677_v52 = vmul.f32 %v1675_v50, %v1661_v40  ;;  %v1682_v47 = vmul.f32 %v1681_v25, %v1660_v14  ;;  %v1683_v32 = vmul.f32 %v1681_v25, %v1661_v40  ;;  %p2381_p9 = pnand %p2380_p2, %p4586_p5  ;;  %p2388_p4 = por %p2387_p7, %p2386_p11 }
 0x279   : > { %v1666_v43 = vadd.f32 %v1664_v3, %v1634_v39  ;;  %v1667_v27 = vadd.f32 %v1665_v48, %v1635_v28  ;;  %v1672_v36 = vadd.f32 %v1670_v54, %v1640_v21  ;;  %v1673_v15 = vadd.f32 %v1671_v53, %v1641_v2 }
 0x27a   : > { %v1678_v49 = vadd.f32 %v1676_v22, %v1646_v8  ;;  %v1679_v18 = vadd.f32 %v1677_v52, %v1647_v51  ;;  %v1684_v46 = vadd.f32 %v1682_v47, %v1652_v24  ;;  %v1685_v9 = vadd.f32 %v1683_v32, %v1653_v1  ;;  %p2382_p10 = pneg %p2381_p9 }
 0x27b   : > { %v1723_v4 = vmul.f32 0.5, %v1666_v43  ;;  %v1724_v44 = vmul.f32 0.5, %v1667_v27  ;;  %v1761_v60 = vmul.f32 0.5, %v1672_v36  ;;  %v1762_v19 = vmul.f32 0.5, %v1673_v15 }
 0x27c   : > { %v1740_v45 = vcombine.low %v1678_v49, %v1679_v18  ;;  %v1778_v26 = vcombine.low %v1684_v46, %v1685_v9  ;;  %p2389_p13 = pnand %p2388_p4, %p2382_p10 }
 0x27d   : > { %2230 = vtanh.f32 %v1723_v4 }
 0x27e   : > { %2232 = vtanh.f32 %v1724_v44 }
 0x27f   : > { %2234 = vtanh.f32 %v1761_v60 }
 0x280   : > { %2236 = vtanh.f32 %v1762_v19 }
 0x287   : > { %v2231_v50 = vpop.eup %2230 }
 0x288   : > { %v2233_v25 = vpop.eup %2232  ;;  %v1727_v61 = vmul.f32 0.8, %v2231_v50 }
 0x289   : > { %v2235_v31 = vpop.eup %2234  ;;  %v1728_v12 = vmul.f32 0.8, %v2233_v25 }
 0x28a   : > { %v2237_v30 = vpop.eup %2236  ;;  %v1729_v55 = vmul.f32 1.442695, %v1727_v61  ;;  %v1765_v35 = vmul.f32 0.8, %v2235_v31 }
 0x28b   : > { %v1731_v29 = vmul.f32 1.442695, %v1728_v12  ;;  %v1766_v5 = vmul.f32 0.8, %v2237_v30 }
 0x28c   : > { %2238 = vpow2.f32 %v1729_v55  ;;  %v1767_v10 = vmul.f32 1.442695, %v1765_v35 }
 0x28d   : > { %2240 = vpow2.f32 %v1731_v29  ;;  %v1769_v62 = vmul.f32 1.442695, %v1766_v5 }
 0x28e   : > { %2242 = vpow2.f32 %v1767_v10 }
 0x28f   : > { %2244 = vpow2.f32 %v1769_v62 }
 0x296   : > { %v2239_v38 = vpop.eup %2238 }
 0x297   : > { %v2241_v59 = vpop.eup %2240 }
 0x298   : > { %v2243_v57 = vpop.eup %2242  ;;  %v1735_v11 = vcombine.low %v2239_v38, %v2241_v59 }
 0x299   : > { %v2245_v56 = vpop.eup %2244 }
 0x29a   : > { %v1737_v16 = vmul.f32 %v1735_v11, %v4579_v42  ;;  %v1773_v13 = vcombine.low %v2243_v57, %v2245_v56 }
 0x29c   : > { %v1742_v23 = vadd.f32 %v1740_v45, %v1737_v16  ;;  %v1775_v33 = vmul.f32 %v1773_v13, %v4581_v41 }
 0x29e   : > { %v1780_v58 = vadd.f32 %v1778_v26, %v1775_v33  ;;  %v1750_v7 = vrot.slane %v1742_v23, %v4583_v37 }
 0x2a0   : > { %v1757_v34 = vrot.slane %v1750_v7, %v4583_v37  ;;  %v1788_v6 = vrot.slane %v1780_v58, %v4583_v37 }
 0x2a2   : > { %2103 = vst.msk [vmem:[%s4578_s9 + $0x2] ss:$4 sm:$0x3] %vm3336_vm8, %v1757_v34  ;;  %v1795_v0 = vrot.slane %v1788_v6, %v4583_v37 }
 0x2a4   : > { %2104 = vst.msk [vmem:[%s4578_s9 + $0x3] ss:$4 sm:$0x3] %vm3336_vm8, %v1795_v0 }
 0x2a5   : > { %2392 = shalt.err (!%p2389_p13)
}
 0x2a6   : > { %s2393_s8 = scalar_lea.hbm %s4092_s16, 128  ;;  %s2397_s1 = scalar_lea.hbm %s4585_s12, 256 }
 0x2a7   : > { %p2394_p0 = scmp.ne.s32.totalorder %s4092_s16, %s2393_s8  ;;  %p2398_p1 = scmp.lt.u32.totalorder %s4092_s16, %s4585_s12 }
 0x2a8   : > { %p2399_p6 = scmp.lt.u32.totalorder %s2397_s1, %s2393_s8  ;;  %p2401_p2 = scmp.lt.u32.totalorder %s2393_s8, %s4092_s16 }
 0x2a9   : > { %p2395_p8 = pnand %p2394_p0, %p4586_p5 }
 0x2aa   : > { %p2400_p3 = por %p2399_p6, %p2398_p1 }
 0x2ab   : > { %p2396_p12 = pneg %p2395_p8 }
 0x2ac   : > { %p2402_p9 = por %p2401_p2, %p2400_p3 }
 0x2ae   : > { %p2403_p10 = pnand %p2402_p9, %p2396_p12 }
 0x2b0   : > { %2406 = shalt.err (!%p2403_p10)
}
 0x2b1   : > { %2138 = dma.vmem_to_hbm [thread:$0]  (%p4586_p5), %s4094_s11, 128, %s4092_s16, %s1800_s29  }
 0x2b2 PF: > { %s4587_s26 = sld [smem:[#allocation22_spill]]  ;;  %s4588_s18 = sld [smem:[#allocation30_spill]] }
 0x2b3   : > { %s4589_s3 = sld [smem:[#allocation25_spill]] }
 0x2b8   : > { %s1826_s2 = sand.u32 1, %s4587_s26   ;;  %p4590_p11 = scmp.ne.s32.totalorder %s4588_s18, 0 }
 0x2b9   : > { %p4591_p7 = scmp.ge.s32.totalorder %s4589_s3, 2  ;;  %s1827_s5 = scalar_lea.sflag [#allocation4], %s1826_s2 }
 0x2bb   : > { %p2164_p4 = pnand %p4591_p7, %p4590_p11 }
 0x2bd   : > { %2444 = dma.done.wait (!%p2164_p4), %s1827_s5, 128  }
 0x2be   : > { %2446 = vsyncadd (!%p2164_p4), %s1827_s5, 4294967168  ;;  %s4592_s27 = sld [smem:[#allocation27_spill]]  ;;  %s4593_s24 = sld [smem:[#allocation23_spill]] }
 0x2bf   : > { %s4594_s25 = sld [smem:[#allocation24_spill]]  ;;  %s4595_s26 = sld [smem:[#allocation28_spill]] }
 0x2c4   : > { %p24_p13 = scmp.ge.s32.totalorder %s4592_s27, 4  }
 0x2c6   :  { %26 = sbr.rel (!%p24_p13) target bundleno = 18 (0x12), region = 128 }
 0x2cd   :  { %1832 = vsyncpa [#allocation3], 1 }
 0x2ce   :  { %1834 = vsyncpa [#allocation3 + $0x1], 1 }
 0x2cf   :  { %1835 = vsyncpa [#allocation7], 1 }
 0x2d0   :  { %1836 = vsyncpa [#allocation4], 1 }
 0x2d1   :  { %1838 = vsyncpa [#allocation4 + $0x1], 1 }
 0x2d2   :  { %1839 = vsyncpa [#allocation5], 1 }
 0x2d3   :  { %1841 = vsyncpa [#allocation5 + $0x1], 1 }
 0x2d4   :  { %1842 = vsyncpa [#allocation10], 1 }
 0x2d5   :  { %1843 = vsyncpa [#allocation13], 1 }

</bundles_post_ra>
